<compile_context>
chip_gen: v7x
topology: tpu7x:2x2x1
jax: 0.10.0
libtpu: 0.0.40
codegen_flags: <defaults>
</compile_context>

<pallas_src>
import jax
import jax.numpy as jnp
from jax import lax
from jax.experimental import pallas as pl
from jax.experimental.pallas import tpu as pltpu

_F_IN = 10            # DocTower fc in_features
_FOLD = 8             # batches folded per matmul row (kernel path needs B % 8 == 0)
_TARGET_ROWS = 8192   # folded rows per grid step (= 64K batches / step)
_MIN_KERNEL_BATCH = 16384   # below this a fused XLA dot is strictly faster


def _cdiv(a, b):
    return -(-a // b)


def _doc_tower_kernel(x2_ref, w2_ref, b_ref, o_ref):
    """One grid step:  (TBr, 80) @ (80, 8) + b  ->  (TBr, 8).

    x2_ref: (TBr, F*FOLD) VMEM   -- 8 batches per row, natural row-major data
    w2_ref: (F*FOLD, FOLD) VMEM  -- block-diagonal kron(I_FOLD, w^T), resident
    b_ref : (1, 1) SMEM          -- bias scalar
    o_ref : (TBr, FOLD) VMEM     -- o[r, j] == y[FOLD*r + j]
    """
    if x2_ref.dtype == jnp.float32:
        # Full-precision f32 MXU passes; bf16 inputs are single-pass exact.
        precision = lax.Precision.HIGHEST
    else:
        precision = None
    acc = jnp.dot(x2_ref[...], w2_ref[...],
                  preferred_element_type=jnp.float32, precision=precision)
    o_ref[...] = (acc + b_ref[0, 0]).astype(o_ref.dtype)


def doc_tower_forward(x, weight, bias):
    """DocTower forward: y = x @ weight.T + bias.

    x: [B, 10] (float32 or bfloat16); weight: [1, 10] f32; bias: [1] f32.
    Returns [B, 1] in x.dtype.
    """
    B, F = x.shape
    O = weight.shape[0]
    assert O == 1 and F == _F_IN, "DocTower is Linear(10, 1)"

    # Small / non-foldable batches: a standalone kernel is launch-overhead
    # dominated (~160 FLOPs at B=8); let XLA fuse the 10-wide dot into the
    # caller instead.
    # TODO(synk): for huge B with B % 8 != 0, run the kernel on the first
    # B - B % 8 rows and this fused path on the tail instead of falling back.
    if B < _MIN_KERNEL_BATCH or B % _FOLD != 0:
        return (x @ weight.T + bias[None, :]).astype(x.dtype)

    # Free, layout-preserving reshape: 8 batches per row, 80 lanes.  No copy,
    # no transpose, no padding (this removes the old ~3x HBM-traffic wrapper).
    R = B // _FOLD
    x2 = x.reshape(R, _FOLD * F)

    # Tiny (80, 8) block-diagonal weight: W2[10*i + k, j] = w[k] if i == j.
    w2 = jnp.kron(jnp.eye(_FOLD, dtype=jnp.float32), weight.reshape(F, 1))
    w2 = w2.astype(x.dtype)
    b2d = bias.reshape(1, 1).astype(jnp.float32)

    # Row-block per grid step: target ~64K batches so the ~0.35 us/step
    # pipeline overhead is small vs per-step HBM time, while double-buffered
    # in+out VMEM stays ~16 MiB (fits v7x's 64 MiB; v5e/v6e have 128 MiB and
    # could raise _TARGET_ROWS further).  Keep >= 2 (even) grid steps so
    # ("parallel",) can shard across both v7x TensorCores.
    n_blocks = max(2, _cdiv(R, _TARGET_ROWS))
    if n_blocks % 2:
        n_blocks += 1
    tbr = _cdiv(R, n_blocks)
    tbr = _cdiv(tbr, 16) * 16          # sublane multiple for f32 and bf16
    grid_n = _cdiv(R, tbr)             # Pallas masks the partial edge block

    out2 = pl.pallas_call(
        _doc_tower_kernel,
        out_shape=jax.ShapeDtypeStruct((R, _FOLD), x.dtype),
        grid_spec=pl.GridSpec(
            grid=(grid_n,),
            in_specs=[
                pl.BlockSpec((tbr, _FOLD * F), lambda i: (i, 0)),
                pl.BlockSpec((_FOLD * F, _FOLD), lambda i: (0, 0)),  # resident
                pl.BlockSpec(memory_space=pltpu.MemorySpace.SMEM),
            ],
            out_specs=pl.BlockSpec((tbr, _FOLD), lambda i: (i, 0)),
        ),
        compiler_params=pltpu.CompilerParams(
            dimension_semantics=("parallel",),
            vmem_limit_bytes=32 * 1024 * 1024,
        ),
    )(x2, w2, b2d)

    # Free bitcast back to the PyTorch layout [B, 1].
    return out2.reshape(B, 1)


def _reference_forward(x, weight, bias):
    return x @ weight.T + bias[None, :]


if __name__ == "__main__":
    key = jax.random.PRNGKey(0)
    k_w, k_b, k_x0, k_x1, k_x2 = jax.random.split(key, 5)

    IN_F, OUT_F = 10, 1
    # PyTorch Linear default init: U(-1/sqrt(in), +1/sqrt(in)), deterministic.
    bound = 1.0 / (IN_F ** 0.5)
    weight = jax.random.uniform(k_w, (OUT_F, IN_F), jnp.float32, -bound, bound)
    bias = jax.random.uniform(k_b, (OUT_F,), jnp.float32, -bound, bound)

    # 1) Tiny production-like batch -> fused XLA path (no kernel launch).
    x_small = jax.random.normal(k_x0, (8, IN_F), jnp.float32)
    out_small = jax.block_until_ready(doc_tower_forward(x_small, weight, bias))
    ref_small = _reference_forward(x_small, weight, bias)
    assert out_small.shape == (8, OUT_F)
    assert jnp.allclose(out_small, ref_small, atol=1e-5, rtol=1e-5)

    # 2) Large f32 batch -> Pallas kernel (2 parallel grid steps, exact tiling).
    #    Tolerance kept modest to be robust to MXU f32-pass behaviour across
    #    generations; with Precision.HIGHEST the actual error is ~1e-6.
    B1 = 20480
    x1 = jax.random.normal(k_x1, (B1, IN_F), jnp.float32)
    out1 = jax.block_until_ready(doc_tower_forward(x1, weight, bias))
    ref1 = _reference_forward(x1, weight, bias)
    assert out1.shape == (B1, OUT_F)
    assert jnp.allclose(out1, ref1, atol=1e-2, rtol=1e-2)

    # 3) Large bf16 batch where the row block does not divide the folded rows
    #    (exercises Pallas edge-block masking) + the bf16 input path.
    B2 = 33000
    x2_f32 = jax.random.normal(k_x2, (B2, IN_F), jnp.float32)
    x2_bf16 = x2_f32.astype(jnp.bfloat16)
    out2 = jax.block_until_ready(doc_tower_forward(x2_bf16, weight, bias))
    ref2 = _reference_forward(
        x2_bf16.astype(jnp.float32),
        weight.astype(jnp.bfloat16).astype(jnp.float32),
        bias,
    )
    assert out2.shape == (B2, OUT_F)
    assert jnp.allclose(out2.astype(jnp.float32), ref2, atol=3e-2, rtol=3e-2)

    print("KERNEL_OK")
</pallas_src>

<mosaic_0001>
module attributes {stable_mosaic.version = 11 : i64} {
  func.func @_doc_tower_kernel(%arg0: i32, %arg1: memref<1280x80xf32, #tpu.memory_space<vmem>>, %arg2: memref<80x8xf32, #tpu.memory_space<vmem>>, %arg3: memref<1x1xf32, #tpu.memory_space<smem>>, %arg4: memref<1280x8xf32, #tpu.memory_space<vmem>>) attributes {dimension_semantics = [#tpu.dimension_semantics<parallel>], iteration_bounds = array<i64: 2>, scalar_prefetch = 0 : i64, scratch_operands = 0 : i64, tpu.core_type = #tpu.core_type<tc>, window_params = [{transform_indices = @transform_0, window_bounds = array<i64: 1280, 80>}, {pipeline_mode = #tpu.pipeline_mode<synchronous>, transform_indices = @transform_1, window_bounds = array<i64: 80, 8>}, {transform_indices = @transform_2, window_bounds = array<i64: 1, 1>}, {transform_indices = @transform_3, window_bounds = array<i64: 1280, 8>}]} {
    %c0 = arith.constant 0 : index
    %c0_0 = arith.constant 0 : index
    %0 = vector.load %arg1[%c0, %c0_0] : memref<1280x80xf32, #tpu.memory_space<vmem>>, vector<1280x80xf32>
    %c0_1 = arith.constant 0 : index
    %c0_2 = arith.constant 0 : index
    %1 = vector.load %arg2[%c0_1, %c0_2] : memref<80x8xf32, #tpu.memory_space<vmem>>, vector<80x8xf32>
    %cst = arith.constant dense<0.000000e+00> : vector<1280x8xf32>
    %2 = tpu.matmul %0, %1, %cst {dimension_numbers = #tpu.dot_dimension_numbers<[1], [0], [0], [1], [0, 0, 1, 1], [], []>, precision = #tpu.contract_precision<fp32>} : vector<1280x80xf32>, vector<80x8xf32>, vector<1280x8xf32> -> vector<1280x8xf32>
    %c0_3 = arith.constant 0 : index
    %c0_4 = arith.constant 0 : index
    %3 = memref.load %arg3[%c0_3, %c0_4] : memref<1x1xf32, #tpu.memory_space<smem>>
    %4 = vector.broadcast %3 : f32 to vector<1280x8xf32>
    %5 = arith.addf %2, %4 : vector<1280x8xf32>
    %c0_5 = arith.constant 0 : index
    %c0_6 = arith.constant 0 : index
    %6 = vector.load %arg4[%c0_5, %c0_6] : memref<1280x8xf32, #tpu.memory_space<vmem>>, vector<1280x8xf32>
    tpu.vector_store %arg4[%c0_5, %c0_6], %5 {strides = array<i32>} : memref<1280x8xf32, #tpu.memory_space<vmem>>, vector<1280x8xf32>,
    return
  }
  func.func @transform_0(%arg0: i32) -> (i32, i32) {
    %c0_i32 = arith.constant 0 : i32
    %c0_i32_0 = arith.constant 0 : i32
    return %arg0, %c0_i32 : i32, i32
  }
  func.func @transform_1(%arg0: i32) -> (i32, i32) {
    %c0_i32 = arith.constant 0 : i32
    %c0_i32_0 = arith.constant 0 : i32
    %c0_i32_1 = arith.constant 0 : i32
    return %c0_i32, %c0_i32_0 : i32, i32
  }
  func.func @transform_2(%arg0: i32) -> (i32, i32) {
    %c0_i32 = arith.constant 0 : i32
    %c0_i32_0 = arith.constant 0 : i32
    %c0_i32_1 = arith.constant 0 : i32
    return %c0_i32, %c0_i32_0 : i32, i32
  }
  func.func @transform_3(%arg0: i32) -> (i32, i32) {
    %c0_i32 = arith.constant 0 : i32
    %c0_i32_0 = arith.constant 0 : i32
    return %arg0, %c0_i32 : i32, i32
  }
}

</mosaic_0001>

<bundles_post_ra>
// kernel: tpu_custom_call.1
= control target key start
LH: loop header
LB: loop body
LE: loop exit
PB: predicated region body
PF: predicated region fallthrough
CT: control target
= control target key end

     0   :  { %s12159_s14 = smov 0   ;;  %s15115_s0 = inlined_call_operand.vmem [shape: f32[2560,80], index: 0, kind: input, shape index: {}]   ;;  %s15116_s1 = inlined_call_operand.vmem [shape: f32[80,8], index: 1, kind: input, shape index: {}]   ;;  %s15117_s2 = inlined_call_operand.<no memory space> [shape: f32[1,1], index: 2, kind: input, shape index: {}]   ;;  %s15118_s3 = inlined_call_operand.vmem [shape: f32[2560,8], index: 3, kind: output, shape index: {}]  }
   0x1   :  { %8 = sst [smem:[#allocation2]] %s15117_s2 }
   0x2 LB: > { %s8445_s15 = sadd.s32 4294967295, %s12134_s14   ;;  %p8449_p0 = scmp.ge.s32.totalorder %s12134_s14, 1  ;;  %s12134_s14 = sphi %s12159_s14, %s14_s14  }
   0x3   : > { %p139_p1 = scmp.lt.s32.totalorder %s12134_s14, 3 }
   0x5   : > { %p140_p2 = pnand %p8449_p0, %p139_p1 }
   0x7   : > { %143 = sbr.rel (%p140_p2) target bundleno = 1213 (0x4bd), region = 32 }
   0xe   : > { %v335_v0 = vld [vmem:[%s15116_s1] sm:$0xff]  ;;  %v336_v1 = vld [vmem:[%s15116_s1 + $0x8] sm:$0xff]  ;;  %v12176_v2 = vld [vmem:[%s15116_s1 + $0x10] sm:$0xff]  ;;  %s163_s21 = smul.u32 160, %s8445_s15  ;;  %vm347_vm0 = vcmask 654336   ;;  %s345_s26 = sld [smem:[#allocation2]] }
   0xf   : > { %v829_v3 = vand.u32 4294901760, %v335_v0  ;;  %v832_v4 = vand.u32 4294901760, %v336_v1  ;;  %v12181_v5 = vld [vmem:[%s15116_s1 + $0x18] sm:$0xff]  ;;  %v15126_v6 = vand.u32 4294901760, %v12176_v2  ;;  %v12187_v7 = vld [vmem:[%s15116_s1 + $0x20] sm:$0xff]  ;;  %v12192_v8 = vld [vmem:[%s15116_s1 + $0x28] sm:$0xff] }
  0x10   : > { %v15125_v9 = vand.u32 4294901760, %v12181_v5  ;;  %v12198_v10 = vld [vmem:[%s15116_s1 + $0x30] sm:$0xff]  ;;  %v12203_v11 = vld [vmem:[%s15116_s1 + $0x38] sm:$0xff]  ;;  %v15124_v13 = vand.u32 4294901760, %v12187_v7  ;;  %v15123_v14 = vand.u32 4294901760, %v12192_v8  ;;  %v12212_v15 = vld [vmem:[%s15116_s1 + $0x40] sm:$0xff] }
  0x11   : > { %v12205_v12 = vpack.c.bf16 %v832_v4, %v829_v3  ;;  %v12217_v16 = vld [vmem:[%s15116_s1 + $0x48] sm:$0xff]  ;;  %p164_p3 = scmp.lt.s32.totalorder %s163_s21, 319  ;;  %v12225_v18 = vsub.f32 %v335_v0, %v829_v3  ;;  %v15122_v19 = vand.u32 4294901760, %v12198_v10  ;;  %v15121_v20 = vand.u32 4294901760, %v12203_v11 }
  0x12   : > { %v12223_v17 = vpack.c.bf16 %v15125_v9, %v15126_v6  ;;  %v12233_v21 = vsub.f32 %v336_v1, %v832_v4  ;;  %v15120_v22 = vand.u32 4294901760, %v12212_v15  ;;  %v15119_v23 = vand.u32 4294901760, %v12217_v16 }
  0x13   : > { %11035 = vmatprep.subr.bf16.mxu1 %v12205_v12  ;;  %11095 = vmatprep.subr.bf16.mxu0 %v12205_v12  ;;  %s16442_s21 = smov (!%p164_p3, %s163_s21), 319  ;;  %v2506_v24 = vand.u32 4294901760, %v12225_v18  ;;  %v12246_v25 = vpack.c.bf16 %v15123_v14, %v15124_v13  ;;  %v12266_v28 = vpack.c.bf16 %v15121_v20, %v15122_v19  ;;  %vm8228_vm1 = vcmask 64512  }
  0x14   : > { %11037 = vmatpush3.bf16.msra.mxu1 %v12205_v12  ;;  %11097 = vmatpush3.bf16.msra.mxu0 %v12205_v12  ;;  %s8450_s9 = sshll.u32 %s16442_s21, 3  ;;  %v2513_v26 = vand.u32 4294901760, %v12233_v21  ;;  %v12280_v33 = vpack.c.bf16 %v15119_v23, %v15120_v22 }
  0x15   : > { %11039 = vmatprep.subr.bf16.mxu1 %v12223_v17  ;;  %11099 = vmatprep.subr.bf16.mxu0 %v12223_v17  ;;  %s12255_s12 = scalar_lea.vmem %s15115_s0, %s8450_s9  ;;  %v12260_v27 = vsub.f32 %v12225_v18, %v2506_v24  ;;  %s14527_s29 = scalar_lea.vmem %s15118_s3, %s8450_s9 }
  0x16   : > { %v175_v29 = vld [vmem:[%s12255_s12] sm:$0xff]  ;;  %v176_v30 = vld [vmem:[%s12255_s12 + $0x8] sm:$0xff]  ;;  %v2514_v31 = vsub.f32 %v12233_v21, %v2513_v26  ;;  %v177_v32 = vld [vmem:[%s12255_s12 + $0x10] sm:$0xff] }
  0x17   : > { %v349_v34 = vsel %vm347_vm0, %v175_v29, 0  ;;  %v352_v35 = vsel %vm347_vm0, %v176_v30, 0  ;;  %v355_v36 = vsel %vm347_vm0, %v177_v32, 0  ;;  %v178_v37 = vld [vmem:[%s12255_s12 + $0x18] sm:$0xff]  ;;  %v179_v38 = vld [vmem:[%s12255_s12 + $0x20] sm:$0xff]  ;;  %v2508_v41 = vand.u32 4294901760, %v12260_v27 }
  0x18   : > { %11041 = vmatpush3.bf16.msra.mxu1 %v12223_v17  ;;  %11101 = vmatpush3.bf16.msra.mxu0 %v12223_v17  ;;  %v12289_v39 = vand.u32 4294901760, %v349_v34  ;;  %v12291_v40 = vand.u32 4294901760, %v352_v35  ;;  %v12294_v42 = vand.u32 4294901760, %v355_v36  ;;  %v180_v43 = vld [vmem:[%s12255_s12 + $0x28] sm:$0xff]  ;;  %v181_v44 = vld [vmem:[%s12255_s12 + $0x30] sm:$0xff]  ;;  %v358_v45 = vsel %vm347_vm0, %v178_v37, 0 }
  0x19   : > { %11043 = vmatprep.subr.bf16.mxu1 %v12246_v25  ;;  %11103 = vmatprep.subr.bf16.mxu0 %v12246_v25  ;;  %v361_v46 = vsel %vm347_vm0, %v179_v38, 0  ;;  %v364_v47 = vsel %vm347_vm0, %v180_v43, 0  ;;  %v367_v48 = vsel %vm347_vm0, %v181_v44, 0  ;;  %v182_v49 = vld [vmem:[%s12255_s12 + $0x38] sm:$0xff]  ;;  %v2515_v52 = vand.u32 4294901760, %v2514_v31  ;;  %v192_v6 = vld [vmem:[%s12255_s12 + $0x88] sm:$0xff] }
  0x1a   : > { %v12304_v50 = vsub.f32 %v349_v34, %v12289_v39  ;;  %v12307_v51 = vsub.f32 %v352_v35, %v12291_v40  ;;  %v12310_v53 = vsub.f32 %v355_v36, %v12294_v42  ;;  %v12314_v54 = vand.u32 4294901760, %v358_v45  ;;  %v183_v34 = vld [vmem:[%s12255_s12 + $0x40] sm:$0xff]  ;;  %v184_v35 = vld [vmem:[%s12255_s12 + $0x48] sm:$0xff]  ;;  %v185_v36 = vld [vmem:[%s12255_s12 + $0x50] sm:$0xff] }
  0x1b   : > { %v12316_v55 = vand.u32 4294901760, %v361_v46  ;;  %v12318_v56 = vand.u32 4294901760, %v364_v47  ;;  %v12320_v57 = vand.u32 4294901760, %v367_v48  ;;  %v370_v61 = vsel %vm347_vm0, %v182_v49, 0 }
  0x1c   : > { %15660 = vst [vmem:[#allocation3_spill] sm:$0xff] %v12304_v50  ;;  %15661 = vst [vmem:[#allocation4_spill] sm:$0xff] %v12307_v51  ;;  %11045 = vmatpush3.bf16.msra.mxu1 %v12246_v25  ;;  %11105 = vmatpush3.bf16.msra.mxu0 %v12246_v25  ;;  %v905_v58 = vand.u32 4294901760, %v12304_v50  ;;  %v915_v59 = vand.u32 4294901760, %v12307_v51  ;;  %v925_v60 = vand.u32 4294901760, %v12310_v53  ;;  %v12329_v62 = vsub.f32 %v358_v45, %v12314_v54 }
  0x1d   : > { %15662 = vst [vmem:[#allocation5_spill] sm:$0xff] %v12310_v53  ;;  %11047 = vmatprep.subr.bf16.mxu1 %v12266_v28  ;;  %11107 = vmatprep.subr.bf16.mxu0 %v12266_v28  ;;  %v12332_v63 = vsub.f32 %v361_v46, %v12316_v55  ;;  %v12335_v0 = vsub.f32 %v364_v47, %v12318_v56  ;;  %v12342_v27 = vand.u32 4294901760, %v370_v61  ;;  %v186_v46 = vld [vmem:[%s12255_s12 + $0x58] sm:$0xff]  ;;  %v376_v49 = vsel %vm347_vm0, %v184_v35, 0 }
  0x1e   : > { %15663 = vst [vmem:[#allocation6_spill] sm:$0xff] %v12329_v62  ;;  %v906_v1 = vsub.f32 %v12304_v50, %v905_v58  ;;  %10274 = vmatprep.mubr.f32.mxu0 %v905_v58  ;;  %v916_v3 = vsub.f32 %v12307_v51, %v915_v59  ;;  %v12340_v4 = vsub.f32 %v367_v48, %v12320_v57  ;;  %v935_v30 = vand.u32 4294901760, %v12329_v62  ;;  %v188_v58 = vld [vmem:[%s12255_s12 + $0x68] sm:$0xff]  ;;  %v199_v50 = vld [vmem:[%s12255_s12 + $0xc0] sm:$0xff] }
  0x1f   : > { %15664 = vst [vmem:[#allocation7_spill] sm:$0xff] %v12332_v63  ;;  %15665 = vst [vmem:[#allocation8_spill] sm:$0xff] %v12335_v0  ;;  %v926_v29 = vsub.f32 %v12310_v53, %v925_v60  ;;  %v945_v31 = vand.u32 4294901760, %v12332_v63  ;;  %v15128_v32 = vand.u32 4294901760, %v12335_v0  ;;  %v11054_v38 = vpack.c.bf16 %v2515_v52, %v2508_v41  ;;  %v187_v52 = vld [vmem:[%s12255_s12 + $0x60] sm:$0xff] }
  0x20   : > { %15666 = vst [vmem:[#allocation9_spill] sm:$0xff] %v12340_v4  ;;  %11049 = vmatpush3.bf16.msra.mxu1 %v12266_v28  ;;  %11109 = vmatpush3.bf16.msra.mxu0 %v12266_v28  ;;  %v907_v37 = vand.u32 4294901760, %v906_v1  ;;  %v11114_v43 = vpack.c.bf16 %v2513_v26, %v2506_v24  ;;  %v12362_v44 = vsub.f32 %v370_v61, %v12342_v27  ;;  %v917_v47 = vand.u32 4294901760, %v916_v3  ;;  %v189_v3 = vld [vmem:[%s12255_s12 + $0x70] sm:$0xff] }
  0x21   : > { %11051 = vmatprep.subr.bf16.mxu1 %v12280_v33  ;;  %11111 = vmatprep.subr.bf16.mxu0 %v12280_v33  ;;  %v936_v45 = vsub.f32 %v12329_v62, %v935_v30  ;;  %v373_v48 = vsel %vm347_vm0, %v183_v34, 0  ;;  %v379_v41 = vsel %vm347_vm0, %v185_v36, 0  ;;  %v927_v24 = vand.u32 4294901760, %v926_v29  ;;  %v196_v62 = vld [vmem:[%s12255_s12 + $0xa8] sm:$0xff] }
  0x22   : > { %15667 = vst [vmem:[#allocation10_spill] sm:$0xff] %v12362_v44  ;;  %9494 = vmatprep.mubr.f32.mxu1 %v907_v37  ;;  %v946_v26 = vsub.f32 %v12332_v63, %v945_v31  ;;  %v956_v61 = vsub.f32 %v12335_v0, %v15128_v32  ;;  %v965_v1 = vand.u32 4294901760, %v12340_v4  ;;  %v15127_v34 = vand.u32 4294901760, %v12362_v44 }
  0x23   : > { %v12382_v35 = vand.u32 4294901760, %v373_v48  ;;  %v12384_v36 = vand.u32 4294901760, %v376_v49  ;;  %v12386_v29 = vand.u32 4294901760, %v379_v41  ;;  %v937_v37 = vand.u32 4294901760, %v936_v45 }
  0x24   : > { %11053 = vmatpush3.bf16.msra.mxu1 %v12280_v33  ;;  %11113 = vmatpush3.bf16.msra.mxu0 %v12280_v33  ;;  %v382_v23 = vsel %vm347_vm0, %v186_v46, 0  ;;  %v385_v22 = vsel %vm347_vm0, %v187_v52, 0  ;;  %v388_v20 = vsel %vm347_vm0, %v188_v58, 0  ;;  %v391_v45 = vsel %vm347_vm0, %v189_v3, 0 }
  0x25   : > { %11055 = vmatprep.subr.bf16.mxu1 %v11054_v38  ;;  %11115 = vmatprep.subr.bf16.mxu0 %v11114_v43  ;;  %v12392_v19 = vsub.f32 %v373_v48, %v12382_v35  ;;  %v12395_v14 = vsub.f32 %v376_v49, %v12384_v36  ;;  %v12398_v13 = vsub.f32 %v379_v41, %v12386_v29  ;;  %v947_v46 = vand.u32 4294901760, %v946_v26 }
  0x26   : > { %v966_v52 = vsub.f32 %v12340_v4, %v965_v1  ;;  %v12402_v9 = vand.u32 4294901760, %v382_v23  ;;  %v957_v49 = vand.u32 4294901760, %v956_v61  ;;  %v12411_v41 = vand.u32 4294901760, %v388_v20 }
  0x27   : > { %9495 = vmatmul.mubr.f32.vlgmr.msra.gmra.mrb[0].mxu1 %v917_v47  ;;  %10275 = vmatmul.mubr.f32.vlgmr.msra.gmra.mrb[0].mxu0 %v915_v59  ;;  %15668 = vst [vmem:[#allocation11_spill] sm:$0xff] %v12392_v19  ;;  %15669 = vst [vmem:[#allocation12_spill] sm:$0xff] %v12395_v14  ;;  %v12404_v47 = vand.u32 4294901760, %v385_v22  ;;  %v190_v59 = vld [vmem:[%s12255_s12 + $0x78] sm:$0xff]  ;;  %v985_v48 = vand.u32 4294901760, %v12392_v19  ;;  %v12413_v58 = vand.u32 4294901760, %v391_v45 }
  0x28   : > { %15670 = vst [vmem:[#allocation13_spill] sm:$0xff] %v12398_v13  ;;  %11057 = vmatpush3.bf16.msra.mxu1 %v11054_v38  ;;  %9497 = vmatprep.mubr.f32.mxu1 %v927_v24  ;;  %v995_v38 = vand.u32 4294901760, %v12395_v14  ;;  %15671 = vst [vmem:[#allocation14_spill] sm:$0xff] %v12411_v41  ;;  %v976_v24 = vsub.f32 %v12362_v44, %v15127_v34  ;;  %v394_v26 = vsel %vm347_vm0, %v190_v59, 0  ;;  %v967_v61 = vand.u32 4294901760, %v966_v52  ;;  %v193_v34 = vld [vmem:[%s12255_s12 + $0x90] sm:$0xff] }
  0x29   : > { %10277 = vmatprep.mubr.f32.mxu0 %v925_v60  ;;  %11117 = vmatpush3.bf16.msra.mxu0 %v11114_v43  ;;  %15672 = vst [vmem:[#allocation15_spill] sm:$0xff] %v12413_v58  ;;  %v1005_v60 = vand.u32 4294901760, %v12398_v13  ;;  %v12420_v43 = vsub.f32 %v382_v23, %v12402_v9  ;;  %v986_v3 = vsub.f32 %v12392_v19, %v985_v48  ;;  %v12439_v59 = vand.u32 4294901760, %v394_v26 }
  0x2a   : > { %v996_v32 = vsub.f32 %v12395_v14, %v995_v38  ;;  %v12434_v23 = vsub.f32 %v388_v20, %v12411_v41  ;;  %v400_v4 = vsel %vm347_vm0, %v192_v6, 0 }
  0x2b   : > { %9498 = vmatmul.mubr.f32.gmra.mrb[2].mxu1 %v937_v37  ;;  %10278 = vmatmul.mubr.f32.gmra.mrb[2].mxu0 %v935_v30  ;;  %15673 = vst [vmem:[#allocation16_spill] sm:$0xff] %v12420_v43  ;;  %v12427_v30 = vsub.f32 %v385_v22, %v12404_v47  ;;  %v191_v37 = vld [vmem:[%s12255_s12 + $0x80] sm:$0xff]  ;;  %15677 = vst [vmem:[#allocation20_spill] sm:$0xff] %v12439_v59  ;;  %v977_v22 = vand.u32 4294901760, %v976_v24  ;;  %v1006_v52 = vsub.f32 %v12398_v13, %v1005_v60 }
  0x2c   : > { %9500 = vmatprep.mubr.f32.mxu1 %v947_v46  ;;  %10280 = vmatprep.mubr.f32.mxu0 %v945_v31  ;;  %15675 = vst [vmem:[#allocation18_spill] sm:$0xff] %v12434_v23  ;;  %v12437_v46 = vsub.f32 %v391_v45, %v12413_v58  ;;  %v15678_v31 = vand.u32 4294901760, %v12335_v0  ;;  %v1015_v19 = vand.u32 4294901760, %v12420_v43  ;;  %v397_v14 = vsel %vm347_vm0, %v191_v37, 0  ;;  %v194_v0 = vld [vmem:[%s12255_s12 + $0x98] sm:$0xff] }
  0x2d   : > { %15674 = vst [vmem:[#allocation17_spill] sm:$0xff] %v12427_v30  ;;  %v987_v20 = vand.u32 4294901760, %v986_v3  ;;  %v1025_v45 = vand.u32 4294901760, %v12427_v30  ;;  %v997_v24 = vand.u32 4294901760, %v996_v32  ;;  %v1035_v13 = vand.u32 4294901760, %v12434_v23 }
  0x2e   : > { %15676 = vst [vmem:[#allocation19_spill] sm:$0xff] %v12437_v46  ;;  %v15681_v3 = vand.u32 4294901760, %v12362_v44  ;;  %v1016_v6 = vsub.f32 %v12420_v43, %v1015_v19  ;;  %v406_v32 = vsel %vm347_vm0, %v194_v0, 0  ;;  %v1007_v63 = vand.u32 4294901760, %v1006_v52  ;;  %v197_v44 = vld [vmem:[%s12255_s12 + $0xb0] sm:$0xff] }
  0x2f   : > { %9501 = vmatmul.mubr.f32.gmra.mrb[4].mxu1 %v957_v49  ;;  %10281 = vmatmul.mubr.f32.gmra.mrb[4].mxu0 %v15678_v31  ;;  %v403_v49 = vsel %vm347_vm0, %v193_v34, 0  ;;  %v12450_v31 = vand.u32 4294901760, %v397_v14  ;;  %v12461_v34 = vand.u32 4294901760, %v400_v4  ;;  %v1036_v43 = vsub.f32 %v12434_v23, %v1035_v13  ;;  %v198_v23 = vld [vmem:[%s12255_s12 + $0xb8] sm:$0xff] }
  0x30   : > { %9503 = vmatprep.mubr.f32.mxu1 %v967_v61  ;;  %10283 = vmatprep.mubr.f32.mxu0 %v965_v1  ;;  %v12455_v61 = vsub.f32 %v394_v26, %v12439_v59  ;;  %v195_v1 = vld [vmem:[%s12255_s12 + $0xa0] sm:$0xff]  ;;  %v12463_v37 = vand.u32 4294901760, %v403_v49  ;;  %v1026_v26 = vsub.f32 %v12427_v30, %v1025_v45  ;;  %v12475_v51 = vand.u32 4294901760, %v406_v32 }
  0x31   : > { %15679 = vst [vmem:[#allocation21_spill] sm:$0xff] %v12450_v31  ;;  %15682 = vst [vmem:[#allocation23_spill] sm:$0xff] %v12461_v34  ;;  %v412_v0 = vsel %vm347_vm0, %v196_v62, 0  ;;  %v15686_v52 = vand.u32 4294901760, %v12437_v46 }
  0x32   : > { %15680 = vst [vmem:[#allocation22_spill] sm:$0xff] %v12455_v61  ;;  %15683 = vst [vmem:[#allocation24_spill] sm:$0xff] %v12463_v37  ;;  %v1055_v53 = vand.u32 4294901760, %v12455_v61  ;;  %v1027_v30 = vand.u32 4294901760, %v1026_v26 }
  0x33   : > { %9504 = vmatmul.mubr.f32.gmra.mrb[6].mxu1 %v977_v22  ;;  %10284 = vmatmul.mubr.f32.gmra.mrb[6].mxu0 %v15681_v3  ;;  %v12469_v22 = vsub.f32 %v397_v14, %v12450_v31  ;;  %v409_v3 = vsel %vm347_vm0, %v195_v1, 0  ;;  %15685 = vst [vmem:[#allocation26_spill] sm:$0xff] %v12475_v51  ;;  %v1046_v14 = vsub.f32 %v12437_v46, %v15686_v52 }
  0x34   : > { %9506 = vmatprep.mubr.f32.mxu1 %v987_v20  ;;  %10286 = vmatprep.mubr.f32.mxu0 %v985_v48  ;;  %v1017_v48 = vand.u32 4294901760, %v1016_v6  ;;  %v12482_v20 = vsub.f32 %v400_v4, %v12461_v34  ;;  %v12485_v1 = vsub.f32 %v403_v49, %v12463_v37  ;;  %v12492_v6 = vand.u32 4294901760, %v412_v0 }
  0x35   : > { %15684 = vst [vmem:[#allocation25_spill] sm:$0xff] %v12469_v22  ;;  %v1065_v62 = vand.u32 4294901760, %v12469_v22  ;;  %v1056_v52 = vsub.f32 %v12455_v61, %v1055_v53  ;;  %v12496_v4 = vsub.f32 %v406_v32, %v12475_v51  ;;  %v418_v49 = vsel %vm347_vm0, %v198_v23, 0  ;;  %v200_v23 = vld [vmem:[%s12255_s12 + $0xc8] sm:$0xff] }
  0x36   : > { %15687 = vst [vmem:[#allocation27_spill] sm:$0xff] %v12482_v20  ;;  %15688 = vst [vmem:[#allocation28_spill] sm:$0xff] %v12485_v1  ;;  %v1085_v26 = vand.u32 4294901760, %v12485_v1  ;;  %v1047_v37 = vand.u32 4294901760, %v1046_v14  ;;  %v12510_v51 = vsub.f32 %v412_v0, %v12492_v6  ;;  %v15696_v34 = vand.u32 4294901760, %v12176_v2 }
  0x37   : > { %9507 = vmatmul.mubr.f32.gmra.mrb[8].mxu1 %v997_v24  ;;  %10287 = vmatmul.mubr.f32.gmra.mrb[8].mxu0 %v995_v38  ;;  %v12489_v24 = vand.u32 4294901760, %v409_v3  ;;  %v415_v38 = vsel %vm347_vm0, %v197_v44, 0  ;;  %15690 = vst [vmem:[#allocation30_spill] sm:$0xff] %v12492_v6  ;;  %15691 = vst [vmem:[#allocation31_spill] sm:$0xff] %v12496_v4  ;;  %v1066_v61 = vsub.f32 %v12469_v22, %v1065_v62  ;;  %v15714_v59 = vand.u32 4294901760, %v12496_v4 }
  0x38   : > { %9509 = vmatprep.mubr.f32.mxu1 %v1007_v63  ;;  %10289 = vmatprep.mubr.f32.mxu0 %v1005_v60  ;;  %v1037_v63 = vand.u32 4294901760, %v1036_v43  ;;  %v1075_v60 = vand.u32 4294901760, %v12482_v20  ;;  %v12502_v44 = vand.u32 4294901760, %v415_v38  ;;  %15694 = vst [vmem:[#allocation34_spill] sm:$0xff] %v12510_v51  ;;  %v421_v43 = vsel %vm347_vm0, %v199_v50, 0 }
  0x39   : > { %15689 = vst [vmem:[#allocation29_spill] sm:$0xff] %v12489_v24  ;;  %v12506_v32 = vsub.f32 %v409_v3, %v12489_v24  ;;  %v15697_v3 = vand.u32 4294901760, %v12181_v5  ;;  %v1086_v50 = vsub.f32 %v12485_v1, %v1085_v26  ;;  %v204_v24 = vld [vmem:[%s12255_s12 + $0xe8] sm:$0xff] }
  0x3a   : > { %15692 = vst [vmem:[#allocation32_spill] sm:$0xff] %v12502_v44  ;;  %v1076_v0 = vsub.f32 %v12482_v20, %v1075_v60  ;;  %v12530_v6 = vsub.f32 %v415_v38, %v12502_v44  ;;  %v202_v38 = vld [vmem:[%s12255_s12 + $0xd8] sm:$0xff] }
  0x3b   : > { %9510 = vmatmul.mubr.f32.gmra.mrb[10].mxu1 %v1017_v48  ;;  %10290 = vmatmul.mubr.f32.gmra.mrb[10].mxu0 %v1015_v19  ;;  %15693 = vst [vmem:[#allocation33_spill] sm:$0xff] %v12506_v32  ;;  %v12512_v19 = vand.u32 4294901760, %v418_v49  ;;  %v201_v48 = vld [vmem:[%s12255_s12 + $0xd0] sm:$0xff]  ;;  %v12525_v22 = vsub.f32 %v12181_v5, %v15697_v3  ;;  %v1105_v5 = vand.u32 4294901760, %v12506_v32  ;;  %v12536_v3 = vand.u32 4294901760, %v421_v43 }
  0x3c   : > { %9512 = vmatprep.mubr.f32.mxu1 %v1027_v30  ;;  %10292 = vmatprep.mubr.f32.mxu0 %v1025_v45  ;;  %v12519_v30 = vsub.f32 %v12176_v2, %v15696_v34  ;;  %v1057_v45 = vand.u32 4294901760, %v1056_v52  ;;  %15698 = vst [vmem:[#allocation36_spill] sm:$0xff] %v12530_v6  ;;  %v424_v2 = vsel %vm347_vm0, %v200_v23, 0  ;;  %v15699_v34 = vand.u32 4294901760, %v12437_v46 }
  0x3d   : > { %15695 = vst [vmem:[#allocation35_spill] sm:$0xff] %v12512_v19  ;;  %v1067_v52 = vand.u32 4294901760, %v1066_v61  ;;  %15700 = vst [vmem:[#allocation37_spill] sm:$0xff] %v12536_v3  ;;  %v12541_v14 = vsub.f32 %v418_v49, %v12512_v19  ;;  %v12548_v61 = vand.u32 4294901760, %v424_v2  ;;  %v2527_v49 = vand.u32 4294901760, %v12525_v22 }
  0x3e   : > { %v2520_v1 = vand.u32 4294901760, %v12519_v30  ;;  %v1087_v46 = vand.u32 4294901760, %v1086_v50  ;;  %v1106_v19 = vsub.f32 %v12506_v32, %v1105_v5  ;;  %v430_v44 = vsel %vm347_vm0, %v202_v38, 0 }
  0x3f   : > { %9513 = vmatmul.mubr.f32.gmra.mrb[12].mxu1 %v1037_v63  ;;  %10293 = vmatmul.mubr.f32.gmra.mrb[12].mxu0 %v1035_v13  ;;  %v427_v13 = vsel %vm347_vm0, %v201_v48, 0  ;;  %15701 = vst [vmem:[#allocation38_spill] sm:$0xff] %v12541_v14  ;;  %15703 = vst [vmem:[#allocation39_spill] sm:$0xff] %v12548_v61  ;;  %v1077_v48 = vand.u32 4294901760, %v1076_v0  ;;  %v12574_v38 = vand.u32 4294901760, %v430_v44 }
  0x40   : > { %9515 = vmatprep.mubr.f32.mxu1 %v1047_v37  ;;  %10295 = vmatprep.mubr.f32.mxu0 %v15699_v34  ;;  %v15702_v37 = vand.u32 4294901760, %v12496_v4  ;;  %v203_v34 = vld [vmem:[%s12255_s12 + $0xe0] sm:$0xff]  ;;  %v12552_v20 = vand.u32 4294901760, %v427_v13 }
  0x41   : > { %v433_v31 = vsel %vm347_vm0, %v203_v34, 0  ;;  %v1107_v34 = vand.u32 4294901760, %v1106_v19 }
  0x42   : > { %v1096_v23 = vsub.f32 %v12496_v4, %v15702_v37  ;;  %15704 = vst [vmem:[#allocation40_spill] sm:$0xff] %v12552_v20  ;;  %v12557_v37 = vsub.f32 %v421_v43, %v12536_v3  ;;  %v12572_v43 = vsub.f32 %v427_v13, %v12552_v20  ;;  %v206_v13 = vld [vmem:[%s12255_s12 + $0xf8] sm:$0xff]  ;;  %v15711_v20 = vand.u32 4294901760, %v12541_v14  ;;  %v212_v4 = vld [vmem:[%s12255_s12 + $0x128] sm:$0xff] }
  0x43   : > { %9516 = vmatmul.mubr.f32.gmra.mrb[14].mxu1 %v1057_v45  ;;  %10296 = vmatmul.mubr.f32.gmra.mrb[14].mxu0 %v1055_v53  ;;  %v205_v45 = vld [vmem:[%s12255_s12 + $0xf0] sm:$0xff]  ;;  %v15706_v53 = vand.u32 4294901760, %v12510_v51  ;;  %v11118_v3 = vpack.c.bf16 %v2527_v49, %v2520_v1 }
  0x44   : > { %9518 = vmatprep.mubr.f32.mxu1 %v1067_v52  ;;  %10298 = vmatprep.mubr.f32.mxu0 %v1065_v62  ;;  %15705 = vst [vmem:[#allocation41_spill] sm:$0xff] %v12557_v37  ;;  %v2521_v62 = vsub.f32 %v12519_v30, %v2520_v1  ;;  %v1097_v50 = vand.u32 4294901760, %v1096_v23  ;;  %v12569_v52 = vsub.f32 %v424_v2, %v12548_v61  ;;  %15708 = vst [vmem:[#allocation43_spill] sm:$0xff] %v12572_v43 }
  0x45   : > { %v1116_v0 = vsub.f32 %v12510_v51, %v15706_v53  ;;  %v436_v53 = vsel %vm347_vm0, %v204_v24, 0  ;;  %v439_v63 = vsel %vm347_vm0, %v205_v45, 0  ;;  %v15709_v23 = vand.u32 4294901760, %v12530_v6  ;;  %11119 = vmatprep.subr.bf16.mxu0 %v11118_v3 }
  0x46   : > { %15707 = vst [vmem:[#allocation42_spill] sm:$0xff] %v12569_v52  ;;  %v1136_v24 = vsub.f32 %v12541_v14, %v15711_v20  ;;  %v2522_v61 = vand.u32 4294901760, %v2521_v62  ;;  %v2528_v45 = vsub.f32 %v12525_v22, %v2527_v49  ;;  %v12592_v19 = vand.u32 4294901760, %v439_v63  ;;  %11121 = vmatpush3.bf16.msra.mxu0 %v11118_v3  ;;  %v210_v3 = vld [vmem:[%s12255_s12 + $0x118] sm:$0xff] }
  0x47   : > { %9519 = vmatmul.mubr.f32.gmra.mrb[16].mxu1 %v1077_v48  ;;  %10299 = vmatmul.mubr.f32.gmra.mrb[16].mxu0 %v1075_v60  ;;  %v1126_v2 = vsub.f32 %v12530_v6, %v15709_v23  ;;  %v1145_v48 = vand.u32 4294901760, %v12557_v37  ;;  %v12582_v60 = vand.u32 4294901760, %v433_v31  ;;  %v1117_v32 = vand.u32 4294901760, %v1116_v0  ;;  %v207_v23 = vld [vmem:[%s12255_s12 + $0x100] sm:$0xff] }
  0x48   : > { %9521 = vmatprep.mubr.f32.mxu1 %v1087_v46  ;;  %10301 = vmatprep.mubr.f32.mxu0 %v1085_v26  ;;  %v12590_v26 = vand.u32 4294901760, %v436_v53  ;;  %15713 = vst [vmem:[#allocation46_spill] sm:$0xff] %v12592_v19  ;;  %v12599_v20 = vsub.f32 %v430_v44, %v12574_v38  ;;  %v442_v62 = vsel %vm347_vm0, %v206_v13, 0  ;;  %v2529_v46 = vand.u32 4294901760, %v2528_v45 }
  0x49   : > { %15710 = vst [vmem:[#allocation44_spill] sm:$0xff] %v12582_v60  ;;  %v1127_v58 = vand.u32 4294901760, %v1126_v2  ;;  %v1146_v41 = vsub.f32 %v12557_v37, %v1145_v48  ;;  %v12604_v1 = vsub.f32 %v433_v31, %v12582_v60  ;;  %v445_v49 = vsel %vm347_vm0, %v207_v23, 0  ;;  %v209_v31 = vld [vmem:[%s12255_s12 + $0x110] sm:$0xff] }
  0x4a   : > { %15712 = vst [vmem:[#allocation45_spill] sm:$0xff] %v12590_v26  ;;  %15715 = vst [vmem:[#allocation47_spill] sm:$0xff] %v12599_v20  ;;  %v15717_v44 = vand.u32 4294901760, %v12569_v52  ;;  %v12612_v13 = vsub.f32 %v436_v53, %v12590_v26  ;;  %v1137_v2 = vand.u32 4294901760, %v1136_v24  ;;  %v15722_v45 = vand.u32 4294901760, %v12572_v43  ;;  %v211_v24 = vld [vmem:[%s12255_s12 + $0x120] sm:$0xff] }
  0x4b   : > { %9522 = vmatmul.mubr.f32.gmra.mrb[18].mxu1 %v1097_v50  ;;  %10302 = vmatmul.mubr.f32.gmra.mrb[18].mxu0 %v15714_v59  ;;  %15716 = vst [vmem:[#allocation48_spill] sm:$0xff] %v12604_v1  ;;  %v208_v59 = vld [vmem:[%s12255_s12 + $0x108] sm:$0xff]  ;;  %v11058_v50 = vpack.c.bf16 %v2529_v46, %v2522_v61  ;;  %v15721_v61 = vand.u32 4294901760, %v12510_v51  ;;  %v1175_v53 = vand.u32 4294901760, %v12599_v20  ;;  %v1147_v23 = vand.u32 4294901760, %v1146_v41 }
  0x4c   : > { %9524 = vmatprep.mubr.f32.mxu1 %v1107_v34  ;;  %10304 = vmatprep.mubr.f32.mxu0 %v1105_v5  ;;  %v1156_v0 = vsub.f32 %v12569_v52, %v15717_v44  ;;  %15718 = vst [vmem:[#allocation49_spill] sm:$0xff] %v12612_v13  ;;  %v12615_v5 = vsub.f32 %v439_v63, %v12592_v19  ;;  %v12617_v34 = vand.u32 4294901760, %v442_v62  ;;  %v15723_v63 = vand.u32 4294901760, %v12530_v6  ;;  %v222_v19 = vld [vmem:[%s12255_s12 + $0x178] sm:$0xff] }
  0x4d   : > { %v1166_v46 = vsub.f32 %v12572_v43, %v15722_v45  ;;  %v1185_v44 = vand.u32 4294901760, %v12604_v1  ;;  %v12629_v37 = vand.u32 4294901760, %v445_v49  ;;  %11059 = vmatprep.subr.bf16.mxu1 %v11058_v50  ;;  %v1195_v51 = vand.u32 4294901760, %v12612_v13 }
  0x4e   : > { %15719 = vst [vmem:[#allocation50_spill] sm:$0xff] %v12615_v5  ;;  %15720 = vst [vmem:[#allocation51_spill] sm:$0xff] %v12617_v34  ;;  %v1157_v45 = vand.u32 4294901760, %v1156_v0  ;;  %v12638_v41 = vsub.f32 %v442_v62, %v12617_v34  ;;  %11061 = vmatpush3.bf16.msra.mxu1 %v11058_v50  ;;  %v457_v0 = vsel %vm347_vm0, %v211_v24, 0  ;;  %v460_v24 = vsel %vm347_vm0, %v212_v4, 0 }
  0x4f   : > { %9525 = vmatmul.mubr.f32.gmra.mrb[20].mxu1 %v1117_v32  ;;  %10305 = vmatmul.mubr.f32.gmra.mrb[20].mxu0 %v15721_v61  ;;  %15724 = vst [vmem:[#allocation52_spill] sm:$0xff] %v12629_v37  ;;  %v448_v32 = vsel %vm347_vm0, %v208_v59, 0  ;;  %v451_v61 = vsel %vm347_vm0, %v209_v31, 0  ;;  %v1176_v59 = vsub.f32 %v12599_v20, %v1175_v53  ;;  %v454_v31 = vsel %vm347_vm0, %v210_v3, 0 }
  0x50   : > { %9527 = vmatprep.mubr.f32.mxu1 %v1127_v58  ;;  %10307 = vmatprep.mubr.f32.mxu0 %v15723_v63  ;;  %15725 = vst [vmem:[#allocation53_spill] sm:$0xff] %v12638_v41  ;;  %v15726_v63 = vand.u32 4294901760, %v12541_v14  ;;  %v12643_v6 = vand.u32 4294901760, %v448_v32  ;;  %v1167_v58 = vand.u32 4294901760, %v1166_v46  ;;  %v1186_v62 = vsub.f32 %v12604_v1, %v1185_v44 }
  0x51   : > { %v12650_v50 = vsub.f32 %v445_v49, %v12629_v37  ;;  %v1215_v20 = vand.u32 4294901760, %v12638_v41  ;;  %v12656_v14 = vand.u32 4294901760, %v454_v31  ;;  %v12658_v3 = vand.u32 4294901760, %v457_v0 }
  0x52   : > { %15727 = vst [vmem:[#allocation54_spill] sm:$0xff] %v12643_v6  ;;  %v1177_v46 = vand.u32 4294901760, %v1176_v59  ;;  %v1196_v49 = vsub.f32 %v12612_v13, %v1195_v51  ;;  %v12668_v37 = vsub.f32 %v448_v32, %v12643_v6  ;;  %v15735_v34 = vand.u32 4294901760, %v12572_v43 }
  0x53   : > { %9528 = vmatmul.mubr.f32.gmra.mrb[22].mxu1 %v1137_v2  ;;  %10308 = vmatmul.mubr.f32.gmra.mrb[22].mxu0 %v15726_v63  ;;  %15728 = vst [vmem:[#allocation55_spill] sm:$0xff] %v12650_v50  ;;  %v12652_v2 = vand.u32 4294901760, %v451_v61  ;;  %v213_v63 = vld [vmem:[%s12255_s12 + $0x130] sm:$0xff]  ;;  %15730 = vst [vmem:[#allocation57_spill] sm:$0xff] %v12656_v14  ;;  %v1187_v4 = vand.u32 4294901760, %v1186_v62  ;;  %v12677_v13 = vand.u32 4294901760, %v460_v24  ;;  %v12682_v32 = vsub.f32 %v454_v31, %v12656_v14 }
  0x54   : > { %9530 = vmatprep.mubr.f32.mxu1 %v1147_v23  ;;  %10310 = vmatprep.mubr.f32.mxu0 %v1145_v48  ;;  %15731 = vst [vmem:[#allocation58_spill] sm:$0xff] %v12658_v3  ;;  %v15732_v48 = vand.u32 4294901760, %v12569_v52  ;;  %v15733_v23 = vand.u32 4294901760, %v12615_v5  ;;  %15734 = vst [vmem:[#allocation59_spill] sm:$0xff] %v12668_v37  ;;  %v463_v59 = vsel %vm347_vm0, %v213_v63, 0  ;;  %v214_v52 = vld [vmem:[%s12255_s12 + $0x138] sm:$0xff] }
  0x55   : > { %15729 = vst [vmem:[#allocation56_spill] sm:$0xff] %v12652_v2  ;;  %15737 = vst [vmem:[#allocation61_spill] sm:$0xff] %v12677_v13  ;;  %v1235_v62 = vand.u32 4294901760, %v12668_v37  ;;  %v12689_v63 = vand.u32 4294901760, %v463_v59  ;;  %v466_v14 = vsel %vm347_vm0, %v214_v52, 0 }
  0x56   : > { %v1206_v1 = vsub.f32 %v12615_v5, %v15733_v23  ;;  %v1216_v23 = vsub.f32 %v12638_v41, %v1215_v20  ;;  %15738 = vst [vmem:[#allocation62_spill] sm:$0xff] %v12682_v32 }
  0x57   : > { %9531 = vmatmul.mubr.f32.gmra.mrb[24].mxu1 %v1157_v45  ;;  %10311 = vmatmul.mubr.f32.gmra.mrb[24].mxu0 %v15732_v48  ;;  %v1225_v45 = vand.u32 4294901760, %v12650_v50  ;;  %v12674_v48 = vsub.f32 %v451_v61, %v12652_v2  ;;  %v1197_v61 = vand.u32 4294901760, %v1196_v49  ;;  %15740 = vst [vmem:[#allocation64_spill] sm:$0xff] %v12689_v63  ;;  %v1255_v49 = vand.u32 4294901760, %v12682_v32 }
  0x58   : > { %9533 = vmatprep.mubr.f32.mxu1 %v1167_v58  ;;  %10313 = vmatprep.mubr.f32.mxu0 %v15735_v34  ;;  %v12685_v58 = vsub.f32 %v457_v0, %v12658_v3  ;;  %v215_v34 = vld [vmem:[%s12255_s12 + $0x140] sm:$0xff]  ;;  %v1207_v43 = vand.u32 4294901760, %v1206_v1  ;;  %v216_v0 = vld [vmem:[%s12255_s12 + $0x148] sm:$0xff]  ;;  %v12696_v3 = vsub.f32 %v460_v24, %v12677_v13  ;;  %v217_v1 = vld [vmem:[%s12255_s12 + $0x150] sm:$0xff]  ;;  %v12704_v52 = vsub.f32 %v463_v59, %v12689_v63 }
  0x59   : > { %15736 = vst [vmem:[#allocation60_spill] sm:$0xff] %v12674_v48  ;;  %v1226_v41 = vsub.f32 %v12650_v50, %v1225_v45  ;;  %v1245_v31 = vand.u32 4294901760, %v12674_v48  ;;  %v12706_v50 = vand.u32 4294901760, %v466_v14  ;;  %v472_v24 = vsel %vm347_vm0, %v216_v0, 0  ;;  %v219_v59 = vld [vmem:[%s12255_s12 + $0x160] sm:$0xff] }
  0x5a   : > { %15739 = vst [vmem:[#allocation63_spill] sm:$0xff] %v12685_v58  ;;  %15741 = vst [vmem:[#allocation65_spill] sm:$0xff] %v12696_v3  ;;  %v1256_v63 = vsub.f32 %v12682_v32, %v1255_v49  ;;  %v15746_v0 = vand.u32 4294901760, %v12685_v58  ;;  %v481_v6 = vsel %vm347_vm0, %v219_v59, 0 }
  0x5b   : > { %9534 = vmatmul.mubr.f32.gmra.mrb[26].mxu1 %v1177_v46  ;;  %10314 = vmatmul.mubr.f32.gmra.mrb[26].mxu0 %v1175_v53  ;;  %v469_v53 = vsel %vm347_vm0, %v215_v34, 0  ;;  %v1217_v46 = vand.u32 4294901760, %v1216_v23  ;;  %15742 = vst [vmem:[#allocation66_spill] sm:$0xff] %v12704_v52  ;;  %15743 = vst [vmem:[#allocation67_spill] sm:$0xff] %v12706_v50  ;;  %v15744_v23 = vand.u32 4294901760, %v12615_v5  ;;  %v1227_v34 = vand.u32 4294901760, %v1226_v41 }
  0x5c   : > { %9536 = vmatprep.mubr.f32.mxu1 %v1187_v4  ;;  %10316 = vmatprep.mubr.f32.mxu0 %v1185_v44  ;;  %v1236_v44 = vsub.f32 %v12668_v37, %v1235_v62  ;;  %v1246_v4 = vsub.f32 %v12674_v48, %v1245_v31  ;;  %v12712_v13 = vand.u32 4294901760, %v469_v53  ;;  %v475_v37 = vsel %vm347_vm0, %v217_v1, 0 }
  0x5d   : > { %v1285_v48 = vand.u32 4294901760, %v12704_v52  ;;  %v12726_v5 = vsub.f32 %v466_v14, %v12706_v50  ;;  %v1257_v26 = vand.u32 4294901760, %v1256_v63 }
  0x5e   : > { %15745 = vst [vmem:[#allocation68_spill] sm:$0xff] %v12712_v13  ;;  %v1237_v41 = vand.u32 4294901760, %v1236_v44  ;;  %v1247_v32 = vand.u32 4294901760, %v1246_v4  ;;  %v12730_v2 = vsub.f32 %v469_v53, %v12712_v13  ;;  %v221_v44 = vld [vmem:[%s12255_s12 + $0x170] sm:$0xff]  ;;  %v12746_v4 = vand.u32 4294901760, %v481_v6 }
  0x5f   : > { %9537 = vmatmul.mubr.f32.gmra.mrb[28].mxu1 %v1197_v61  ;;  %10317 = vmatmul.mubr.f32.gmra.mrb[28].mxu0 %v1195_v51  ;;  %v218_v61 = vld [vmem:[%s12255_s12 + $0x158] sm:$0xff]  ;;  %v1275_v51 = vand.u32 4294901760, %v12696_v3  ;;  %15748 = vst [vmem:[#allocation70_spill] sm:$0xff] %v12726_v5  ;;  %v1295_v53 = vand.u32 4294901760, %v12726_v5  ;;  %v487_v59 = vsel %vm347_vm0, %v221_v44, 0  ;;  %v224_v44 = vld [vmem:[%s12255_s12 + $0x188] sm:$0xff] }
  0x60   : > { %9539 = vmatprep.mubr.f32.mxu1 %v1207_v43  ;;  %10319 = vmatprep.mubr.f32.mxu0 %v15744_v23  ;;  %v1266_v43 = vsub.f32 %v12685_v58, %v15746_v0  ;;  %v12722_v23 = vand.u32 4294901760, %v472_v24  ;;  %v478_v1 = vsel %vm347_vm0, %v218_v61, 0  ;;  %15749 = vst [vmem:[#allocation71_spill] sm:$0xff] %v12730_v2  ;;  %v12732_v0 = vand.u32 4294901760, %v475_v37  ;;  %15753 = vst [vmem:[#allocation75_spill] sm:$0xff] %v12746_v4 }
  0x61   : > { %v1305_v63 = vand.u32 4294901760, %v12730_v2 }
  0x62   : > { %15747 = vst [vmem:[#allocation69_spill] sm:$0xff] %v12722_v23  ;;  %15750 = vst [vmem:[#allocation72_spill] sm:$0xff] %v12732_v0  ;;  %v1267_v14 = vand.u32 4294901760, %v1266_v43  ;;  %v12740_v50 = vsub.f32 %v472_v24, %v12722_v23  ;;  %v12751_v24 = vsub.f32 %v475_v37, %v12732_v0  ;;  %v12763_v37 = vand.u32 4294901760, %v487_v59 }
  0x63   : > { %9540 = vmatmul.mubr.f32.gmra.mrb[30].mxu1 %v1217_v46  ;;  %10320 = vmatmul.mubr.f32.gmra.mrb[30].mxu0 %v1215_v20  ;;  %v220_v46 = vld [vmem:[%s12255_s12 + $0x168] sm:$0xff]  ;;  %v1276_v20 = vsub.f32 %v12696_v3, %v1275_v51 }
  0x64   : > { %9542 = vmatprep.mubr.f32.mxu1 %v1227_v34  ;;  %10322 = vmatprep.mubr.f32.mxu0 %v1225_v45  ;;  %15751 = vst [vmem:[#allocation73_spill] sm:$0xff] %v12740_v50  ;;  %v12742_v34 = vand.u32 4294901760, %v478_v1  ;;  %v1286_v45 = vsub.f32 %v12704_v52, %v1285_v48  ;;  %v484_v61 = vsel %vm347_vm0, %v220_v46, 0  ;;  %15754 = vst [vmem:[#allocation76_spill] sm:$0xff] %v12751_v24  ;;  %v1315_v43 = vand.u32 4294901760, %v12740_v50  ;;  %v223_v46 = vld [vmem:[%s12255_s12 + $0x180] sm:$0xff] }
  0x65   : > { %v12759_v52 = vand.u32 4294901760, %v484_v61  ;;  %15757 = vst [vmem:[#allocation79_spill] sm:$0xff] %v12763_v37  ;;  %v1325_v0 = vand.u32 4294901760, %v12751_v24 }
  0x66   : > { %15752 = vst [vmem:[#allocation74_spill] sm:$0xff] %v12742_v34 }
  0x67   : > { %9543 = vmatmul.mubr.f32.gmra.mrb[32].mxu1 %v1237_v41  ;;  %10323 = vmatmul.mubr.f32.gmra.mrb[32].mxu0 %v1235_v62  ;;  %v490_v62 = vsel %vm347_vm0, %v222_v19, 0  ;;  %v12757_v41 = vsub.f32 %v478_v1, %v12742_v34  ;;  %15756 = vst [vmem:[#allocation78_spill] sm:$0xff] %v12759_v52  ;;  %v15759_v19 = vand.u32 4294901760, %v12685_v58  ;;  %v1287_v1 = vand.u32 4294901760, %v1286_v45 }
  0x68   : > { %9545 = vmatprep.mubr.f32.mxu1 %v1247_v32  ;;  %10325 = vmatprep.mubr.f32.mxu0 %v1245_v31  ;;  %v1277_v32 = vand.u32 4294901760, %v1276_v20  ;;  %v1296_v31 = vsub.f32 %v12726_v5, %v1295_v53  ;;  %v12765_v3 = vand.u32 4294901760, %v490_v62  ;;  %v1306_v34 = vsub.f32 %v12730_v2, %v1305_v63 }
  0x69   : > { %15755 = vst [vmem:[#allocation77_spill] sm:$0xff] %v12757_v41  ;;  %v1316_v20 = vsub.f32 %v12740_v50, %v1315_v43  ;;  %v496_v45 = vsel %vm347_vm0, %v224_v44, 0  ;;  %v1326_v5 = vsub.f32 %v12751_v24, %v1325_v0  ;;  %v226_v44 = vld [vmem:[%s12255_s12 + $0x198] sm:$0xff] }
  0x6a   : > { %15758 = vst [vmem:[#allocation80_spill] sm:$0xff] %v12765_v3  ;;  %v1297_v2 = vand.u32 4294901760, %v1296_v31  ;;  %v1307_v50 = vand.u32 4294901760, %v1306_v34  ;;  %v502_v24 = vsel %vm347_vm0, %v226_v44, 0 }
  0x6b   : > { %9546 = vmatmul.mubr.f32.gmra.mrb[34].mxu1 %v1257_v26  ;;  %10326 = vmatmul.mubr.f32.gmra.mrb[34].mxu0 %v1255_v49  ;;  %v12773_v26 = vsub.f32 %v481_v6, %v12746_v4  ;;  %v493_v49 = vsel %vm347_vm0, %v223_v46, 0  ;;  %v12784_v6 = vsub.f32 %v487_v59, %v12763_v37  ;;  %v12787_v46 = vsub.f32 %v490_v62, %v12765_v3 }
  0x6c   : > { %9548 = vmatprep.mubr.f32.mxu1 %v1267_v14  ;;  %10328 = vmatprep.mubr.f32.mxu0 %v15759_v19  ;;  %v12779_v14 = vsub.f32 %v484_v61, %v12759_v52  ;;  %v225_v19 = vld [vmem:[%s12255_s12 + $0x190] sm:$0xff]  ;;  %v12791_v58 = vand.u32 4294901760, %v493_v49  ;;  %v227_v52 = vld [vmem:[%s12255_s12 + $0x1a0] sm:$0xff]  ;;  %v1317_v59 = vand.u32 4294901760, %v1316_v20  ;;  %v15766_v62 = vand.u32 4294901760, %v12757_v41 }
  0x6d   : > { %15760 = vst [vmem:[#allocation81_spill] sm:$0xff] %v12773_v26  ;;  %15762 = vst [vmem:[#allocation83_spill] sm:$0xff] %v12784_v6  ;;  %v1345_v61 = vand.u32 4294901760, %v12773_v26  ;;  %v505_v3 = vsel %vm347_vm0, %v227_v52, 0  ;;  %v1327_v20 = vand.u32 4294901760, %v1326_v5  ;;  %v12819_v34 = vand.u32 4294901760, %v502_v24 }
  0x6e   : > { %15761 = vst [vmem:[#allocation82_spill] sm:$0xff] %v12779_v14  ;;  %15763 = vst [vmem:[#allocation84_spill] sm:$0xff] %v12787_v46  ;;  %v1336_v31 = vsub.f32 %v12757_v41, %v15766_v62  ;;  %v12808_v62 = vsub.f32 %v493_v49, %v12791_v58  ;;  %v229_v5 = vld [vmem:[%s12255_s12 + $0x1b0] sm:$0xff] }
  0x6f   : > { %9549 = vmatmul.mubr.f32.gmra.mrb[36].mxu1 %v1277_v32  ;;  %10329 = vmatmul.mubr.f32.gmra.mrb[36].mxu0 %v1275_v51  ;;  %15764 = vst [vmem:[#allocation85_spill] sm:$0xff] %v12791_v58  ;;  %v12795_v32 = vand.u32 4294901760, %v496_v45  ;;  %v499_v51 = vsel %vm347_vm0, %v225_v19, 0  ;;  %v1346_v19 = vsub.f32 %v12773_v26, %v1345_v61  ;;  %15771 = vst [vmem:[#allocation90_spill] sm:$0xff] %v12819_v34 }
  0x70   : > { %9551 = vmatprep.mubr.f32.mxu1 %v1287_v1  ;;  %10331 = vmatprep.mubr.f32.mxu0 %v1285_v48  ;;  %15767 = vst [vmem:[#allocation87_spill] sm:$0xff] %v12808_v62  ;;  %v12810_v48 = vand.u32 4294901760, %v499_v51  ;;  %v15770_v1 = vand.u32 4294901760, %v12779_v14  ;;  %v1337_v52 = vand.u32 4294901760, %v1336_v31  ;;  %v511_v31 = vsel %vm347_vm0, %v229_v5, 0 }
  0x71   : > { %15765 = vst [vmem:[#allocation86_spill] sm:$0xff] %v12795_v32  ;;  %v12855_v5 = vsub.f32 %v502_v24, %v12819_v34 }
  0x72   : > { %15768 = vst [vmem:[#allocation88_spill] sm:$0xff] %v12810_v48  ;;  %v1356_v44 = vsub.f32 %v12779_v14, %v15770_v1 }
  0x73   : > { %9552 = vmatmul.mubr.f32.gmra.mrb[38].mxu1 %v1297_v2  ;;  %10332 = vmatmul.mubr.f32.gmra.mrb[38].mxu0 %v1295_v53  ;;  %v228_v2 = vld [vmem:[%s12255_s12 + $0x1a8] sm:$0xff]  ;;  %v12814_v53 = vsub.f32 %v496_v45, %v12795_v32  ;;  %v15774_v45 = vand.u32 4294901760, %v12787_v46  ;;  %v1347_v32 = vand.u32 4294901760, %v1346_v19  ;;  %15778 = vst [vmem:[#allocation93_spill] sm:$0xff] %v12855_v5 }
  0x74   : > { %9554 = vmatprep.mubr.f32.mxu1 %v1307_v50  ;;  %10334 = vmatprep.mubr.f32.mxu0 %v1305_v63  ;;  %v12821_v50 = vand.u32 4294901760, %v505_v3  ;;  %v15773_v63 = vand.u32 4294901760, %v12784_v6  ;;  %v508_v1 = vsel %vm347_vm0, %v228_v2, 0  ;;  %v15776_v2 = vand.u32 4294901760, %v12187_v7  ;;  %v231_v7 = vld [vmem:[%s12255_s12 + $0x1c0] sm:$0xff] }
  0x75   : > { %15769 = vst [vmem:[#allocation89_spill] sm:$0xff] %v12814_v53  ;;  %v12830_v26 = vsub.f32 %v12787_v46, %v15774_v45  ;;  %v12122_v45 = vld [vmem:[%s15116_s1 + $0x20] sm:$0xff] }
  0x76   : > { %15772 = vst [vmem:[#allocation91_spill] sm:$0xff] %v12821_v50  ;;  %v1366_v49 = vsub.f32 %v12784_v6, %v15773_v63  ;;  %v230_v63 = vld [vmem:[%s12255_s12 + $0x1b8] sm:$0xff]  ;;  %v12858_v58 = vsub.f32 %v505_v3, %v12821_v50  ;;  %v15782_v3 = vand.u32 4294901760, %v12808_v62  ;;  %v517_v50 = vsel %vm347_vm0, %v231_v7, 0 }
  0x77   : > { %9555 = vmatmul.mubr.f32.gmra.mrb[40].mxu1 %v1317_v59  ;;  %10335 = vmatmul.mubr.f32.gmra.mrb[40].mxu0 %v1315_v43  ;;  %v12835_v43 = vsub.f32 %v499_v51, %v12810_v48  ;;  %v15777_v51 = vand.u32 4294901760, %v12192_v8  ;;  %v1357_v59 = vand.u32 4294901760, %v1356_v44  ;;  %v12860_v48 = vand.u32 4294901760, %v508_v1 }
  0x78   : > { %9557 = vmatprep.mubr.f32.mxu1 %v1327_v20  ;;  %10337 = vmatprep.mubr.f32.mxu0 %v1325_v0  ;;  %v12845_v20 = vsub.f32 %v12122_v45, %v15776_v2  ;;  %v12123_v0 = vld [vmem:[%s15116_s1 + $0x28] sm:$0xff]  ;;  %15779 = vst [vmem:[#allocation94_spill] sm:$0xff] %v12858_v58  ;;  %v15781_v45 = vand.u32 4294901760, %v12757_v41  ;;  %v1367_v2 = vand.u32 4294901760, %v1366_v49  ;;  %v1377_v8 = vand.u32 4294901760, %v12830_v26 }
  0x79   : > { %15775 = vst [vmem:[#allocation92_spill] sm:$0xff] %v12835_v43  ;;  %v12852_v19 = vsub.f32 %v12123_v0, %v15777_v51  ;;  %15780 = vst [vmem:[#allocation95_spill] sm:$0xff] %v12860_v48  ;;  %v1386_v44 = vsub.f32 %v12808_v62, %v15782_v3  ;;  %v1405_v51 = vand.u32 4294901760, %v12835_v43  ;;  %v232_v49 = vld [vmem:[%s12255_s12 + $0x1c8] sm:$0xff]  ;;  %v15784_v26 = vand.u32 4294901760, %v12814_v53 }
  0x7a   : > { %v2534_v0 = vand.u32 4294901760, %v12845_v20  ;;  %v12885_v37 = vsub.f32 %v508_v1, %v12860_v48  ;;  %v520_v23 = vsel %vm347_vm0, %v232_v49, 0  ;;  %v15788_v3 = vand.u32 4294901760, %v12784_v6 }
  0x7b   : > { %9558 = vmatmul.mubr.f32.gmra.mrb[42].mxu1 %v1337_v52  ;;  %10338 = vmatmul.mubr.f32.gmra.mrb[42].mxu0 %v15781_v45  ;;  %v2541_v24 = vand.u32 4294901760, %v12852_v19  ;;  %v12872_v52 = vand.u32 4294901760, %v511_v31  ;;  %v514_v45 = vsel %vm347_vm0, %v230_v63, 0  ;;  %v1396_v41 = vsub.f32 %v12814_v53, %v15784_v26  ;;  %v233_v63 = vld [vmem:[%s12255_s12 + $0x1d0] sm:$0xff] }
  0x7c   : > { %9560 = vmatprep.mubr.f32.mxu1 %v1347_v32  ;;  %10340 = vmatprep.mubr.f32.mxu0 %v1345_v61  ;;  %v2535_v32 = vsub.f32 %v12845_v20, %v2534_v0  ;;  %15785 = vst [vmem:[#allocation97_spill] sm:$0xff] %v12885_v37  ;;  %v15786_v26 = vand.u32 4294901760, %v12779_v14  ;;  %v12890_v7 = vand.u32 4294901760, %v514_v45  ;;  %v1387_v34 = vand.u32 4294901760, %v1386_v44 }
  0x7d   : > { %15783 = vst [vmem:[#allocation96_spill] sm:$0xff] %v12872_v52  ;;  %v2542_v61 = vsub.f32 %v12852_v19, %v2541_v24  ;;  %v11122_v4 = vpack.c.bf16 %v2541_v24, %v2534_v0  ;;  %v1406_v1 = vsub.f32 %v12835_v43, %v1405_v51  ;;  %v12897_v48 = vsub.f32 %v511_v31, %v12872_v52  ;;  %v234_v0 = vld [vmem:[%s12255_s12 + $0x1d8] sm:$0xff]  ;;  %v235_v24 = vld [vmem:[%s12255_s12 + $0x1e0] sm:$0xff]  ;;  %v236_v43 = vld [vmem:[%s12255_s12 + $0x1e8] sm:$0xff] }
  0x7e   : > { %15787 = vst [vmem:[#allocation98_spill] sm:$0xff] %v12890_v7  ;;  %v2536_v13 = vand.u32 4294901760, %v2535_v32  ;;  %v1397_v49 = vand.u32 4294901760, %v1396_v41  ;;  %v15792_v44 = vand.u32 4294901760, %v12858_v58  ;;  %v12910_v31 = vand.u32 4294901760, %v520_v23 }
  0x7f   : > { %9561 = vmatmul.mubr.f32.gmra.mrb[44].mxu1 %v1357_v59  ;;  %10341 = vmatmul.mubr.f32.gmra.mrb[44].mxu0 %v15786_v26  ;;  %v2543_v60 = vand.u32 4294901760, %v2542_v61  ;;  %15789 = vst [vmem:[#allocation99_spill] sm:$0xff] %v12897_v48  ;;  %v12899_v59 = vand.u32 4294901760, %v517_v50  ;;  %v523_v26 = vsel %vm347_vm0, %v233_v63, 0  ;;  %v526_v41 = vsel %vm347_vm0, %v234_v0, 0 }
  0x80   : > { %9563 = vmatprep.mubr.f32.mxu1 %v1367_v2  ;;  %10343 = vmatprep.mubr.f32.mxu0 %v15788_v3  ;;  %v15791_v2 = vand.u32 4294901760, %v12855_v5  ;;  %v1426_v61 = vsub.f32 %v12858_v58, %v15792_v44  ;;  %15793 = vst [vmem:[#allocation101_spill] sm:$0xff] %v12910_v31  ;;  %v15794_v3 = vand.u32 4294901760, %v12787_v46  ;;  %v529_v63 = vsel %vm347_vm0, %v235_v24, 0  ;;  %v237_v46 = vld [vmem:[%s12255_s12 + $0x1f0] sm:$0xff] }
  0x81   : > { %15790 = vst [vmem:[#allocation100_spill] sm:$0xff] %v12899_v59  ;;  %v11062_v14 = vpack.c.bf16 %v2543_v60, %v2536_v13  ;;  %11123 = vmatprep.subr.bf16.mxu0 %v11122_v4  ;;  %v1435_v60 = vand.u32 4294901760, %v12885_v37  ;;  %v12916_v13 = vsub.f32 %v514_v45, %v12890_v7  ;;  %v1407_v44 = vand.u32 4294901760, %v1406_v1 }
  0x82   : > { %v1416_v32 = vsub.f32 %v12855_v5, %v15791_v2  ;;  %11125 = vmatpush3.bf16.msra.mxu0 %v11122_v4  ;;  %v15796_v2 = vand.u32 4294901760, %v12808_v62  ;;  %v1445_v4 = vand.u32 4294901760, %v12897_v48  ;;  %v12931_v0 = vsub.f32 %v520_v23, %v12910_v31 }
  0x83   : > { %9564 = vmatmul.mubr.f32.gmra.mrb[46].mxu1 %v1377_v8  ;;  %10344 = vmatmul.mubr.f32.gmra.mrb[46].mxu0 %v15794_v3  ;;  %15795 = vst [vmem:[#allocation102_spill] sm:$0xff] %v12916_v13  ;;  %v12924_v8 = vsub.f32 %v517_v50, %v12899_v59  ;;  %v12926_v3 = vand.u32 4294901760, %v523_v26  ;;  %v12935_v24 = vand.u32 4294901760, %v529_v63  ;;  %v15802_v1 = vand.u32 4294901760, %v12814_v53 }
  0x84   : > { %9566 = vmatprep.mubr.f32.mxu1 %v1387_v34  ;;  %10346 = vmatprep.mubr.f32.mxu0 %v15796_v2  ;;  %v1417_v45 = vand.u32 4294901760, %v1416_v32  ;;  %15799 = vst [vmem:[#allocation105_spill] sm:$0xff] %v12931_v0  ;;  %v12933_v34 = vand.u32 4294901760, %v526_v41  ;;  %v1427_v50 = vand.u32 4294901760, %v1426_v61  ;;  %v1436_v2 = vsub.f32 %v12885_v37, %v1435_v60 }
  0x85   : > { %15797 = vst [vmem:[#allocation103_spill] sm:$0xff] %v12924_v8  ;;  %15798 = vst [vmem:[#allocation104_spill] sm:$0xff] %v12926_v3  ;;  %11063 = vmatprep.subr.bf16.mxu1 %v11062_v14  ;;  %v1455_v62 = vand.u32 4294901760, %v12916_v13  ;;  %v532_v32 = vsel %vm347_vm0, %v236_v43, 0  ;;  %v1446_v23 = vsub.f32 %v12897_v48, %v1445_v4  ;;  %v1465_v6 = vand.u32 4294901760, %v12924_v8 }
  0x86   : > { %15800 = vst [vmem:[#allocation106_spill] sm:$0xff] %v12933_v34  ;;  %15801 = vst [vmem:[#allocation107_spill] sm:$0xff] %v12935_v24  ;;  %11065 = vmatpush3.bf16.msra.mxu1 %v11062_v14  ;;  %v12945_v14 = vsub.f32 %v523_v26, %v12926_v3  ;;  %v1475_v61 = vand.u32 4294901760, %v12931_v0  ;;  %v12951_v37 = vsub.f32 %v526_v41, %v12933_v34  ;;  %v15807_v48 = vand.u32 4294901760, %v12855_v5 }
  0x87   : > { %9567 = vmatmul.mubr.f32.gmra.mrb[48].mxu1 %v1397_v49  ;;  %10347 = vmatmul.mubr.f32.gmra.mrb[48].mxu0 %v15802_v1  ;;  %v535_v49 = vsel %vm347_vm0, %v237_v46, 0  ;;  %v238_v1 = vld [vmem:[%s12255_s12 + $0x1f8] sm:$0xff]  ;;  %v12954_v43 = vsub.f32 %v529_v63, %v12935_v24  ;;  %v1437_v26 = vand.u32 4294901760, %v1436_v2  ;;  %v1456_v46 = vsub.f32 %v12916_v13, %v1455_v62 }
  0x88   : > { %9569 = vmatprep.mubr.f32.mxu1 %v1407_v44  ;;  %10349 = vmatprep.mubr.f32.mxu0 %v1405_v51  ;;  %15803 = vst [vmem:[#allocation108_spill] sm:$0xff] %v12945_v14  ;;  %15804 = vst [vmem:[#allocation109_spill] sm:$0xff] %v12951_v37  ;;  %v12956_v51 = vand.u32 4294901760, %v532_v32  ;;  %v239_v44 = vld [vmem:[%s12255_s12 + $0x200] sm:$0xff]  ;;  %v12962_v53 = vand.u32 4294901760, %v535_v49  ;;  %v15809_v41 = vand.u32 4294901760, %v12858_v58  ;;  %v1466_v63 = vsub.f32 %v12924_v8, %v1465_v6 }
  0x89   : > { %15805 = vst [vmem:[#allocation110_spill] sm:$0xff] %v12954_v43  ;;  %v1447_v34 = vand.u32 4294901760, %v1446_v23  ;;  %v1485_v24 = vand.u32 4294901760, %v12945_v14  ;;  %v541_v5 = vsel %vm347_vm0, %v239_v44, 0  ;;  %v1476_v2 = vsub.f32 %v12931_v0, %v1475_v61  ;;  %v241_v23 = vld [vmem:[%s12255_s12 + $0x210] sm:$0xff] }
  0x8a   : > { %15806 = vst [vmem:[#allocation111_spill] sm:$0xff] %v12956_v51  ;;  %15808 = vst [vmem:[#allocation112_spill] sm:$0xff] %v12962_v53  ;;  %v1495_v13 = vand.u32 4294901760, %v12951_v37  ;;  %v12975_v58 = vsub.f32 %v532_v32, %v12956_v51  ;;  %v1467_v0 = vand.u32 4294901760, %v1466_v63  ;;  %v12984_v3 = vand.u32 4294901760, %v541_v5  ;;  %v245_v51 = vld [vmem:[%s12255_s12 + $0x230] sm:$0xff] }
  0x8b   : > { %9570 = vmatmul.mubr.f32.gmra.mrb[50].mxu1 %v1417_v45  ;;  %10350 = vmatmul.mubr.f32.gmra.mrb[50].mxu0 %v15807_v48  ;;  %v538_v45 = vsel %vm347_vm0, %v238_v1, 0  ;;  %v240_v48 = vld [vmem:[%s12255_s12 + $0x208] sm:$0xff]  ;;  %v12979_v1 = vsub.f32 %v535_v49, %v12962_v53  ;;  %v1486_v8 = vsub.f32 %v12945_v14, %v1485_v24  ;;  %v15814_v49 = vand.u32 4294901760, %v12954_v43 }
  0x8c   : > { %9572 = vmatprep.mubr.f32.mxu1 %v1427_v50  ;;  %10352 = vmatprep.mubr.f32.mxu0 %v15809_v41  ;;  %15810 = vst [vmem:[#allocation113_spill] sm:$0xff] %v12975_v58  ;;  %v1457_v41 = vand.u32 4294901760, %v1456_v46  ;;  %v12981_v44 = vand.u32 4294901760, %v538_v45  ;;  %15813 = vst [vmem:[#allocation116_spill] sm:$0xff] %v12984_v3  ;;  %v544_v32 = vsel %vm347_vm0, %v240_v48, 0  ;;  %v242_v50 = vld [vmem:[%s12255_s12 + $0x218] sm:$0xff]  ;;  %v1496_v46 = vsub.f32 %v12951_v37, %v1495_v13 }
  0x8d   : > { %15811 = vst [vmem:[#allocation114_spill] sm:$0xff] %v12979_v1  ;;  %v1506_v53 = vsub.f32 %v12954_v43, %v15814_v49  ;;  %v1525_v63 = vand.u32 4294901760, %v12979_v1  ;;  %v1487_v37 = vand.u32 4294901760, %v1486_v8  ;;  %v13003_v49 = vsub.f32 %v541_v5, %v12984_v3 }
  0x8e   : > { %15812 = vst [vmem:[#allocation115_spill] sm:$0xff] %v12981_v44  ;;  %v12997_v48 = vsub.f32 %v538_v45, %v12981_v44  ;;  %v1497_v31 = vand.u32 4294901760, %v1496_v46 }
  0x8f   : > { %9573 = vmatmul.mubr.f32.gmra.mrb[52].mxu1 %v1437_v26  ;;  %10353 = vmatmul.mubr.f32.gmra.mrb[52].mxu0 %v1435_v60  ;;  %v547_v26 = vsel %vm347_vm0, %v241_v23, 0  ;;  %v1477_v60 = vand.u32 4294901760, %v1476_v2  ;;  %v12999_v23 = vand.u32 4294901760, %v544_v32  ;;  %v550_v2 = vsel %vm347_vm0, %v242_v50, 0  ;;  %15817 = vst [vmem:[#allocation119_spill] sm:$0xff] %v13003_v49  ;;  %v246_v50 = vld [vmem:[%s12255_s12 + $0x238] sm:$0xff] }
  0x90   : > { %9575 = vmatprep.mubr.f32.mxu1 %v1447_v34  ;;  %10355 = vmatprep.mubr.f32.mxu0 %v1445_v4  ;;  %v1515_v4 = vand.u32 4294901760, %v12975_v58  ;;  %v243_v34 = vld [vmem:[%s12255_s12 + $0x220] sm:$0xff]  ;;  %15815 = vst [vmem:[#allocation117_spill] sm:$0xff] %v12997_v48  ;;  %v13005_v14 = vand.u32 4294901760, %v547_v26  ;;  %v1507_v45 = vand.u32 4294901760, %v1506_v53  ;;  %v13011_v59 = vand.u32 4294901760, %v550_v2 }
  0x91   : > { %15816 = vst [vmem:[#allocation118_spill] sm:$0xff] %v12999_v23  ;;  %v1535_v5 = vand.u32 4294901760, %v12997_v48  ;;  %v13016_v8 = vsub.f32 %v544_v32, %v12999_v23  ;;  %v1545_v53 = vand.u32 4294901760, %v13003_v49 }
  0x92   : > { %15818 = vst [vmem:[#allocation120_spill] sm:$0xff] %v13005_v14  ;;  %v1516_v44 = vsub.f32 %v12975_v58, %v1515_v4  ;;  %15819 = vst [vmem:[#allocation121_spill] sm:$0xff] %v13011_v59  ;;  %v13022_v46 = vsub.f32 %v547_v26, %v13005_v14  ;;  %v13029_v32 = vsub.f32 %v550_v2, %v13011_v59 }
  0x93   : > { %9576 = vmatmul.mubr.f32.gmra.mrb[54].mxu1 %v1457_v41  ;;  %10356 = vmatmul.mubr.f32.gmra.mrb[54].mxu0 %v1455_v62  ;;  %v244_v41 = vld [vmem:[%s12255_s12 + $0x228] sm:$0xff]  ;;  %v553_v62 = vsel %vm347_vm0, %v243_v34, 0  ;;  %15820 = vst [vmem:[#allocation122_spill] sm:$0xff] %v13016_v8  ;;  %v247_v34 = vld [vmem:[%s12255_s12 + $0x240] sm:$0xff]  ;;  %v1536_v26 = vsub.f32 %v12997_v48, %v1535_v5  ;;  %v1546_v2 = vsub.f32 %v13003_v49, %v1545_v53 }
  0x94   : > { %9578 = vmatprep.mubr.f32.mxu1 %v1467_v0  ;;  %10358 = vmatprep.mubr.f32.mxu0 %v1465_v6  ;;  %v1526_v6 = vsub.f32 %v12979_v1, %v1525_v63  ;;  %v556_v0 = vsel %vm347_vm0, %v244_v41, 0  ;;  %15821 = vst [vmem:[#allocation123_spill] sm:$0xff] %v13022_v46  ;;  %v1517_v1 = vand.u32 4294901760, %v1516_v44  ;;  %15823 = vst [vmem:[#allocation125_spill] sm:$0xff] %v13029_v32  ;;  %v1555_v41 = vand.u32 4294901760, %v13016_v8 }
  0x95   : > { %v13031_v58 = vand.u32 4294901760, %v556_v0  ;;  %v15826_v44 = vand.u32 4294901760, %v12954_v43  ;;  %v1575_v48 = vand.u32 4294901760, %v13029_v32  ;;  %v1537_v49 = vand.u32 4294901760, %v1536_v26 }
  0x96   : > { %v1556_v43 = vsub.f32 %v13016_v8, %v1555_v41  ;;  %v1547_v23 = vand.u32 4294901760, %v1546_v2 }
  0x97   : > { %9579 = vmatmul.mubr.f32.gmra.mrb[56].mxu1 %v1477_v60  ;;  %10359 = vmatmul.mubr.f32.gmra.mrb[56].mxu0 %v1475_v61  ;;  %v13024_v60 = vand.u32 4294901760, %v553_v62  ;;  %v559_v61 = vsel %vm347_vm0, %v245_v51, 0  ;;  %15824 = vst [vmem:[#allocation126_spill] sm:$0xff] %v13031_v58  ;;  %v248_v51 = vld [vmem:[%s12255_s12 + $0x248] sm:$0xff]  ;;  %v13051_v59 = vsub.f32 %v556_v0, %v13031_v58  ;;  %v1576_v26 = vsub.f32 %v13029_v32, %v1575_v48 }
  0x98   : > { %9581 = vmatprep.mubr.f32.mxu1 %v1487_v37  ;;  %10361 = vmatprep.mubr.f32.mxu0 %v1485_v24  ;;  %v562_v37 = vsel %vm347_vm0, %v246_v50, 0  ;;  %v1527_v24 = vand.u32 4294901760, %v1526_v6  ;;  %v13036_v14 = vand.u32 4294901760, %v559_v61  ;;  %v1565_v50 = vand.u32 4294901760, %v13022_v46 }
  0x99   : > { %15822 = vst [vmem:[#allocation124_spill] sm:$0xff] %v13024_v60  ;;  %v13047_v6 = vand.u32 4294901760, %v562_v37  ;;  %15829 = vst [vmem:[#allocation130_spill] sm:$0xff] %v13051_v59  ;;  %v1577_v2 = vand.u32 4294901760, %v1576_v26 }
  0x9a   : > { %15825 = vst [vmem:[#allocation127_spill] sm:$0xff] %v13036_v14  ;;  %v1566_v0 = vsub.f32 %v13022_v46, %v1565_v50 }
  0x9b   : > { %9582 = vmatmul.mubr.f32.gmra.mrb[58].mxu1 %v1497_v31  ;;  %10362 = vmatmul.mubr.f32.gmra.mrb[58].mxu0 %v1495_v13  ;;  %v13044_v31 = vsub.f32 %v553_v62, %v13024_v60  ;;  %v565_v13 = vsel %vm347_vm0, %v247_v34, 0  ;;  %15828 = vst [vmem:[#allocation129_spill] sm:$0xff] %v13047_v6  ;;  %v13057_v62 = vsub.f32 %v559_v61, %v13036_v14  ;;  %v250_v60 = vld [vmem:[%s12255_s12 + $0x258] sm:$0xff]  ;;  %v251_v61 = vld [vmem:[%s12255_s12 + $0x260] sm:$0xff] }
  0x9c   : > { %9584 = vmatprep.mubr.f32.mxu1 %v1507_v45  ;;  %10364 = vmatprep.mubr.f32.mxu0 %v15826_v44  ;;  %v568_v45 = vsel %vm347_vm0, %v248_v51, 0  ;;  %v249_v44 = vld [vmem:[%s12255_s12 + $0x250] sm:$0xff]  ;;  %v13059_v34 = vand.u32 4294901760, %v565_v13  ;;  %v13065_v58 = vsub.f32 %v562_v37, %v13047_v6  ;;  %v577_v8 = vsel %vm347_vm0, %v251_v61, 0 }
  0x9d   : > { %15827 = vst [vmem:[#allocation128_spill] sm:$0xff] %v13044_v31  ;;  %15830 = vst [vmem:[#allocation131_spill] sm:$0xff] %v13057_v62  ;;  %v1585_v51 = vand.u32 4294901760, %v13044_v31 }
  0x9e   : > { %15831 = vst [vmem:[#allocation132_spill] sm:$0xff] %v13059_v34  ;;  %15832 = vst [vmem:[#allocation133_spill] sm:$0xff] %v13065_v58  ;;  %v13076_v37 = vsub.f32 %v565_v13, %v13059_v34  ;;  %v253_v13 = vld [vmem:[%s12255_s12 + $0x270] sm:$0xff] }
  0x9f   : > { %9585 = vmatmul.mubr.f32.gmra.mrb[60].mxu1 %v1517_v1  ;;  %10365 = vmatmul.mubr.f32.gmra.mrb[60].mxu0 %v1515_v4  ;;  %v13067_v1 = vand.u32 4294901760, %v568_v45  ;;  %v571_v4 = vsel %vm347_vm0, %v249_v44, 0  ;;  %v1567_v44 = vand.u32 4294901760, %v1566_v0  ;;  %v1586_v46 = vsub.f32 %v13044_v31, %v1585_v51 }
  0xa0   : > { %9587 = vmatprep.mubr.f32.mxu1 %v1527_v24  ;;  %10367 = vmatprep.mubr.f32.mxu0 %v1525_v63  ;;  %v574_v63 = vsel %vm347_vm0, %v250_v60, 0  ;;  %v1557_v24 = vand.u32 4294901760, %v1556_v43  ;;  %15834 = vst [vmem:[#allocation135_spill] sm:$0xff] %v13076_v37  ;;  %v13079_v32 = vand.u32 4294901760, %v571_v4  ;;  %v252_v60 = vld [vmem:[%s12255_s12 + $0x268] sm:$0xff]  ;;  %v15839_v0 = vand.u32 4294901760, %v13057_v62 }
  0xa1   : > { %15833 = vst [vmem:[#allocation134_spill] sm:$0xff] %v13067_v1  ;;  %v13085_v43 = vsub.f32 %v568_v45, %v13067_v1  ;;  %v13097_v31 = vand.u32 4294901760, %v577_v8  ;;  %v580_v45 = vsel %vm347_vm0, %v252_v60, 0  ;;  %v254_v1 = vld [vmem:[%s12255_s12 + $0x278] sm:$0xff]  ;;  %v1587_v26 = vand.u32 4294901760, %v1586_v46  ;;  %v255_v60 = vld [vmem:[%s12255_s12 + $0x280] sm:$0xff] }
  0xa2   : > { %15835 = vst [vmem:[#allocation136_spill] sm:$0xff] %v13079_v32  ;;  %v1606_v61 = vsub.f32 %v13057_v62, %v15839_v0  ;;  %v13102_v34 = vsub.f32 %v571_v4, %v13079_v32  ;;  %v586_v46 = vsel %vm347_vm0, %v254_v1, 0  ;;  %v15845_v4 = vand.u32 4294901760, %v12198_v10  ;;  %v257_v32 = vld [vmem:[%s12255_s12 + $0x290] sm:$0xff] }
  0xa3   : > { %9588 = vmatmul.mubr.f32.gmra.mrb[62].mxu1 %v1537_v49  ;;  %10368 = vmatmul.mubr.f32.gmra.mrb[62].mxu0 %v1535_v5  ;;  %15836 = vst [vmem:[#allocation137_spill] sm:$0xff] %v13085_v43  ;;  %v13087_v5 = vand.u32 4294901760, %v574_v63  ;;  %15840 = vst [vmem:[#allocation139_spill] sm:$0xff] %v13097_v31 }
  0xa4   : > { %9590 = vmatprep.mubr.f32.mxu1 %v1547_v23  ;;  %10370 = vmatprep.mubr.f32.mxu0 %v1545_v53  ;;  %v15838_v23 = vand.u32 4294901760, %v13051_v59  ;;  %15841 = vst [vmem:[#allocation140_spill] sm:$0xff] %v13102_v34  ;;  %v1645_v10 = vand.u32 4294901760, %v13102_v34 }
  0xa5   : > { %15837 = vst [vmem:[#allocation138_spill] sm:$0xff] %v13087_v5  ;;  %v13110_v49 = vsub.f32 %v574_v63, %v13087_v5  ;;  %v15846_v63 = vand.u32 4294901760, %v13076_v37  ;;  %v256_v5 = vld [vmem:[%s12255_s12 + $0x288] sm:$0xff] }
  0xa6   : > { %v1596_v53 = vsub.f32 %v13051_v59, %v15838_v23  ;;  %v1646_v3 = vsub.f32 %v13102_v34, %v1645_v10 }
  0xa7   : > { %9591 = vmatmul.mubr.f32.gmra.mrb[64].mxu1 %v1557_v24  ;;  %10371 = vmatmul.mubr.f32.gmra.mrb[64].mxu0 %v1555_v41  ;;  %v583_v24 = vsel %vm347_vm0, %v253_v13, 0  ;;  %v15842_v41 = vand.u32 4294901760, %v13065_v58  ;;  %15843 = vst [vmem:[#allocation141_spill] sm:$0xff] %v13110_v49  ;;  %v1626_v0 = vsub.f32 %v13076_v37, %v15846_v63 }
  0xa8   : > { %9593 = vmatprep.mubr.f32.mxu1 %v1567_v44  ;;  %10373 = vmatprep.mubr.f32.mxu0 %v1565_v50  ;;  %v1597_v6 = vand.u32 4294901760, %v1596_v53  ;;  %v13113_v44 = vand.u32 4294901760, %v580_v45  ;;  %v12124_v50 = vld [vmem:[%s15116_s1 + $0x30] sm:$0xff]  ;;  %v13127_v53 = vsub.f32 %v577_v8, %v13097_v31  ;;  %v13129_v1 = vand.u32 4294901760, %v583_v24 }
  0xa9   : > { %v1616_v23 = vsub.f32 %v13065_v58, %v15842_v41  ;;  %v13121_v13 = vsub.f32 %v12124_v50, %v15845_v4  ;;  %v1607_v41 = vand.u32 4294901760, %v1606_v61  ;;  %v589_v50 = vsel %vm347_vm0, %v255_v60, 0 }
  0xaa   : > { %15844 = vst [vmem:[#allocation142_spill] sm:$0xff] %v13113_v44  ;;  %15847 = vst [vmem:[#allocation143_spill] sm:$0xff] %v13127_v53  ;;  %v15849_v61 = vand.u32 4294901760, %v12203_v11  ;;  %v15850_v8 = vand.u32 4294901760, %v13085_v43  ;;  %v13149_v60 = vsub.f32 %v580_v45, %v13113_v44  ;;  %v592_v31 = vsel %vm347_vm0, %v256_v5, 0 }
  0xab   : > { %9594 = vmatmul.mubr.f32.gmra.mrb[66].mxu1 %v1577_v2  ;;  %10374 = vmatmul.mubr.f32.gmra.mrb[66].mxu0 %v1575_v48  ;;  %15848 = vst [vmem:[#allocation144_spill] sm:$0xff] %v13129_v1  ;;  %v2548_v48 = vand.u32 4294901760, %v13121_v13  ;;  %v12125_v2 = vld [vmem:[%s15116_s1 + $0x38] sm:$0xff]  ;;  %v13161_v45 = vand.u32 4294901760, %v589_v50  ;;  %v15856_v5 = vand.u32 4294901760, %v13057_v62  ;;  %v1627_v44 = vand.u32 4294901760, %v1626_v0 }
  0xac   : > { %9596 = vmatprep.mubr.f32.mxu1 %v1587_v26  ;;  %10376 = vmatprep.mubr.f32.mxu0 %v1585_v51  ;;  %v13140_v4 = vsub.f32 %v12125_v2, %v15849_v61  ;;  %v1636_v63 = vsub.f32 %v13085_v43, %v15850_v8  ;;  %v13146_v26 = vand.u32 4294901760, %v586_v46  ;;  %15852 = vst [vmem:[#allocation146_spill] sm:$0xff] %v13149_v60  ;;  %v15853_v2 = vand.u32 4294901760, %v13051_v59 }
  0xad   : > { %v2549_v14 = vsub.f32 %v13121_v13, %v2548_v48  ;;  %v1617_v61 = vand.u32 4294901760, %v1616_v23  ;;  %v13159_v51 = vsub.f32 %v583_v24, %v13129_v1  ;;  %15855 = vst [vmem:[#allocation148_spill] sm:$0xff] %v13161_v45  ;;  %v13168_v59 = vand.u32 4294901760, %v592_v31 }
  0xae   : > { %15851 = vst [vmem:[#allocation145_spill] sm:$0xff] %v13146_v26  ;;  %v2555_v11 = vand.u32 4294901760, %v13140_v4  ;;  %v1637_v23 = vand.u32 4294901760, %v1636_v63  ;;  %v595_v24 = vsel %vm347_vm0, %v257_v32, 0  ;;  %v15858_v1 = vand.u32 4294901760, %v13110_v49 }
  0xaf   : > { %9597 = vmatmul.mubr.f32.gmra.mrb[68].mxu1 %v1597_v6  ;;  %10377 = vmatmul.mubr.f32.gmra.mrb[68].mxu0 %v15853_v2  ;;  %15854 = vst [vmem:[#allocation147_spill] sm:$0xff] %v13159_v51  ;;  %v258_v6 = vld [vmem:[%s12255_s12 + $0x298] sm:$0xff]  ;;  %v2550_v7 = vand.u32 4294901760, %v2549_v14  ;;  %15857 = vst [vmem:[#allocation149_spill] sm:$0xff] %v13168_v59  ;;  %v13176_v0 = vsub.f32 %v586_v46, %v13146_v26  ;;  %v15860_v63 = vand.u32 4294901760, %v13065_v58  ;;  %v15861_v32 = vand.u32 4294901760, %v13127_v53 }
  0xb0   : > { %9599 = vmatprep.mubr.f32.mxu1 %v1607_v41  ;;  %10379 = vmatprep.mubr.f32.mxu0 %v15856_v5  ;;  %v2556_v2 = vsub.f32 %v13140_v4, %v2555_v11  ;;  %v11126_v8 = vpack.c.bf16 %v2555_v11, %v2548_v48  ;;  %v1656_v41 = vsub.f32 %v13110_v49, %v15858_v1  ;;  %v259_v5 = vld [vmem:[%s12255_s12 + $0x2a0] sm:$0xff]  ;;  %v1685_v11 = vand.u32 4294901760, %v13159_v51  ;;  %v260_v58 = vld [vmem:[%s12255_s12 + $0x2a8] sm:$0xff]  ;;  %v261_v26 = vld [vmem:[%s12255_s12 + $0x2b0] sm:$0xff] }
  0xb1   : > { %15859 = vst [vmem:[#allocation150_spill] sm:$0xff] %v13176_v0  ;;  %v1666_v48 = vsub.f32 %v13127_v53, %v15861_v32  ;;  %v13186_v1 = vsub.f32 %v589_v50, %v13161_v45  ;;  %v598_v46 = vsel %vm347_vm0, %v258_v6, 0  ;;  %v15863_v62 = vand.u32 4294901760, %v13076_v37 }
  0xb2   : > { %v2557_v14 = vand.u32 4294901760, %v2556_v2  ;;  %v1647_v2 = vand.u32 4294901760, %v1646_v3  ;;  %v601_v32 = vsel %vm347_vm0, %v259_v5, 0  ;;  %11127 = vmatprep.subr.bf16.mxu0 %v11126_v8  ;;  %v15866_v50 = vand.u32 4294901760, %v13149_v60 }
  0xb3   : > { %9600 = vmatmul.mubr.f32.gmra.mrb[70].mxu1 %v1617_v61  ;;  %10380 = vmatmul.mubr.f32.gmra.mrb[70].mxu0 %v15860_v63  ;;  %15862 = vst [vmem:[#allocation151_spill] sm:$0xff] %v13186_v1  ;;  %v13191_v61 = vand.u32 4294901760, %v595_v24  ;;  %v13194_v63 = vsub.f32 %v592_v31, %v13168_v59  ;;  %v1657_v3 = vand.u32 4294901760, %v1656_v41  ;;  %v1667_v31 = vand.u32 4294901760, %v1666_v48  ;;  %v263_v48 = vld [vmem:[%s12255_s12 + $0x2c0] sm:$0xff]  ;;  %v264_v59 = vld [vmem:[%s12255_s12 + $0x2c8] sm:$0xff] }
  0xb4   : > { %9602 = vmatprep.mubr.f32.mxu1 %v1627_v44  ;;  %10382 = vmatprep.mubr.f32.mxu0 %v15863_v62  ;;  %v11066_v34 = vpack.c.bf16 %v2557_v14, %v2550_v7  ;;  %v1676_v6 = vsub.f32 %v13149_v60, %v15866_v50  ;;  %v1695_v44 = vand.u32 4294901760, %v13176_v0  ;;  %v13203_v62 = vand.u32 4294901760, %v598_v46 }
  0xb5   : > { %15864 = vst [vmem:[#allocation152_spill] sm:$0xff] %v13191_v61  ;;  %15865 = vst [vmem:[#allocation153_spill] sm:$0xff] %v13194_v63  ;;  %11129 = vmatpush3.bf16.msra.mxu0 %v11126_v8  ;;  %v15868_v7 = vand.u32 4294901760, %v13085_v43  ;;  %v1686_v5 = vsub.f32 %v13159_v51, %v1685_v11  ;;  %v1705_v14 = vand.u32 4294901760, %v13186_v1  ;;  %v13210_v50 = vsub.f32 %v595_v24, %v13191_v61  ;;  %v262_v43 = vld [vmem:[%s12255_s12 + $0x2b8] sm:$0xff] }
  0xb6   : > { %15867 = vst [vmem:[#allocation154_spill] sm:$0xff] %v13203_v62  ;;  %11067 = vmatprep.subr.bf16.mxu1 %v11066_v34  ;;  %v13212_v37 = vand.u32 4294901760, %v601_v32  ;;  %v604_v8 = vsel %vm347_vm0, %v260_v58, 0  ;;  %v1715_v41 = vand.u32 4294901760, %v13194_v63  ;;  %v15872_v24 = vand.u32 4294901760, %v13110_v49 }
  0xb7   : > { %9603 = vmatmul.mubr.f32.gmra.mrb[72].mxu1 %v1637_v23  ;;  %10383 = vmatmul.mubr.f32.gmra.mrb[72].mxu0 %v15868_v7  ;;  %15869 = vst [vmem:[#allocation155_spill] sm:$0xff] %v13210_v50  ;;  %v607_v23 = vsel %vm347_vm0, %v261_v26, 0  ;;  %v1677_v7 = vand.u32 4294901760, %v1676_v6  ;;  %v1687_v51 = vand.u32 4294901760, %v1686_v5  ;;  %v13225_v58 = vand.u32 4294901760, %v604_v8 }
  0xb8   : > { %9605 = vmatprep.mubr.f32.mxu1 %v1647_v2  ;;  %10385 = vmatprep.mubr.f32.mxu0 %v1645_v10  ;;  %15870 = vst [vmem:[#allocation156_spill] sm:$0xff] %v13212_v37  ;;  %v1696_v2 = vsub.f32 %v13176_v0, %v1695_v44  ;;  %v13221_v10 = vsub.f32 %v598_v46, %v13203_v62  ;;  %v13227_v26 = vand.u32 4294901760, %v607_v23  ;;  %v610_v61 = vsel %vm347_vm0, %v262_v43, 0 }
  0xb9   : > { %11069 = vmatpush3.bf16.msra.mxu1 %v11066_v34  ;;  %15873 = vst [vmem:[#allocation158_spill] sm:$0xff] %v13225_v58  ;;  %v15875_v34 = vand.u32 4294901760, %v13127_v53  ;;  %v1706_v6 = vsub.f32 %v13186_v1, %v1705_v14  ;;  %v1725_v46 = vand.u32 4294901760, %v13210_v50  ;;  %v613_v5 = vsel %vm347_vm0, %v263_v48, 0 }
  0xba   : > { %15871 = vst [vmem:[#allocation157_spill] sm:$0xff] %v13221_v10  ;;  %15874 = vst [vmem:[#allocation159_spill] sm:$0xff] %v13227_v26  ;;  %v1716_v0 = vsub.f32 %v13194_v63, %v1715_v41  ;;  %v1697_v49 = vand.u32 4294901760, %v1696_v2  ;;  %v1735_v43 = vand.u32 4294901760, %v13221_v10  ;;  %v15878_v1 = vand.u32 4294901760, %v13149_v60  ;;  %v266_v60 = vld [vmem:[%s12255_s12 + $0x2d8] sm:$0xff] }
  0xbb   : > { %9606 = vmatmul.mubr.f32.gmra.mrb[74].mxu1 %v1657_v3  ;;  %10386 = vmatmul.mubr.f32.gmra.mrb[74].mxu0 %v15872_v24  ;;  %v13236_v3 = vsub.f32 %v601_v32, %v13212_v37  ;;  %v265_v24 = vld [vmem:[%s12255_s12 + $0x2d0] sm:$0xff]  ;;  %v13248_v32 = vsub.f32 %v604_v8, %v13225_v58  ;;  %v13251_v48 = vsub.f32 %v607_v23, %v13227_v26  ;;  %v13253_v63 = vand.u32 4294901760, %v613_v5 }
  0xbc   : > { %9608 = vmatprep.mubr.f32.mxu1 %v1667_v31  ;;  %10388 = vmatprep.mubr.f32.mxu0 %v15875_v34  ;;  %v13242_v31 = vand.u32 4294901760, %v610_v61  ;;  %v616_v34 = vsel %vm347_vm0, %v264_v59, 0  ;;  %v619_v2 = vsel %vm347_vm0, %v265_v24, 0  ;;  %v1707_v53 = vand.u32 4294901760, %v1706_v6  ;;  %v267_v24 = vld [vmem:[%s12255_s12 + $0x2e0] sm:$0xff] }
  0xbd   : > { %15876 = vst [vmem:[#allocation160_spill] sm:$0xff] %v13236_v3  ;;  %15879 = vst [vmem:[#allocation162_spill] sm:$0xff] %v13248_v32  ;;  %v1726_v59 = vsub.f32 %v13210_v50, %v1725_v46  ;;  %v1736_v37 = vsub.f32 %v13221_v10, %v1735_v43  ;;  %v13263_v23 = vand.u32 4294901760, %v616_v34  ;;  %v13265_v26 = vand.u32 4294901760, %v619_v2 }
  0xbe   : > { %15877 = vst [vmem:[#allocation161_spill] sm:$0xff] %v13242_v31  ;;  %15880 = vst [vmem:[#allocation163_spill] sm:$0xff] %v13251_v48  ;;  %v13261_v8 = vsub.f32 %v610_v61, %v13242_v31  ;;  %v622_v6 = vsel %vm347_vm0, %v266_v60, 0  ;;  %v625_v50 = vsel %vm347_vm0, %v267_v24, 0  ;;  %v268_v31 = vld [vmem:[%s12255_s12 + $0x2e8] sm:$0xff] }
  0xbf   : > { %9609 = vmatmul.mubr.f32.gmra.mrb[76].mxu1 %v1677_v7  ;;  %10389 = vmatmul.mubr.f32.gmra.mrb[76].mxu0 %v15878_v1  ;;  %15881 = vst [vmem:[#allocation164_spill] sm:$0xff] %v13253_v63  ;;  %v1745_v7 = vand.u32 4294901760, %v13236_v3  ;;  %v1717_v1 = vand.u32 4294901760, %v1716_v0  ;;  %15883 = vst [vmem:[#allocation166_spill] sm:$0xff] %v13263_v23  ;;  %v13271_v0 = vsub.f32 %v613_v5, %v13253_v63  ;;  %v1727_v61 = vand.u32 4294901760, %v1726_v59 }
  0xc0   : > { %9611 = vmatprep.mubr.f32.mxu1 %v1687_v51  ;;  %10391 = vmatprep.mubr.f32.mxu0 %v1685_v11  ;;  %15882 = vst [vmem:[#allocation165_spill] sm:$0xff] %v13261_v8  ;;  %15884 = vst [vmem:[#allocation167_spill] sm:$0xff] %v13265_v26  ;;  %v1755_v51 = vand.u32 4294901760, %v13248_v32  ;;  %v1765_v11 = vand.u32 4294901760, %v13251_v48  ;;  %v13282_v58 = vsub.f32 %v619_v2, %v13265_v26  ;;  %v13284_v5 = vand.u32 4294901760, %v622_v6 }
  0xc1   : > { %15885 = vst [vmem:[#allocation168_spill] sm:$0xff] %v13271_v0  ;;  %v1746_v10 = vsub.f32 %v13236_v3, %v1745_v7  ;;  %v1737_v60 = vand.u32 4294901760, %v1736_v37  ;;  %v1785_v24 = vand.u32 4294901760, %v13271_v0  ;;  %v13290_v3 = vand.u32 4294901760, %v625_v50 }
  0xc2   : > { %15887 = vst [vmem:[#allocation170_spill] sm:$0xff] %v13282_v58  ;;  %15888 = vst [vmem:[#allocation171_spill] sm:$0xff] %v13284_v5  ;;  %v1766_v59 = vsub.f32 %v13251_v48, %v1765_v11  ;;  %v628_v2 = vsel %vm347_vm0, %v268_v31, 0 }
  0xc3   : > { %9612 = vmatmul.mubr.f32.gmra.mrb[78].mxu1 %v1697_v49  ;;  %10392 = vmatmul.mubr.f32.gmra.mrb[78].mxu0 %v1695_v44  ;;  %v1775_v49 = vand.u32 4294901760, %v13261_v8  ;;  %v13279_v44 = vsub.f32 %v616_v34, %v13263_v23  ;;  %v1747_v34 = vand.u32 4294901760, %v1746_v10  ;;  %15889 = vst [vmem:[#allocation172_spill] sm:$0xff] %v13290_v3  ;;  %v270_v23 = vld [vmem:[%s12255_s12 + $0x2f8] sm:$0xff] }
  0xc4   : > { %9614 = vmatprep.mubr.f32.mxu1 %v1707_v53  ;;  %10394 = vmatprep.mubr.f32.mxu0 %v1705_v14  ;;  %v269_v53 = vld [vmem:[%s12255_s12 + $0x2f0] sm:$0xff]  ;;  %v1756_v14 = vsub.f32 %v13248_v32, %v1755_v51  ;;  %v13300_v32 = vsub.f32 %v622_v6, %v13284_v5  ;;  %v1767_v31 = vand.u32 4294901760, %v1766_v59  ;;  %v634_v6 = vsel %vm347_vm0, %v270_v23, 0 }
  0xc5   : > { %15886 = vst [vmem:[#allocation169_spill] sm:$0xff] %v13279_v44  ;;  %v631_v26 = vsel %vm347_vm0, %v269_v53, 0  ;;  %v1776_v37 = vsub.f32 %v13261_v8, %v1775_v49  ;;  %v13304_v53 = vand.u32 4294901760, %v628_v2  ;;  %v13307_v8 = vsub.f32 %v625_v50, %v13290_v3 }
  0xc6   : > { %15890 = vst [vmem:[#allocation173_spill] sm:$0xff] %v13300_v32  ;;  %v1757_v10 = vand.u32 4294901760, %v1756_v14  ;;  %v13309_v63 = vand.u32 4294901760, %v631_v26  ;;  %v1815_v50 = vand.u32 4294901760, %v13300_v32 }
  0xc7   : > { %9615 = vmatmul.mubr.f32.gmra.mrb[80].mxu1 %v1717_v1  ;;  %10395 = vmatmul.mubr.f32.gmra.mrb[80].mxu0 %v1715_v41  ;;  %v271_v1 = vld [vmem:[%s12255_s12 + $0x300] sm:$0xff]  ;;  %v1795_v41 = vand.u32 4294901760, %v13279_v44  ;;  %15891 = vst [vmem:[#allocation174_spill] sm:$0xff] %v13304_v53  ;;  %15892 = vst [vmem:[#allocation175_spill] sm:$0xff] %v13307_v8  ;;  %v1777_v14 = vand.u32 4294901760, %v1776_v37  ;;  %v13322_v23 = vsub.f32 %v628_v2, %v13304_v53 }
  0xc8   : > { %9617 = vmatprep.mubr.f32.mxu1 %v1727_v61  ;;  %10397 = vmatprep.mubr.f32.mxu0 %v1725_v46  ;;  %v272_v46 = vld [vmem:[%s12255_s12 + $0x308] sm:$0xff]  ;;  %v1786_v61 = vsub.f32 %v13271_v0, %v1785_v24  ;;  %15893 = vst [vmem:[#allocation176_spill] sm:$0xff] %v13309_v63  ;;  %v637_v48 = vsel %vm347_vm0, %v271_v1, 0  ;;  %v15894_v0 = vand.u32 4294901760, %v13282_v58  ;;  %v13324_v1 = vand.u32 4294901760, %v634_v6  ;;  %v275_v2 = vld [vmem:[%s12255_s12 + $0x320] sm:$0xff] }
  0xc9   : > { %v1796_v59 = vsub.f32 %v13279_v44, %v1795_v41  ;;  %15895 = vst [vmem:[#allocation177_spill] sm:$0xff] %v13322_v23  ;;  %v13326_v3 = vand.u32 4294901760, %v637_v48  ;;  %v13331_v44 = vsub.f32 %v631_v26, %v13309_v63  ;;  %v1816_v62 = vsub.f32 %v13300_v32, %v1815_v50  ;;  %v276_v63 = vld [vmem:[%s12255_s12 + $0x328] sm:$0xff] }
  0xca   : > { %15896 = vst [vmem:[#allocation178_spill] sm:$0xff] %v13324_v1 }
  0xcb   : > { %9618 = vmatmul.mubr.f32.gmra.mrb[82].mxu1 %v1737_v60  ;;  %10398 = vmatmul.mubr.f32.gmra.mrb[82].mxu0 %v1735_v43  ;;  %v273_v60 = vld [vmem:[%s12255_s12 + $0x310] sm:$0xff]  ;;  %v640_v43 = vsel %vm347_vm0, %v272_v46, 0  ;;  %15897 = vst [vmem:[#allocation179_spill] sm:$0xff] %v13326_v3  ;;  %v1787_v46 = vand.u32 4294901760, %v1786_v61  ;;  %15898 = vst [vmem:[#allocation180_spill] sm:$0xff] %v13331_v44  ;;  %v1797_v53 = vand.u32 4294901760, %v1796_v59  ;;  %v13345_v26 = vsub.f32 %v637_v48, %v13326_v3 }
  0xcc   : > { %9620 = vmatprep.mubr.f32.mxu1 %v1747_v34  ;;  %10400 = vmatprep.mubr.f32.mxu0 %v1745_v7  ;;  %v1806_v7 = vsub.f32 %v13282_v58, %v15894_v0  ;;  %v274_v34 = vld [vmem:[%s12255_s12 + $0x318] sm:$0xff]  ;;  %v643_v37 = vsel %vm347_vm0, %v273_v60, 0  ;;  %v1825_v0 = vand.u32 4294901760, %v13307_v8  ;;  %v649_v61 = vsel %vm347_vm0, %v275_v2, 0  ;;  %v284_v3 = vld [vmem:[%s12255_s12 + $0x368] sm:$0xff] }
  0xcd   : > { %v13338_v60 = vand.u32 4294901760, %v643_v37  ;;  %15902 = vst [vmem:[#allocation184_spill] sm:$0xff] %v13345_v26  ;;  %v13360_v48 = vand.u32 4294901760, %v649_v61  ;;  %v652_v2 = vsel %vm347_vm0, %v276_v63, 0 }
  0xce   : > { %v1807_v5 = vand.u32 4294901760, %v1806_v7  ;;  %v1826_v59 = vsub.f32 %v13307_v8, %v1825_v0  ;;  %v1845_v7 = vand.u32 4294901760, %v13331_v44 }
  0xcf   : > { %9621 = vmatmul.mubr.f32.gmra.mrb[84].mxu1 %v1757_v10  ;;  %10401 = vmatmul.mubr.f32.gmra.mrb[84].mxu0 %v1755_v51  ;;  %v13333_v51 = vand.u32 4294901760, %v640_v43  ;;  %v646_v10 = vsel %vm347_vm0, %v274_v34, 0  ;;  %15900 = vst [vmem:[#allocation182_spill] sm:$0xff] %v13338_v60  ;;  %v277_v34 = vld [vmem:[%s12255_s12 + $0x330] sm:$0xff]  ;;  %15906 = vst [vmem:[#allocation188_spill] sm:$0xff] %v13360_v48 }
  0xd0   : > { %9623 = vmatprep.mubr.f32.mxu1 %v1767_v31  ;;  %10403 = vmatprep.mubr.f32.mxu0 %v1765_v11  ;;  %v1835_v11 = vand.u32 4294901760, %v13322_v23  ;;  %v13342_v31 = vsub.f32 %v634_v6, %v13324_v1  ;;  %v13358_v6 = vsub.f32 %v643_v37, %v13338_v60  ;;  %v15907_v37 = vand.u32 4294901760, %v13282_v58 }
  0xd1   : > { %15899 = vst [vmem:[#allocation181_spill] sm:$0xff] %v13333_v51  ;;  %v1827_v60 = vand.u32 4294901760, %v1826_v59 }
  0xd2   : > { %15901 = vst [vmem:[#allocation183_spill] sm:$0xff] %v13342_v31  ;;  %15905 = vst [vmem:[#allocation187_spill] sm:$0xff] %v13358_v6  ;;  %v1836_v8 = vsub.f32 %v13322_v23, %v1835_v11  ;;  %v279_v23 = vld [vmem:[%s12255_s12 + $0x340] sm:$0xff] }
  0xd3   : > { %9624 = vmatmul.mubr.f32.gmra.mrb[86].mxu1 %v1777_v14  ;;  %10404 = vmatmul.mubr.f32.gmra.mrb[86].mxu0 %v1775_v49  ;;  %v13353_v49 = vsub.f32 %v640_v43, %v13333_v51  ;;  %v13355_v14 = vand.u32 4294901760, %v646_v10  ;;  %v1855_v43 = vand.u32 4294901760, %v13342_v31  ;;  %v1846_v51 = vsub.f32 %v13331_v44, %v1845_v7 }
  0xd4   : > { %9626 = vmatprep.mubr.f32.mxu1 %v1787_v46  ;;  %10406 = vmatprep.mubr.f32.mxu0 %v1785_v24  ;;  %v655_v46 = vsel %vm347_vm0, %v277_v34, 0  ;;  %v1817_v24 = vand.u32 4294901760, %v1816_v62  ;;  %v13375_v62 = vand.u32 4294901760, %v652_v2  ;;  %v1837_v59 = vand.u32 4294901760, %v1836_v8 }
  0xd5   : > { %15903 = vst [vmem:[#allocation185_spill] sm:$0xff] %v13353_v49  ;;  %15904 = vst [vmem:[#allocation186_spill] sm:$0xff] %v13355_v14  ;;  %v13372_v34 = vsub.f32 %v646_v10, %v13355_v14  ;;  %v15912_v10 = vand.u32 4294901760, %v13345_v26  ;;  %v1847_v58 = vand.u32 4294901760, %v1846_v51  ;;  %v15913_v32 = vand.u32 4294901760, %v13353_v49  ;;  %v12127_v51 = vld [vmem:[%s15116_s1 + $0x48] sm:$0xff] }
  0xd6   : > { %15909 = vst [vmem:[#allocation190_spill] sm:$0xff] %v13375_v62  ;;  %v661_v8 = vsel %vm347_vm0, %v279_v23, 0  ;;  %v12126_v23 = vld [vmem:[%s15116_s1 + $0x40] sm:$0xff] }
  0xd7   : > { %9627 = vmatmul.mubr.f32.gmra.mrb[88].mxu1 %v1797_v53  ;;  %10407 = vmatmul.mubr.f32.gmra.mrb[88].mxu0 %v1795_v41  ;;  %15908 = vst [vmem:[#allocation189_spill] sm:$0xff] %v13372_v34  ;;  %v278_v41 = vld [vmem:[%s12255_s12 + $0x338] sm:$0xff]  ;;  %v13377_v53 = vand.u32 4294901760, %v655_v46  ;;  %v1866_v63 = vsub.f32 %v13345_v26, %v15912_v10  ;;  %v280_v10 = vld [vmem:[%s12255_s12 + $0x348] sm:$0xff] }
  0xd8   : > { %9629 = vmatprep.mubr.f32.mxu1 %v1807_v5  ;;  %10409 = vmatprep.mubr.f32.mxu0 %v15907_v37  ;;  %v13382_v5 = vsub.f32 %v649_v61, %v13360_v48  ;;  %v1856_v37 = vsub.f32 %v13342_v31, %v1855_v43  ;;  %v658_v44 = vsel %vm347_vm0, %v278_v41, 0  ;;  %v1876_v61 = vsub.f32 %v13353_v49, %v15913_v32  ;;  %v281_v32 = vld [vmem:[%s12255_s12 + $0x350] sm:$0xff] }
  0xd9   : > { %15910 = vst [vmem:[#allocation191_spill] sm:$0xff] %v13377_v53  ;;  %v13398_v31 = vsub.f32 %v655_v46, %v13377_v53  ;;  %v15916_v41 = vand.u32 4294901760, %v13358_v6  ;;  %v1867_v53 = vand.u32 4294901760, %v1866_v63  ;;  %v282_v63 = vld [vmem:[%s12255_s12 + $0x358] sm:$0xff] }
  0xda   : > { %15911 = vst [vmem:[#allocation192_spill] sm:$0xff] %v13382_v5  ;;  %v1857_v46 = vand.u32 4294901760, %v1856_v37 }
  0xdb   : > { %9630 = vmatmul.mubr.f32.gmra.mrb[90].mxu1 %v1817_v24  ;;  %10410 = vmatmul.mubr.f32.gmra.mrb[90].mxu0 %v1815_v50  ;;  %v13395_v50 = vsub.f32 %v652_v2, %v13375_v62  ;;  %15915 = vst [vmem:[#allocation194_spill] sm:$0xff] %v13398_v31  ;;  %v15918_v2 = vand.u32 4294901760, %v12212_v15  ;;  %v15920_v62 = vand.u32 4294901760, %v12217_v16  ;;  %v1877_v15 = vand.u32 4294901760, %v1876_v61 }
  0xdc   : > { %9632 = vmatprep.mubr.f32.mxu1 %v1827_v60  ;;  %10412 = vmatprep.mubr.f32.mxu0 %v1825_v0  ;;  %v1886_v0 = vsub.f32 %v13358_v6, %v15916_v41  ;;  %v13405_v60 = vand.u32 4294901760, %v658_v44  ;;  %v13415_v41 = vand.u32 4294901760, %v661_v8  ;;  %v667_v16 = vsel %vm347_vm0, %v281_v32, 0 }
  0xdd   : > { %15914 = vst [vmem:[#allocation193_spill] sm:$0xff] %v13395_v50  ;;  %v13413_v24 = vsub.f32 %v12126_v23, %v15918_v2  ;;  %v13422_v48 = vsub.f32 %v12127_v51, %v15920_v62  ;;  %v15922_v23 = vand.u32 4294901760, %v13372_v34  ;;  %v283_v62 = vld [vmem:[%s12255_s12 + $0x360] sm:$0xff]  ;;  %v15923_v61 = vand.u32 4294901760, %v13382_v5 }
  0xde   : > { %15917 = vst [vmem:[#allocation195_spill] sm:$0xff] %v13405_v60  ;;  %15919 = vst [vmem:[#allocation196_spill] sm:$0xff] %v13415_v41  ;;  %v13443_v14 = vsub.f32 %v661_v8, %v13415_v41  ;;  %v670_v2 = vsel %vm347_vm0, %v282_v63, 0  ;;  %v285_v8 = vld [vmem:[%s12255_s12 + $0x370] sm:$0xff]  ;;  %v15929_v45 = vand.u32 4294901760, %v13395_v50 }
  0xdf   : > { %9633 = vmatmul.mubr.f32.gmra.mrb[92].mxu1 %v1837_v59  ;;  %10413 = vmatmul.mubr.f32.gmra.mrb[92].mxu0 %v1835_v11  ;;  %15921 = vst [vmem:[#allocation197_spill] sm:$0xff] %v13422_v48  ;;  %v1896_v11 = vsub.f32 %v13372_v34, %v15922_v23  ;;  %v664_v59 = vsel %vm347_vm0, %v280_v10, 0  ;;  %v2562_v37 = vand.u32 4294901760, %v13413_v24  ;;  %v1906_v51 = vsub.f32 %v13382_v5, %v15923_v61 }
  0xe0   : > { %9635 = vmatprep.mubr.f32.mxu1 %v1847_v58  ;;  %10415 = vmatprep.mubr.f32.mxu0 %v1845_v7  ;;  %v2569_v58 = vand.u32 4294901760, %v13422_v48  ;;  %v1887_v7 = vand.u32 4294901760, %v1886_v0  ;;  %v13439_v10 = vsub.f32 %v658_v44, %v13405_v60  ;;  %15925 = vst [vmem:[#allocation199_spill] sm:$0xff] %v13443_v14  ;;  %v13445_v32 = vand.u32 4294901760, %v664_v59 }
  0xe1   : > { %v2563_v23 = vsub.f32 %v13413_v24, %v2562_v37  ;;  %v15927_v61 = vand.u32 4294901760, %v13345_v26  ;;  %v13451_v44 = vand.u32 4294901760, %v667_v16  ;;  %v673_v60 = vsel %vm347_vm0, %v283_v62, 0 }
  0xe2   : > { %15924 = vst [vmem:[#allocation198_spill] sm:$0xff] %v13439_v10  ;;  %15926 = vst [vmem:[#allocation200_spill] sm:$0xff] %v13445_v32  ;;  %v2570_v0 = vsub.f32 %v13422_v48, %v2569_v58  ;;  %v1897_v1 = vand.u32 4294901760, %v1896_v11  ;;  %v1916_v63 = vsub.f32 %v13395_v50, %v15929_v45  ;;  %v15930_v48 = vand.u32 4294901760, %v13398_v31 }
  0xe3   : > { %9636 = vmatmul.mubr.f32.gmra.mrb[94].mxu1 %v1857_v46  ;;  %10416 = vmatmul.mubr.f32.gmra.mrb[94].mxu0 %v1855_v43  ;;  %15928 = vst [vmem:[#allocation201_spill] sm:$0xff] %v13451_v44  ;;  %v2564_v46 = vand.u32 4294901760, %v2563_v23  ;;  %v11130_v43 = vpack.c.bf16 %v2569_v58, %v2562_v37  ;;  %v13463_v26 = vand.u32 4294901760, %v670_v2  ;;  %v15932_v37 = vand.u32 4294901760, %v13353_v49 }
  0xe4   : > { %9638 = vmatprep.mubr.f32.mxu1 %v1867_v53  ;;  %10418 = vmatprep.mubr.f32.mxu0 %v15927_v61  ;;  %v2571_v41 = vand.u32 4294901760, %v2570_v0  ;;  %v1926_v53 = vsub.f32 %v13398_v31, %v15930_v48  ;;  %v1935_v61 = vand.u32 4294901760, %v13439_v10  ;;  %v13468_v11 = vsub.f32 %v664_v59, %v13445_v32  ;;  %v286_v59 = vld [vmem:[%s12255_s12 + $0x378] sm:$0xff] }
  0xe5   : > { %15931 = vst [vmem:[#allocation202_spill] sm:$0xff] %v13463_v26  ;;  %11131 = vmatprep.subr.bf16.mxu0 %v11130_v43  ;;  %v13470_v62 = vand.u32 4294901760, %v673_v60  ;;  %v676_v45 = vsel %vm347_vm0, %v284_v3, 0  ;;  %v15935_v48 = vand.u32 4294901760, %v13358_v6  ;;  %v1907_v23 = vand.u32 4294901760, %v1906_v51 }
  0xe6   : > { %15933 = vst [vmem:[#allocation203_spill] sm:$0xff] %v13468_v11  ;;  %v11070_v58 = vpack.c.bf16 %v2571_v41, %v2564_v46  ;;  %v1945_v0 = vand.u32 4294901760, %v13443_v14  ;;  %11133 = vmatpush3.bf16.msra.mxu0 %v11130_v43  ;;  %v1917_v49 = vand.u32 4294901760, %v1916_v63  ;;  %v1936_v32 = vsub.f32 %v13439_v10, %v1935_v61 }
  0xe7   : > { %9639 = vmatmul.mubr.f32.gmra.mrb[96].mxu1 %v1877_v15  ;;  %10419 = vmatmul.mubr.f32.gmra.mrb[96].mxu0 %v15932_v37  ;;  %15934 = vst [vmem:[#allocation204_spill] sm:$0xff] %v13470_v62  ;;  %v13477_v15 = vsub.f32 %v667_v16, %v13451_v44  ;;  %v679_v37 = vsel %vm347_vm0, %v285_v8, 0  ;;  %v13483_v3 = vsub.f32 %v670_v2, %v13463_v26  ;;  %v13485_v41 = vand.u32 4294901760, %v676_v45 }
  0xe8   : > { %9641 = vmatprep.mubr.f32.mxu1 %v1887_v7  ;;  %10421 = vmatprep.mubr.f32.mxu0 %v15935_v48  ;;  %v287_v7 = vld [vmem:[%s12255_s12 + $0x380] sm:$0xff]  ;;  %v15939_v16 = vand.u32 4294901760, %v13372_v34  ;;  %v1955_v51 = vand.u32 4294901760, %v13468_v11  ;;  %v13493_v46 = vsub.f32 %v673_v60, %v13470_v62  ;;  %v13495_v43 = vand.u32 4294901760, %v679_v37  ;;  %v288_v48 = vld [vmem:[%s12255_s12 + $0x388] sm:$0xff] }
  0xe9   : > { %15936 = vst [vmem:[#allocation205_spill] sm:$0xff] %v13477_v15  ;;  %11071 = vmatprep.subr.bf16.mxu1 %v11070_v58  ;;  %15937 = vst [vmem:[#allocation206_spill] sm:$0xff] %v13483_v3  ;;  %11135 = vmatprep.subr.bf16.mxu0 %v12205_v12  ;;  %v682_v2 = vsel %vm347_vm0, %v286_v59, 0  ;;  %v15942_v8 = vand.u32 4294901760, %v13382_v5  ;;  %v1927_v63 = vand.u32 4294901760, %v1926_v53  ;;  %v1937_v10 = vand.u32 4294901760, %v1936_v32 }
  0xea   : > { %15938 = vst [vmem:[#allocation207_spill] sm:$0xff] %v13485_v41  ;;  %11073 = vmatpush3.bf16.msra.mxu1 %v11070_v58  ;;  %15940 = vst [vmem:[#allocation208_spill] sm:$0xff] %v13493_v46  ;;  %v1965_v58 = vand.u32 4294901760, %v13477_v15  ;;  %v1975_v60 = vand.u32 4294901760, %v13483_v3  ;;  %v13506_v34 = vsub.f32 %v676_v45, %v13485_v41  ;;  %v13508_v59 = vand.u32 4294901760, %v682_v2 }
  0xeb   : > { %9642 = vmatmul.mubr.f32.gmra.mrb[98].mxu1 %v1897_v1  ;;  %10422 = vmatmul.mubr.f32.gmra.mrb[98].mxu0 %v15939_v16  ;;  %15941 = vst [vmem:[#allocation209_spill] sm:$0xff] %v13495_v43  ;;  %v1946_v1 = vsub.f32 %v13443_v14, %v1945_v0  ;;  %v685_v16 = vsel %vm347_vm0, %v287_v7, 0  ;;  %v15945_v53 = vand.u32 4294901760, %v13395_v50  ;;  %v1985_v14 = vand.u32 4294901760, %v13493_v46  ;;  %v290_v50 = vld [vmem:[%s12255_s12 + $0x398] sm:$0xff] }
  0xec   : > { %9644 = vmatprep.mubr.f32.mxu1 %v1907_v23  ;;  %10424 = vmatprep.mubr.f32.mxu0 %v15942_v8  ;;  %15943 = vst [vmem:[#allocation210_spill] sm:$0xff] %v13506_v34  ;;  %15944 = vst [vmem:[#allocation211_spill] sm:$0xff] %v13508_v59  ;;  %v289_v23 = vld [vmem:[%s12255_s12 + $0x390] sm:$0xff]  ;;  %v1956_v8 = vsub.f32 %v13468_v11, %v1955_v51  ;;  %v13516_v32 = vsub.f32 %v679_v37, %v13495_v43  ;;  %v688_v7 = vsel %vm347_vm0, %v288_v48, 0  ;;  %v291_v48 = vld [vmem:[%s12255_s12 + $0x3a0] sm:$0xff] }
  0xed   : > { %v15947_v45 = vand.u32 4294901760, %v13398_v31  ;;  %v1947_v5 = vand.u32 4294901760, %v1946_v1  ;;  %v13522_v6 = vand.u32 4294901760, %v685_v16  ;;  %v1976_v11 = vsub.f32 %v13483_v3, %v1975_v60 }
  0xee   : > { %15946 = vst [vmem:[#allocation212_spill] sm:$0xff] %v13516_v32  ;;  %v1995_v37 = vand.u32 4294901760, %v13506_v34  ;;  %v13529_v43 = vsub.f32 %v682_v2, %v13508_v59  ;;  %v1957_v1 = vand.u32 4294901760, %v1956_v8  ;;  %v694_v2 = vsel %vm347_vm0, %v290_v50, 0  ;;  %v292_v59 = vld [vmem:[%s12255_s12 + $0x3a8] sm:$0xff] }
  0xef   : > { %9645 = vmatmul.mubr.f32.gmra.mrb[100].mxu1 %v1917_v49  ;;  %10425 = vmatmul.mubr.f32.gmra.mrb[100].mxu0 %v15945_v53  ;;  %v1966_v49 = vsub.f32 %v13477_v15, %v1965_v58  ;;  %15948 = vst [vmem:[#allocation213_spill] sm:$0xff] %v13522_v6  ;;  %v691_v53 = vsel %vm347_vm0, %v289_v23, 0  ;;  %v2005_v23 = vand.u32 4294901760, %v13516_v32  ;;  %v13537_v15 = vsub.f32 %v685_v16, %v13522_v6 }
  0xf0   : > { %9647 = vmatprep.mubr.f32.mxu1 %v1927_v63  ;;  %10427 = vmatprep.mubr.f32.mxu0 %v15947_v45  ;;  %15949 = vst [vmem:[#allocation214_spill] sm:$0xff] %v13529_v43  ;;  %v13531_v63 = vand.u32 4294901760, %v688_v7  ;;  %v1986_v45 = vsub.f32 %v13493_v46, %v1985_v14  ;;  %v13539_v31 = vand.u32 4294901760, %v691_v53  ;;  %v697_v41 = vsel %vm347_vm0, %v291_v48, 0 }
  0xf1   : > { %v1967_v3 = vand.u32 4294901760, %v1966_v49  ;;  %15951 = vst [vmem:[#allocation216_spill] sm:$0xff] %v13537_v15  ;;  %v1996_v8 = vsub.f32 %v13506_v34, %v1995_v37  ;;  %v2006_v49 = vsub.f32 %v13516_v32, %v2005_v23  ;;  %v13551_v50 = vand.u32 4294901760, %v694_v2 }
  0xf2   : > { %15950 = vst [vmem:[#allocation215_spill] sm:$0xff] %v13531_v63  ;;  %15952 = vst [vmem:[#allocation217_spill] sm:$0xff] %v13539_v31  ;;  %v1987_v16 = vand.u32 4294901760, %v1986_v45  ;;  %v700_v48 = vsel %vm347_vm0, %v292_v59, 0  ;;  %v13556_v34 = vsub.f32 %v691_v53, %v13539_v31  ;;  %v13558_v46 = vand.u32 4294901760, %v697_v41 }
  0xf3   : > { %9648 = vmatmul.mubr.f32.gmra.mrb[102].mxu1 %v1937_v10  ;;  %10428 = vmatmul.mubr.f32.gmra.mrb[102].mxu0 %v1935_v61  ;;  %v293_v10 = vld [vmem:[%s12255_s12 + $0x3b0] sm:$0xff]  ;;  %v1977_v61 = vand.u32 4294901760, %v1976_v11  ;;  %15954 = vst [vmem:[#allocation219_spill] sm:$0xff] %v13551_v50  ;;  %v2025_v11 = vand.u32 4294901760, %v13537_v15  ;;  %v1997_v45 = vand.u32 4294901760, %v1996_v8  ;;  %v13565_v59 = vand.u32 4294901760, %v700_v48 }
  0xf4   : > { %9650 = vmatprep.mubr.f32.mxu1 %v1947_v5  ;;  %10430 = vmatprep.mubr.f32.mxu0 %v1945_v0  ;;  %v2015_v5 = vand.u32 4294901760, %v13529_v43  ;;  %v13548_v0 = vsub.f32 %v688_v7, %v13531_v63  ;;  %15955 = vst [vmem:[#allocation220_spill] sm:$0xff] %v13556_v34  ;;  %15956 = vst [vmem:[#allocation221_spill] sm:$0xff] %v13558_v46  ;;  %v703_v7 = vsel %vm347_vm0, %v293_v10, 0 }
  0xf5   : > { %15957 = vst [vmem:[#allocation222_spill] sm:$0xff] %v13565_v59  ;;  %v13570_v53 = vand.u32 4294901760, %v703_v7  ;;  %v2026_v8 = vsub.f32 %v13537_v15, %v2025_v11  ;;  %v13576_v31 = vsub.f32 %v697_v41, %v13558_v46  ;;  %v299_v46 = vld [vmem:[%s12255_s12 + $0x3e0] sm:$0xff] }
  0xf6   : > { %15953 = vst [vmem:[#allocation218_spill] sm:$0xff] %v13548_v0  ;;  %v2016_v32 = vsub.f32 %v13529_v43, %v2015_v5  ;;  %v2035_v63 = vand.u32 4294901760, %v13548_v0  ;;  %v2045_v43 = vand.u32 4294901760, %v13556_v34 }
  0xf7   : > { %9651 = vmatmul.mubr.f32.gmra.mrb[104].mxu1 %v1957_v1  ;;  %10431 = vmatmul.mubr.f32.gmra.mrb[104].mxu0 %v1955_v51  ;;  %v294_v1 = vld [vmem:[%s12255_s12 + $0x3b8] sm:$0xff]  ;;  %v295_v51 = vld [vmem:[%s12255_s12 + $0x3c0] sm:$0xff]  ;;  %15959 = vst [vmem:[#allocation224_spill] sm:$0xff] %v13570_v53  ;;  %15960 = vst [vmem:[#allocation225_spill] sm:$0xff] %v13576_v31  ;;  %v13589_v41 = vsub.f32 %v703_v7, %v13570_v53  ;;  %v2065_v15 = vand.u32 4294901760, %v13576_v31 }
  0xf8   : > { %9653 = vmatprep.mubr.f32.mxu1 %v1967_v3  ;;  %10433 = vmatprep.mubr.f32.mxu0 %v1965_v58  ;;  %v2007_v3 = vand.u32 4294901760, %v2006_v49  ;;  %v13568_v58 = vsub.f32 %v694_v2, %v13551_v50  ;;  %v706_v10 = vsel %vm347_vm0, %v294_v1, 0  ;;  %v2017_v49 = vand.u32 4294901760, %v2016_v32 }
  0xf9   : > { %v2036_v2 = vsub.f32 %v13548_v0, %v2035_v63  ;;  %v13582_v50 = vsub.f32 %v700_v48, %v13565_v59  ;;  %v13584_v1 = vand.u32 4294901760, %v706_v10  ;;  %15963 = vst [vmem:[#allocation228_spill] sm:$0xff] %v13589_v41  ;;  %v2027_v48 = vand.u32 4294901760, %v2026_v8 }
  0xfa   : > { %15958 = vst [vmem:[#allocation223_spill] sm:$0xff] %v13568_v58  ;;  %v2046_v0 = vsub.f32 %v13556_v34, %v2045_v43  ;;  %v2085_v8 = vand.u32 4294901760, %v13589_v41 }
  0xfb   : > { %9654 = vmatmul.mubr.f32.gmra.mrb[106].mxu1 %v1977_v61  ;;  %10434 = vmatmul.mubr.f32.gmra.mrb[106].mxu0 %v1975_v60  ;;  %v709_v60 = vsel %vm347_vm0, %v295_v51, 0  ;;  %v296_v61 = vld [vmem:[%s12255_s12 + $0x3c8] sm:$0xff]  ;;  %15961 = vst [vmem:[#allocation226_spill] sm:$0xff] %v13582_v50  ;;  %15962 = vst [vmem:[#allocation227_spill] sm:$0xff] %v13584_v1  ;;  %v2075_v59 = vand.u32 4294901760, %v13582_v50  ;;  %v13600_v7 = vsub.f32 %v706_v10, %v13584_v1 }
  0xfc   : > { %9656 = vmatprep.mubr.f32.mxu1 %v1987_v16  ;;  %10436 = vmatprep.mubr.f32.mxu0 %v1985_v14  ;;  %v297_v14 = vld [vmem:[%s12255_s12 + $0x3d0] sm:$0xff]  ;;  %v2055_v16 = vand.u32 4294901760, %v13568_v58  ;;  %v13591_v51 = vand.u32 4294901760, %v709_v60  ;;  %v712_v32 = vsel %vm347_vm0, %v296_v61, 0  ;;  %v2047_v34 = vand.u32 4294901760, %v2046_v0 }
  0xfd   : > { %15965 = vst [vmem:[#allocation230_spill] sm:$0xff] %v13600_v7  ;;  %v13602_v53 = vand.u32 4294901760, %v712_v32  ;;  %v2066_v10 = vsub.f32 %v13576_v31, %v2065_v15  ;;  %v301_v0 = vld [vmem:[%s12255_s12 + $0x3f0] sm:$0xff]  ;;  %v2086_v31 = vsub.f32 %v13589_v41, %v2085_v8 }
  0xfe   : > { %15964 = vst [vmem:[#allocation229_spill] sm:$0xff] %v13591_v51  ;;  %v13608_v61 = vsub.f32 %v709_v60, %v13591_v51 }
  0xff   : > { %9657 = vmatmul.mubr.f32.gmra.mrb[108].mxu1 %v1997_v45  ;;  %10437 = vmatmul.mubr.f32.gmra.mrb[108].mxu0 %v1995_v37  ;;  %v715_v45 = vsel %vm347_vm0, %v297_v14, 0  ;;  %v298_v37 = vld [vmem:[%s12255_s12 + $0x3d8] sm:$0xff]  ;;  %15966 = vst [vmem:[#allocation231_spill] sm:$0xff] %v13602_v53  ;;  %v300_v14 = vld [vmem:[%s12255_s12 + $0x3e8] sm:$0xff]  ;;  %v13619_v60 = vsub.f32 %v712_v32, %v13602_v53 }
 0x100   : > { %9659 = vmatprep.mubr.f32.mxu1 %v2007_v3  ;;  %10439 = vmatprep.mubr.f32.mxu0 %v2005_v23  ;;  %v2037_v23 = vand.u32 4294901760, %v2036_v2  ;;  %v2056_v3 = vsub.f32 %v13568_v58, %v2055_v16  ;;  %15967 = vst [vmem:[#allocation232_spill] sm:$0xff] %v13608_v61  ;;  %v13612_v1 = vand.u32 4294901760, %v715_v45  ;;  %v2076_v2 = vsub.f32 %v13582_v50, %v2075_v59 }
 0x101   : > { %v2095_v58 = vand.u32 4294901760, %v13600_v7  ;;  %15969 = vst [vmem:[#allocation234_spill] sm:$0xff] %v13619_v60  ;;  %v2067_v50 = vand.u32 4294901760, %v2066_v10 }
 0x102   : > { %15968 = vst [vmem:[#allocation233_spill] sm:$0xff] %v13612_v1  ;;  %v13628_v51 = vsub.f32 %v715_v45, %v13612_v1 }
 0x103   : > { %9660 = vmatmul.mubr.f32.gmra.mrb[110].mxu1 %v2017_v49  ;;  %10440 = vmatmul.mubr.f32.gmra.mrb[110].mxu0 %v2015_v5  ;;  %v718_v49 = vsel %vm347_vm0, %v298_v37, 0  ;;  %v721_v5 = vsel %vm347_vm0, %v299_v46, 0  ;;  %v2105_v37 = vand.u32 4294901760, %v13608_v61  ;;  %v2096_v41 = vsub.f32 %v13600_v7, %v2095_v58 }
 0x104   : > { %9662 = vmatprep.mubr.f32.mxu1 %v2027_v48  ;;  %10442 = vmatprep.mubr.f32.mxu0 %v2025_v11  ;;  %v724_v48 = vsel %vm347_vm0, %v300_v14, 0  ;;  %v2057_v11 = vand.u32 4294901760, %v2056_v3  ;;  %v13625_v46 = vand.u32 4294901760, %v718_v49  ;;  %15971 = vst [vmem:[#allocation236_spill] sm:$0xff] %v13628_v51  ;;  %v13630_v32 = vand.u32 4294901760, %v721_v5  ;;  %v302_v14 = vld [vmem:[%s12255_s12 + $0x3f8] sm:$0xff] }
 0x105   : > { %v13633_v53 = vand.u32 4294901760, %v724_v48  ;;  %v2077_v3 = vand.u32 4294901760, %v2076_v2  ;;  %v2106_v45 = vsub.f32 %v13608_v61, %v2105_v37  ;;  %v730_v1 = vsel %vm347_vm0, %v302_v14, 0  ;;  %v305_v61 = vld [vmem:[%s12255_s12 + $0x410] sm:$0xff] }
 0x106   : > { %15970 = vst [vmem:[#allocation235_spill] sm:$0xff] %v13625_v46  ;;  %15972 = vst [vmem:[#allocation237_spill] sm:$0xff] %v13630_v32  ;;  %v13641_v10 = vsub.f32 %v718_v49, %v13625_v46  ;;  %v13646_v2 = vsub.f32 %v721_v5, %v13630_v32  ;;  %v2097_v49 = vand.u32 4294901760, %v2096_v41 }
 0x107   : > { %9663 = vmatmul.mubr.f32.gmra.mrb[112].mxu1 %v2037_v23  ;;  %10443 = vmatmul.mubr.f32.gmra.mrb[112].mxu0 %v2035_v63  ;;  %15973 = vst [vmem:[#allocation238_spill] sm:$0xff] %v13633_v53  ;;  %v727_v63 = vsel %vm347_vm0, %v301_v0, 0  ;;  %v303_v23 = vld [vmem:[%s12255_s12 + $0x400] sm:$0xff]  ;;  %v2125_v0 = vand.u32 4294901760, %v13628_v51  ;;  %v2107_v5 = vand.u32 4294901760, %v2106_v45 }
 0x108   : > { %9665 = vmatprep.mubr.f32.mxu1 %v2047_v34  ;;  %10445 = vmatprep.mubr.f32.mxu0 %v2045_v43  ;;  %v2115_v34 = vand.u32 4294901760, %v13619_v60  ;;  %v2087_v43 = vand.u32 4294901760, %v2086_v31  ;;  %15974 = vst [vmem:[#allocation239_spill] sm:$0xff] %v13641_v10  ;;  %15975 = vst [vmem:[#allocation240_spill] sm:$0xff] %v13646_v2  ;;  %v13648_v7 = vand.u32 4294901760, %v727_v63  ;;  %v13653_v31 = vsub.f32 %v724_v48, %v13633_v53 }
 0x109   : > { %v2126_v41 = vsub.f32 %v13628_v51, %v2125_v0 }
 0x10a   : > { %15976 = vst [vmem:[#allocation241_spill] sm:$0xff] %v13648_v7  ;;  %15977 = vst [vmem:[#allocation242_spill] sm:$0xff] %v13653_v31  ;;  %v2116_v14 = vsub.f32 %v13619_v60, %v2115_v34  ;;  %v2145_v60 = vand.u32 4294901760, %v13646_v2  ;;  %v13670_v53 = vsub.f32 %v727_v63, %v13648_v7  ;;  %v308_v7 = vld [vmem:[%s12255_s12 + $0x428] sm:$0xff] }
 0x10b   : > { %9666 = vmatmul.mubr.f32.gmra.mrb[114].mxu1 %v2057_v11  ;;  %10446 = vmatmul.mubr.f32.gmra.mrb[114].mxu0 %v2055_v16  ;;  %v733_v11 = vsel %vm347_vm0, %v303_v23, 0  ;;  %v304_v16 = vld [vmem:[%s12255_s12 + $0x408] sm:$0xff]  ;;  %v2135_v23 = vand.u32 4294901760, %v13641_v10 }
 0x10c   : > { %9668 = vmatprep.mubr.f32.mxu1 %v2067_v50  ;;  %10448 = vmatprep.mubr.f32.mxu0 %v2065_v15  ;;  %v13657_v50 = vand.u32 4294901760, %v730_v1  ;;  %v13661_v15 = vpack.c.bf16 %v12233_v21, %v12225_v18  ;;  %v13664_v32 = vand.u32 4294901760, %v733_v11  ;;  %v736_v48 = vsel %vm347_vm0, %v304_v16, 0  ;;  %15980 = vst [vmem:[#allocation245_spill] sm:$0xff] %v13670_v53  ;;  %v306_v21 = vld [vmem:[%s12255_s12 + $0x418] sm:$0xff] }
 0x10d   : > { %v739_v18 = vsel %vm347_vm0, %v305_v61, 0  ;;  %v2136_v63 = vsub.f32 %v13641_v10, %v2135_v23  ;;  %v742_v51 = vsel %vm347_vm0, %v306_v21, 0  ;;  %v309_v10 = vld [vmem:[%s12255_s12 + $0x430] sm:$0xff] }
 0x10e   : > { %15978 = vst [vmem:[#allocation243_spill] sm:$0xff] %v13657_v50  ;;  %15979 = vst [vmem:[#allocation244_spill] sm:$0xff] %v13664_v32  ;;  %11075 = vmatprep.subr.bf16.mxu1 %v13661_v15  ;;  %v13677_v45 = vsub.f32 %v730_v1, %v13657_v50  ;;  %v13684_v61 = vsub.f32 %v733_v11, %v13664_v32  ;;  %v13686_v16 = vand.u32 4294901760, %v739_v18  ;;  %v2165_v50 = vand.u32 4294901760, %v13670_v53 }
 0x10f   : > { %9669 = vmatmul.mubr.f32.gmra.mrb[116].mxu1 %v2077_v3  ;;  %10449 = vmatmul.mubr.f32.gmra.mrb[116].mxu0 %v2075_v59  ;;  %v2155_v59 = vand.u32 4294901760, %v13653_v31  ;;  %v2117_v3 = vand.u32 4294901760, %v2116_v14  ;;  %v2127_v14 = vand.u32 4294901760, %v2126_v41  ;;  %v2146_v1 = vsub.f32 %v13646_v2, %v2145_v60 }
 0x110   : > { %9671 = vmatprep.mubr.f32.mxu1 %v2087_v43  ;;  %10451 = vmatprep.mubr.f32.mxu0 %v2085_v8  ;;  %15981 = vst [vmem:[#allocation246_spill] sm:$0xff] %v13677_v45  ;;  %v13679_v8 = vand.u32 4294901760, %v736_v48  ;;  %v307_v43 = vld [vmem:[%s12255_s12 + $0x420] sm:$0xff]  ;;  %15983 = vst [vmem:[#allocation248_spill] sm:$0xff] %v13684_v61  ;;  %v2175_v11 = vand.u32 4294901760, %v13677_v45  ;;  %v13699_v21 = vand.u32 4294901760, %v742_v51  ;;  %v13703_v41 = vsub.f32 %v739_v18, %v13686_v16 }
 0x111   : > { %15984 = vst [vmem:[#allocation249_spill] sm:$0xff] %v13686_v16  ;;  %v2166_v2 = vsub.f32 %v13670_v53, %v2165_v50  ;;  %v313_v16 = vld [vmem:[%s12255_s12 + $0x450] sm:$0xff] }
 0x112   : > { %15982 = vst [vmem:[#allocation247_spill] sm:$0xff] %v13679_v8  ;;  %v13697_v32 = vsub.f32 %v736_v48, %v13679_v8  ;;  %15986 = vst [vmem:[#allocation251_spill] sm:$0xff] %v13699_v21  ;;  %v751_v8 = vsel %vm347_vm0, %v309_v10, 0  ;;  %v13714_v18 = vsub.f32 %v742_v51, %v13699_v21  ;;  %v2205_v10 = vand.u32 4294901760, %v13703_v41  ;;  %v312_v21 = vld [vmem:[%s12255_s12 + $0x448] sm:$0xff] }
 0x113   : > { %9672 = vmatmul.mubr.f32.gmra.mrb[118].mxu1 %v2097_v49  ;;  %10452 = vmatmul.mubr.f32.gmra.mrb[118].mxu0 %v2095_v58  ;;  %v2156_v49 = vsub.f32 %v13653_v31, %v2155_v59  ;;  %v745_v58 = vsel %vm347_vm0, %v307_v43, 0  ;;  %15987 = vst [vmem:[#allocation252_spill] sm:$0xff] %v13703_v41  ;;  %v748_v43 = vsel %vm347_vm0, %v308_v7, 0  ;;  %v2147_v31 = vand.u32 4294901760, %v2146_v1 }
 0x114   : > { %9674 = vmatprep.mubr.f32.mxu1 %v2107_v5  ;;  %10454 = vmatprep.mubr.f32.mxu0 %v2105_v37  ;;  %15985 = vst [vmem:[#allocation250_spill] sm:$0xff] %v13697_v32  ;;  %v2137_v37 = vand.u32 4294901760, %v2136_v63  ;;  %v2185_v5 = vand.u32 4294901760, %v13684_v61  ;;  %v13707_v48 = vand.u32 4294901760, %v745_v58  ;;  %v2176_v63 = vsub.f32 %v13677_v45, %v2175_v11  ;;  %15989 = vst [vmem:[#allocation254_spill] sm:$0xff] %v13714_v18 }
 0x115   : > { %v2195_v46 = vand.u32 4294901760, %v13697_v32  ;;  %v13716_v7 = vand.u32 4294901760, %v748_v43  ;;  %v13721_v1 = vand.u32 4294901760, %v751_v8  ;;  %v2167_v45 = vand.u32 4294901760, %v2166_v2 }
 0x116   : > { %15988 = vst [vmem:[#allocation253_spill] sm:$0xff] %v13707_v48  ;;  %v13725_v53 = vsub.f32 %v745_v58, %v13707_v48 }
 0x117   : > { %9675 = vmatmul.mubr.f32.gmra.mrb[120].mxu1 %v2117_v3  ;;  %10455 = vmatmul.mubr.f32.gmra.mrb[120].mxu0 %v2115_v34  ;;  %v310_v3 = vld [vmem:[%s12255_s12 + $0x438] sm:$0xff]  ;;  %v2157_v34 = vand.u32 4294901760, %v2156_v49  ;;  %15990 = vst [vmem:[#allocation255_spill] sm:$0xff] %v13716_v7  ;;  %15991 = vst [vmem:[#allocation256_spill] sm:$0xff] %v13721_v1  ;;  %v2196_v2 = vsub.f32 %v13697_v32, %v2195_v46  ;;  %v13739_v58 = vsub.f32 %v751_v8, %v13721_v1 }
 0x118   : > { %9677 = vmatprep.mubr.f32.mxu1 %v2127_v14  ;;  %10457 = vmatprep.mubr.f32.mxu0 %v2125_v0  ;;  %v311_v0 = vld [vmem:[%s12255_s12 + $0x440] sm:$0xff]  ;;  %v2186_v14 = vsub.f32 %v13684_v61, %v2185_v5  ;;  %v754_v49 = vsel %vm347_vm0, %v310_v3, 0  ;;  %15992 = vst [vmem:[#allocation257_spill] sm:$0xff] %v13725_v53  ;;  %v13732_v61 = vsub.f32 %v748_v43, %v13716_v7  ;;  %v2225_v3 = vand.u32 4294901760, %v13725_v53 }
 0x119   : > { %v757_v51 = vsel %vm347_vm0, %v311_v0, 0  ;;  %v13734_v6 = vand.u32 4294901760, %v754_v49  ;;  %15995 = vst [vmem:[#allocation260_spill] sm:$0xff] %v13739_v58  ;;  %v760_v43 = vsel %vm347_vm0, %v312_v21, 0  ;;  %v314_v0 = vld [vmem:[%s12255_s12 + $0x458] sm:$0xff]  ;;  %v2245_v1 = vand.u32 4294901760, %v13739_v58 }
 0x11a   : > { %15993 = vst [vmem:[#allocation258_spill] sm:$0xff] %v13732_v61 }
 0x11b   : > { %9678 = vmatmul.mubr.f32.gmra.mrb[122].mxu1 %v2137_v37  ;;  %10458 = vmatmul.mubr.f32.gmra.mrb[122].mxu0 %v2135_v23  ;;  %v2177_v37 = vand.u32 4294901760, %v2176_v63  ;;  %v2215_v23 = vand.u32 4294901760, %v13714_v18  ;;  %15994 = vst [vmem:[#allocation259_spill] sm:$0xff] %v13734_v6  ;;  %v13742_v63 = vand.u32 4294901760, %v757_v51  ;;  %v13750_v8 = vsub.f32 %v754_v49, %v13734_v6  ;;  %v316_v6 = vld [vmem:[%s12255_s12 + $0x468] sm:$0xff] }
 0x11c   : > { %9680 = vmatprep.mubr.f32.mxu1 %v2147_v31  ;;  %10460 = vmatprep.mubr.f32.mxu0 %v2145_v60  ;;  %v2187_v60 = vand.u32 4294901760, %v2186_v14  ;;  %v2206_v31 = vsub.f32 %v13703_v41, %v2205_v10  ;;  %v2235_v14 = vand.u32 4294901760, %v13732_v61  ;;  %v13753_v41 = vand.u32 4294901760, %v760_v43 }
 0x11d   : > { %15996 = vst [vmem:[#allocation261_spill] sm:$0xff] %v13742_v63  ;;  %15997 = vst [vmem:[#allocation262_spill] sm:$0xff] %v13750_v8  ;;  %v13761_v49 = vsub.f32 %v757_v51, %v13742_v63 }
 0x11e   : > { %15998 = vst [vmem:[#allocation263_spill] sm:$0xff] %v13753_v41  ;;  %v2207_v21 = vand.u32 4294901760, %v2206_v31  ;;  %v2236_v7 = vsub.f32 %v13732_v61, %v2235_v14  ;;  %v772_v31 = vsel %vm347_vm0, %v316_v6, 0  ;;  %v2246_v61 = vsub.f32 %v13739_v58, %v2245_v1 }
 0x11f   : > { %9681 = vmatmul.mubr.f32.gmra.mrb[124].mxu1 %v2157_v34  ;;  %10461 = vmatmul.mubr.f32.gmra.mrb[124].mxu0 %v2155_v59  ;;  %v763_v34 = vsel %vm347_vm0, %v313_v16, 0  ;;  %v2216_v59 = vsub.f32 %v13714_v18, %v2215_v23  ;;  %v766_v16 = vsel %vm347_vm0, %v314_v0, 0  ;;  %v2226_v18 = vsub.f32 %v13725_v53, %v2225_v3  ;;  %16000 = vst [vmem:[#allocation265_spill] sm:$0xff] %v13761_v49 }
 0x120   : > { %9683 = vmatprep.mubr.f32.mxu1 %v2167_v45  ;;  %10463 = vmatprep.mubr.f32.mxu0 %v2165_v50  ;;  %v315_v45 = vld [vmem:[%s12255_s12 + $0x460] sm:$0xff]  ;;  %v2197_v50 = vand.u32 4294901760, %v2196_v2  ;;  %v13755_v32 = vand.u32 4294901760, %v763_v34  ;;  %v2255_v0 = vand.u32 4294901760, %v13750_v8  ;;  %v2265_v53 = vand.u32 4294901760, %v13761_v49 }
 0x121   : > { %v2217_v2 = vand.u32 4294901760, %v2216_v59  ;;  %v2237_v63 = vand.u32 4294901760, %v2236_v7 }
 0x122   : > { %15999 = vst [vmem:[#allocation264_spill] sm:$0xff] %v13755_v32  ;;  %v13774_v51 = vsub.f32 %v763_v34, %v13755_v32  ;;  %v13786_v34 = vand.u32 4294901760, %v772_v31  ;;  %v2266_v58 = vsub.f32 %v13761_v49, %v2265_v53 }
 0x123   : > { %9684 = vmatmul.mubr.f32.gmra.mrb[126].mxu1 %v2177_v37  ;;  %10464 = vmatmul.mubr.f32.gmra.mrb[126].mxu0 %v2175_v11  ;;  %v317_v37 = vld [vmem:[%s12255_s12 + $0x470] sm:$0xff]  ;;  %v769_v11 = vsel %vm347_vm0, %v315_v45, 0  ;;  %v2227_v45 = vand.u32 4294901760, %v2226_v18  ;;  %v2256_v18 = vsub.f32 %v13750_v8, %v2255_v0 }
 0x124   : > { %9686 = vmatprep.mubr.f32.mxu1 %v2187_v60  ;;  %10466 = vmatprep.mubr.f32.mxu0 %v2185_v5  ;;  %v13768_v60 = vand.u32 4294901760, %v766_v16  ;;  %v13771_v5 = vsub.f32 %v760_v43, %v13753_v41  ;;  %16003 = vst [vmem:[#allocation268_spill] sm:$0xff] %v13774_v51  ;;  %v775_v59 = vsel %vm347_vm0, %v317_v37, 0  ;;  %16006 = vst [vmem:[#allocation271_spill] sm:$0xff] %v13786_v34  ;;  %v319_v37 = vld [vmem:[%s12255_s12 + $0x480] sm:$0xff] }
 0x125   : > { %v13788_v6 = vand.u32 4294901760, %v775_v59  ;;  %v13803_v8 = vsub.f32 %v772_v31, %v13786_v34  ;;  %v322_v34 = vld [vmem:[%s12255_s12 + $0x498] sm:$0xff] }
 0x126   : > { %16001 = vst [vmem:[#allocation266_spill] sm:$0xff] %v13768_v60  ;;  %16002 = vst [vmem:[#allocation267_spill] sm:$0xff] %v13771_v5  ;;  %v13784_v43 = vsub.f32 %v766_v16, %v13768_v60  ;;  %v2247_v16 = vand.u32 4294901760, %v2246_v61  ;;  %v321_v61 = vld [vmem:[%s12255_s12 + $0x490] sm:$0xff] }
 0x127   : > { %9687 = vmatmul.mubr.f32.gmra.mrb[128].mxu1 %v2197_v50  ;;  %10467 = vmatmul.mubr.f32.gmra.mrb[128].mxu0 %v2195_v46  ;;  %v13780_v50 = vand.u32 4294901760, %v769_v11  ;;  %v318_v46 = vld [vmem:[%s12255_s12 + $0x478] sm:$0xff]  ;;  %16007 = vst [vmem:[#allocation272_spill] sm:$0xff] %v13788_v6  ;;  %16009 = vst [vmem:[#allocation274_spill] sm:$0xff] %v13803_v8  ;;  %v13806_v41 = vsub.f32 %v775_v59, %v13788_v6  ;;  %v787_v6 = vsel %vm347_vm0, %v321_v61, 0 }
 0x128   : > { %9689 = vmatprep.mubr.f32.mxu1 %v2207_v21  ;;  %10469 = vmatprep.mubr.f32.mxu0 %v2205_v10  ;;  %16005 = vst [vmem:[#allocation270_spill] sm:$0xff] %v13784_v43  ;;  %v2275_v10 = vand.u32 4294901760, %v13771_v5  ;;  %v2285_v21 = vand.u32 4294901760, %v13774_v51  ;;  %v778_v7 = vsel %vm347_vm0, %v318_v46, 0  ;;  %v2295_v32 = vand.u32 4294901760, %v13784_v43 }
 0x129   : > { %16004 = vst [vmem:[#allocation269_spill] sm:$0xff] %v13780_v50  ;;  %v13797_v60 = vsub.f32 %v769_v11, %v13780_v50  ;;  %16010 = vst [vmem:[#allocation275_spill] sm:$0xff] %v13806_v41  ;;  %v790_v50 = vsel %vm347_vm0, %v322_v34, 0 }
 0x12a   : > { %v2276_v11 = vsub.f32 %v13771_v5, %v2275_v10  ;;  %v2286_v46 = vsub.f32 %v13774_v51, %v2285_v21  ;;  %v13832_v5 = vand.u32 4294901760, %v787_v6 }
 0x12b   : > { %9690 = vmatmul.mubr.f32.gmra.mrb[130].mxu1 %v2217_v2  ;;  %10470 = vmatmul.mubr.f32.gmra.mrb[130].mxu0 %v2215_v23  ;;  %16008 = vst [vmem:[#allocation273_spill] sm:$0xff] %v13797_v60  ;;  %v781_v2 = vsel %vm347_vm0, %v319_v37, 0  ;;  %v320_v23 = vld [vmem:[%s12255_s12 + $0x488] sm:$0xff]  ;;  %v2267_v37 = vand.u32 4294901760, %v2266_v58  ;;  %v2305_v31 = vand.u32 4294901760, %v13797_v60  ;;  %v323_v58 = vld [vmem:[%s12255_s12 + $0x4a0] sm:$0xff] }
 0x12c   : > { %9692 = vmatprep.mubr.f32.mxu1 %v2227_v45  ;;  %10472 = vmatprep.mubr.f32.mxu0 %v2225_v3  ;;  %v13808_v45 = vand.u32 4294901760, %v778_v7  ;;  %v2257_v3 = vand.u32 4294901760, %v2256_v18  ;;  %v13814_v49 = vand.u32 4294901760, %v781_v2  ;;  %v784_v59 = vsel %vm347_vm0, %v320_v23, 0  ;;  %16016 = vst [vmem:[#allocation281_spill] sm:$0xff] %v13832_v5 }
 0x12d   : > { %v2325_v18 = vand.u32 4294901760, %v13806_v41  ;;  %v2287_v51 = vand.u32 4294901760, %v2286_v46  ;;  %v13826_v23 = vand.u32 4294901760, %v784_v59  ;;  %v2306_v61 = vsub.f32 %v13797_v60, %v2305_v31 }
 0x12e   : > { %16011 = vst [vmem:[#allocation276_spill] sm:$0xff] %v13808_v45  ;;  %16012 = vst [vmem:[#allocation277_spill] sm:$0xff] %v13814_v49 }
 0x12f   : > { %9693 = vmatmul.mubr.f32.gmra.mrb[132].mxu1 %v2237_v63  ;;  %10473 = vmatmul.mubr.f32.gmra.mrb[132].mxu0 %v2235_v14  ;;  %v2296_v63 = vsub.f32 %v13784_v43, %v2295_v32  ;;  %v2315_v14 = vand.u32 4294901760, %v13803_v8  ;;  %16014 = vst [vmem:[#allocation279_spill] sm:$0xff] %v13826_v23  ;;  %v13830_v43 = vsub.f32 %v781_v2, %v13814_v49 }
 0x130   : > { %9695 = vmatprep.mubr.f32.mxu1 %v2247_v16  ;;  %10475 = vmatprep.mubr.f32.mxu0 %v2245_v1  ;;  %v13823_v1 = vsub.f32 %v778_v7, %v13808_v45  ;;  %v2277_v16 = vand.u32 4294901760, %v2276_v11  ;;  %v324_v7 = vld [vmem:[%s12255_s12 + $0x4a8] sm:$0xff]  ;;  %v325_v45 = vld [vmem:[%s12255_s12 + $0x4b0] sm:$0xff]  ;;  %v13842_v2 = vsub.f32 %v784_v59, %v13826_v23 }
 0x131   : > { %16015 = vst [vmem:[#allocation280_spill] sm:$0xff] %v13830_v43  ;;  %v2316_v11 = vsub.f32 %v13803_v8, %v2315_v14  ;;  %v796_v34 = vsel %vm347_vm0, %v324_v7, 0  ;;  %v2345_v8 = vand.u32 4294901760, %v13830_v43 }
 0x132   : > { %16013 = vst [vmem:[#allocation278_spill] sm:$0xff] %v13823_v1  ;;  %v2335_v46 = vand.u32 4294901760, %v13823_v1  ;;  %16017 = vst [vmem:[#allocation282_spill] sm:$0xff] %v13842_v2  ;;  %v13857_v49 = vand.u32 4294901760, %v796_v34 }
 0x133   : > { %9696 = vmatmul.mubr.f32.gmra.mrb[134].mxu1 %v2257_v3  ;;  %10476 = vmatmul.mubr.f32.gmra.mrb[134].mxu0 %v2255_v0  ;;  %v793_v3 = vsel %vm347_vm0, %v323_v58, 0  ;;  %v2297_v0 = vand.u32 4294901760, %v2296_v63  ;;  %v799_v58 = vsel %vm347_vm0, %v325_v45, 0  ;;  %v2307_v63 = vand.u32 4294901760, %v2306_v61 }
 0x134   : > { %9698 = vmatprep.mubr.f32.mxu1 %v2267_v37  ;;  %10478 = vmatprep.mubr.f32.mxu0 %v2265_v53  ;;  %v2326_v53 = vsub.f32 %v13806_v41, %v2325_v18  ;;  %v13844_v37 = vand.u32 4294901760, %v790_v50  ;;  %v13850_v41 = vsub.f32 %v787_v6, %v13832_v5  ;;  %v13852_v60 = vand.u32 4294901760, %v793_v3  ;;  %16021 = vst [vmem:[#allocation286_spill] sm:$0xff] %v13857_v49 }
 0x135   : > { %v2317_v59 = vand.u32 4294901760, %v2316_v11  ;;  %v2336_v23 = vsub.f32 %v13823_v1, %v2335_v46  ;;  %v13859_v7 = vand.u32 4294901760, %v799_v58  ;;  %v2346_v61 = vsub.f32 %v13830_v43, %v2345_v8 }
 0x136   : > { %16018 = vst [vmem:[#allocation283_spill] sm:$0xff] %v13844_v37  ;;  %16019 = vst [vmem:[#allocation284_spill] sm:$0xff] %v13850_v41  ;;  %v13863_v6 = vsub.f32 %v790_v50, %v13844_v37  ;;  %v2365_v11 = vand.u32 4294901760, %v13850_v41  ;;  %v13869_v1 = vsub.f32 %v793_v3, %v13852_v60 }
 0x137   : > { %9699 = vmatmul.mubr.f32.gmra.mrb[136].mxu1 %v2277_v16  ;;  %10479 = vmatmul.mubr.f32.gmra.mrb[136].mxu0 %v2275_v10  ;;  %16020 = vst [vmem:[#allocation285_spill] sm:$0xff] %v13852_v60  ;;  %v326_v10 = vld [vmem:[%s12255_s12 + $0x4b8] sm:$0xff]  ;;  %v327_v16 = vld [vmem:[%s12255_s12 + $0x4c0] sm:$0xff]  ;;  %16022 = vst [vmem:[#allocation287_spill] sm:$0xff] %v13859_v7  ;;  %v13877_v50 = vsub.f32 %v799_v58, %v13859_v7 }
 0x138   : > { %9701 = vmatprep.mubr.f32.mxu1 %v2287_v51  ;;  %10481 = vmatprep.mubr.f32.mxu0 %v2285_v21  ;;  %v2327_v51 = vand.u32 4294901760, %v2326_v53  ;;  %v2355_v21 = vand.u32 4294901760, %v13842_v2  ;;  %16023 = vst [vmem:[#allocation288_spill] sm:$0xff] %v13863_v6  ;;  %v802_v45 = vsel %vm347_vm0, %v326_v10, 0  ;;  %16024 = vst [vmem:[#allocation289_spill] sm:$0xff] %v13869_v1  ;;  %v13874_v53 = vsub.f32 %v796_v34, %v13857_v49 }
 0x139   : > { %16026 = vst [vmem:[#allocation291_spill] sm:$0xff] %v13877_v50  ;;  %v13879_v10 = vand.u32 4294901760, %v802_v45  ;;  %v2375_v43 = vand.u32 4294901760, %v13863_v6  ;;  %v2347_v34 = vand.u32 4294901760, %v2346_v61  ;;  %v2366_v58 = vsub.f32 %v13850_v41, %v2365_v11 }
 0x13a   : > { %16025 = vst [vmem:[#allocation290_spill] sm:$0xff] %v13874_v53  ;;  %v2356_v3 = vsub.f32 %v13842_v2, %v2355_v21  ;;  %v2385_v7 = vand.u32 4294901760, %v13869_v1  ;;  %v2405_v2 = vand.u32 4294901760, %v13877_v50 }
 0x13b   : > { %9702 = vmatmul.mubr.f32.gmra.mrb[138].mxu1 %v2297_v0  ;;  %10482 = vmatmul.mubr.f32.gmra.mrb[138].mxu0 %v2295_v32  ;;  %v805_v0 = vsel %vm347_vm0, %v327_v16, 0  ;;  %v328_v32 = vld [vmem:[%s12255_s12 + $0x4c8] sm:$0xff]  ;;  %16027 = vst [vmem:[#allocation292_spill] sm:$0xff] %v13879_v10  ;;  %v13894_v60 = vsub.f32 %v802_v45, %v13879_v10  ;;  %v2376_v61 = vsub.f32 %v13863_v6, %v2375_v43  ;;  %v2367_v41 = vand.u32 4294901760, %v2366_v58 }
 0x13c   : > { %9704 = vmatprep.mubr.f32.mxu1 %v2307_v63  ;;  %10484 = vmatprep.mubr.f32.mxu0 %v2305_v31  ;;  %v329_v31 = vld [vmem:[%s12255_s12 + $0x4d0] sm:$0xff]  ;;  %v2337_v63 = vand.u32 4294901760, %v2336_v23  ;;  %v13884_v16 = vand.u32 4294901760, %v805_v0  ;;  %v808_v49 = vsel %vm347_vm0, %v328_v32, 0  ;;  %v2395_v23 = vand.u32 4294901760, %v13874_v53 }
 0x13d   : > { %16029 = vst [vmem:[#allocation294_spill] sm:$0xff] %v13894_v60  ;;  %v2386_v37 = vsub.f32 %v13869_v1, %v2385_v7  ;;  %v2406_v6 = vsub.f32 %v13877_v50, %v2405_v2 }
 0x13e   : > { %16028 = vst [vmem:[#allocation293_spill] sm:$0xff] %v13884_v16  ;;  %v13899_v32 = vsub.f32 %v805_v0, %v13884_v16  ;;  %v2415_v0 = vand.u32 4294901760, %v13894_v60  ;;  %v333_v16 = vld [vmem:[%s12255_s12 + $0x4f0] sm:$0xff] }
 0x13f   : > { %9705 = vmatmul.mubr.f32.gmra.mrb[140].mxu1 %v2317_v59  ;;  %10485 = vmatmul.mubr.f32.gmra.mrb[140].mxu0 %v2315_v14  ;;  %v811_v59 = vsel %vm347_vm0, %v329_v31, 0  ;;  %v330_v14 = vld [vmem:[%s12255_s12 + $0x4d8] sm:$0xff]  ;;  %v13901_v31 = vand.u32 4294901760, %v808_v49  ;;  %v2407_v10 = vand.u32 4294901760, %v2406_v6 }
 0x140   : > { %9707 = vmatprep.mubr.f32.mxu1 %v2327_v51  ;;  %10487 = vmatprep.mubr.f32.mxu0 %v2325_v18  ;;  %v331_v51 = vld [vmem:[%s12255_s12 + $0x4e0] sm:$0xff]  ;;  %v2357_v18 = vand.u32 4294901760, %v2356_v3  ;;  %16030 = vst [vmem:[#allocation295_spill] sm:$0xff] %v13899_v32  ;;  %v13904_v5 = vand.u32 4294901760, %v811_v59  ;;  %v814_v45 = vsel %vm347_vm0, %v330_v14, 0  ;;  %v2396_v3 = vsub.f32 %v13874_v53, %v2395_v23 }
 0x141   : > { %v13915_v58 = vsub.f32 %v808_v49, %v13901_v31  ;;  %v13917_v14 = vand.u32 4294901760, %v814_v45  ;;  %v2416_v49 = vsub.f32 %v13894_v60, %v2415_v0 }
 0x142   : > { %16031 = vst [vmem:[#allocation296_spill] sm:$0xff] %v13904_v5  ;;  %v13920_v53 = vsub.f32 %v811_v59, %v13904_v5 }
 0x143   : > { %9708 = vmatmul.mubr.f32.gmra.mrb[142].mxu1 %v2337_v63  ;;  %10488 = vmatmul.mubr.f32.gmra.mrb[142].mxu0 %v2335_v46  ;;  %v817_v46 = vsel %vm347_vm0, %v331_v51, 0  ;;  %v332_v63 = vld [vmem:[%s12255_s12 + $0x4e8] sm:$0xff]  ;;  %16032 = vst [vmem:[#allocation297_spill] sm:$0xff] %v13915_v58  ;;  %16033 = vst [vmem:[#allocation298_spill] sm:$0xff] %v13917_v14  ;;  %v2387_v51 = vand.u32 4294901760, %v2386_v37  ;;  %v2435_v37 = vand.u32 4294901760, %v13915_v58 }
 0x144   : > { %9710 = vmatprep.mubr.f32.mxu1 %v2347_v34  ;;  %10490 = vmatprep.mubr.f32.mxu0 %v2345_v8  ;;  %v2377_v8 = vand.u32 4294901760, %v2376_v61  ;;  %v2425_v34 = vand.u32 4294901760, %v13899_v32  ;;  %16034 = vst [vmem:[#allocation299_spill] sm:$0xff] %v13920_v53  ;;  %v13922_v50 = vand.u32 4294901760, %v817_v46  ;;  %v820_v1 = vsel %vm347_vm0, %v332_v63, 0 }
 0x145   : > { %v2397_v61 = vand.u32 4294901760, %v2396_v3  ;;  %v13933_v59 = vand.u32 4294901760, %v820_v1  ;;  %v2417_v3 = vand.u32 4294901760, %v2416_v49 }
 0x146   : > { %16035 = vst [vmem:[#allocation300_spill] sm:$0xff] %v13922_v50  ;;  %v13937_v63 = vsub.f32 %v817_v46, %v13922_v50 }
 0x147   : > { %9711 = vmatmul.mubr.f32.gmra.mrb[144].mxu1 %v2357_v18  ;;  %10491 = vmatmul.mubr.f32.gmra.mrb[144].mxu0 %v2355_v21  ;;  %v823_v21 = vsel %vm347_vm0, %v333_v16, 0  ;;  %v334_v18 = vld [vmem:[%s12255_s12 + $0x4f8] sm:$0xff]  ;;  %16037 = vst [vmem:[#allocation302_spill] sm:$0xff] %v13933_v59  ;;  %v2445_v16 = vand.u32 4294901760, %v13920_v53 }
 0x148   : > { %9713 = vmatprep.mubr.f32.mxu1 %v2367_v41  ;;  %10493 = vmatprep.mubr.f32.mxu0 %v2365_v11  ;;  %v2426_v41 = vsub.f32 %v13899_v32, %v2425_v34  ;;  %v13931_v11 = vsub.f32 %v814_v45, %v13917_v14  ;;  %16038 = vst [vmem:[#allocation303_spill] sm:$0xff] %v13937_v63  ;;  %v13939_v6 = vand.u32 4294901760, %v823_v21  ;;  %v2465_v60 = vand.u32 4294901760, %v13937_v63 }
 0x149   : > { %v13945_v32 = vsub.f32 %v820_v1, %v13933_v59 }
 0x14a   : > { %16036 = vst [vmem:[#allocation301_spill] sm:$0xff] %v13931_v11  ;;  %16039 = vst [vmem:[#allocation304_spill] sm:$0xff] %v13939_v6  ;;  %v2455_v45 = vand.u32 4294901760, %v13931_v11  ;;  %v2427_v46 = vand.u32 4294901760, %v2426_v41 }
 0x14b   : > { %9714 = vmatmul.mubr.f32.gmra.mrb[146].mxu1 %v2377_v8  ;;  %10494 = vmatmul.mubr.f32.gmra.mrb[146].mxu0 %v2375_v43  ;;  %v826_v43 = vsel %vm347_vm0, %v334_v18, 0  ;;  %v2436_v8 = vsub.f32 %v13915_v58, %v2435_v37  ;;  %16040 = vst [vmem:[#allocation305_spill] sm:$0xff] %v13945_v32  ;;  %v13952_v18 = vsub.f32 %v823_v21, %v13939_v6  ;;  %v2475_v1 = vand.u32 4294901760, %v13945_v32  ;;  %v16080_v58 = vld [vmem:[#allocation88_spill] sm:$0xff] }
 0x14c   : > { %9716 = vmatprep.mubr.f32.mxu1 %v2387_v51  ;;  %10496 = vmatprep.mubr.f32.mxu0 %v2385_v7  ;;  %v13947_v7 = vand.u32 4294901760, %v826_v43  ;;  %v2446_v51 = vsub.f32 %v13920_v53, %v2445_v16  ;;  %v16079_v53 = vld [vmem:[#allocation86_spill] sm:$0xff] }
 0x14d   : > { %16042 = vst [vmem:[#allocation307_spill] sm:$0xff] %v13952_v18  ;;  %v2485_v41 = vand.u32 4294901760, %v13952_v18 }
 0x14e   : > { %16041 = vst [vmem:[#allocation306_spill] sm:$0xff] %v13947_v7  ;;  %v13957_v49 = vsub.f32 %v826_v43, %v13947_v7 }
 0x14f   : > { %9717 = vmatmul.mubr.f32.gmra.mrb[148].mxu1 %v2397_v61  ;;  %10497 = vmatmul.mubr.f32.gmra.mrb[148].mxu0 %v2395_v23  ;;  %v2437_v23 = vand.u32 4294901760, %v2436_v8  ;;  %v2456_v61 = vsub.f32 %v13931_v11, %v2455_v45  ;;  %v2486_v43 = vsub.f32 %v13952_v18, %v2485_v41  ;;  %v16075_v18 = vld [vmem:[#allocation78_spill] sm:$0xff]  ;;  %v16078_v11 = vld [vmem:[#allocation85_spill] sm:$0xff] }
 0x150   : > { %9719 = vmatprep.mubr.f32.mxu1 %v2407_v10  ;;  %10499 = vmatprep.mubr.f32.mxu0 %v2405_v2  ;;  %16043 = vst [vmem:[#allocation308_spill] sm:$0xff] %v13957_v49  ;;  %v2447_v2 = vand.u32 4294901760, %v2446_v51  ;;  %v2466_v10 = vsub.f32 %v13937_v63, %v2465_v60  ;;  %v16077_v63 = vld [vmem:[#allocation80_spill] sm:$0xff] }
 0x151   : > { %v2457_v21 = vand.u32 4294901760, %v2456_v61  ;;  %v2487_v51 = vand.u32 4294901760, %v2486_v43  ;;  %v16056_v61 = vld [vmem:[#allocation39_spill] sm:$0xff]  ;;  %v16064_v43 = vld [vmem:[#allocation56_spill] sm:$0xff] }
 0x152   : > { %v2467_v8 = vand.u32 4294901760, %v2466_v10  ;;  %v16059_v10 = vld [vmem:[#allocation45_spill] sm:$0xff] }
 0x153   : > { %9720 = vmatmul.mubr.f32.gmra.mrb[150].mxu1 %v2417_v3  ;;  %10500 = vmatmul.mubr.f32.gmra.mrb[150].mxu0 %v2415_v0  ;;  %v2476_v0 = vsub.f32 %v13945_v32, %v2475_v1  ;;  %v2495_v3 = vand.u32 4294901760, %v13957_v49  ;;  %v16076_v32 = vld [vmem:[#allocation79_spill] sm:$0xff] }
 0x154   : > { %9722 = vmatprep.mubr.f32.mxu1 %v2427_v46  ;;  %10502 = vmatprep.mubr.f32.mxu0 %v2425_v34 }
 0x155   : > { %v2477_v34 = vand.u32 4294901760, %v2476_v0  ;;  %v2496_v46 = vsub.f32 %v13957_v49, %v2495_v3  ;;  %v16062_v0 = vld [vmem:[#allocation52_spill] sm:$0xff]  ;;  %v16074_v49 = vld [vmem:[#allocation75_spill] sm:$0xff] }
 0x157   : > { %9723 = vmatmul.mubr.f32.gmra.mrb[152].mxu1 %v2437_v23  ;;  %10503 = vmatmul.mubr.f32.gmra.mrb[152].mxu0 %v2435_v37  ;;  %v2497_v37 = vand.u32 4294901760, %v2496_v46  ;;  %v16055_v23 = vld [vmem:[#allocation37_spill] sm:$0xff]  ;;  %v16066_v46 = vld [vmem:[#allocation58_spill] sm:$0xff] }
 0x158   : > { %9725 = vmatprep.mubr.f32.mxu1 %v2447_v2  ;;  %10505 = vmatprep.mubr.f32.mxu0 %v2445_v16  ;;  %v11078_v16 = vpack.c.bf16 %v12525_v22, %v12519_v30  ;;  %v16049_v22 = vld [vmem:[#allocation24_spill] sm:$0xff]  ;;  %v16050_v30 = vld [vmem:[#allocation26_spill] sm:$0xff] }
 0x159   : > { %v16058_v2 = vld [vmem:[#allocation44_spill] sm:$0xff] }
 0x15b   : > { %9726 = vmatmul.mubr.f32.gmra.mrb[154].mxu1 %v2457_v21  ;;  %10506 = vmatmul.mubr.f32.gmra.mrb[154].mxu0 %v2455_v45  ;;  %v16054_v45 = vld [vmem:[#allocation35_spill] sm:$0xff] }
 0x15c   : > { %9728 = vmatprep.mubr.f32.mxu1 %v2467_v8  ;;  %10508 = vmatprep.mubr.f32.mxu0 %v2465_v60  ;;  %v11082_v60 = vpack.c.bf16 %v12852_v19, %v12845_v20  ;;  %v16051_v20 = vld [vmem:[#allocation29_spill] sm:$0xff]  ;;  %v16052_v19 = vld [vmem:[#allocation30_spill] sm:$0xff]  ;;  %v16061_v21 = vld [vmem:[#allocation51_spill] sm:$0xff]  ;;  %v11086_v8 = vpack.c.bf16 %v13140_v4, %v13121_v13 }
 0x15d   : > { %v16069_v13 = vld [vmem:[#allocation67_spill] sm:$0xff]  ;;  %v16070_v4 = vld [vmem:[#allocation68_spill] sm:$0xff] }
 0x15f   : > { %9729 = vmatmul.mubr.f32.gmra.mrb[156].mxu1 %v2477_v34  ;;  %10509 = vmatmul.mubr.f32.gmra.mrb[156].mxu0 %v2475_v1  ;;  %v16057_v1 = vld [vmem:[#allocation40_spill] sm:$0xff]  ;;  %v16065_v34 = vld [vmem:[#allocation57_spill] sm:$0xff] }
 0x160   : > { %9731 = vmatprep.mubr.f32.mxu1 %v2487_v51  ;;  %10511 = vmatprep.mubr.f32.mxu0 %v2485_v41  ;;  %v16060_v41 = vld [vmem:[#allocation46_spill] sm:$0xff]  ;;  %v16067_v51 = vld [vmem:[#allocation61_spill] sm:$0xff] }
 0x163   : > { %9732 = vmatmul.mubr.f32.gmra.mrb[158].mxu1 %v2497_v37  ;;  %10512 = vmatmul.mubr.f32.gmra.mrb[158].mxu0 %v2495_v3  ;;  %v16063_v3 = vld [vmem:[#allocation54_spill] sm:$0xff]  ;;  %v16068_v37 = vld [vmem:[#allocation64_spill] sm:$0xff] }
 0x164   : > { %9754 = vmatprep.mubr.f32.mxu1 %v12289_v39  ;;  %10534 = vmatprep.mubr.f32.mxu0 %v12289_v39 }
 0x167   : > { %9755 = vmatmul.mubr.f32.vlgmr.msra.gmra.mrb[0].mxu1 %v12291_v40  ;;  %10535 = vmatmul.mubr.f32.vlgmr.msra.gmra.mrb[0].mxu0 %v12291_v40 }
 0x168   : > { %11077 = vmatpush3.bf16.msra.mxu1 %v13661_v15  ;;  %9757 = vmatprep.mubr.f32.mxu1 %v12294_v42  ;;  %v16053_v15 = vld [vmem:[#allocation32_spill] sm:$0xff] }
 0x169   : > { %10537 = vmatprep.mubr.f32.mxu0 %v12294_v42  ;;  %11137 = vmatpush3.bf16.msra.mxu0 %v12205_v12  ;;  %v16044_v12 = vld [vmem:[#allocation14_spill] sm:$0xff] }
 0x16a   : > { %11079 = vmatprep.subr.bf16.mxu1 %v11078_v16  ;;  %11139 = vmatprep.subr.bf16.mxu0 %v12223_v17 }
 0x16b   : > { %9758 = vmatmul.mubr.f32.gmra.mrb[2].mxu1 %v12314_v54  ;;  %10538 = vmatmul.mubr.f32.gmra.mrb[2].mxu0 %v12314_v54 }
 0x16c   : > { %9760 = vmatprep.mubr.f32.mxu1 %v12316_v55  ;;  %10540 = vmatprep.mubr.f32.mxu0 %v12316_v55 }
 0x16d   : > { %11081 = vmatpush3.bf16.msra.mxu1 %v11078_v16  ;;  %11141 = vmatpush3.bf16.msra.mxu0 %v12223_v17  ;;  %v16045_v17 = vld [vmem:[#allocation15_spill] sm:$0xff]  ;;  %v16071_v16 = vld [vmem:[#allocation69_spill] sm:$0xff] }
 0x16e   : > { %11083 = vmatprep.subr.bf16.mxu1 %v11082_v60  ;;  %11143 = vmatprep.subr.bf16.mxu0 %v12246_v25 }
 0x16f   : > { %9761 = vmatmul.mubr.f32.gmra.mrb[4].mxu1 %v12318_v56  ;;  %10541 = vmatmul.mubr.f32.gmra.mrb[4].mxu0 %v12318_v56 }
 0x170   : > { %9763 = vmatprep.mubr.f32.mxu1 %v12320_v57  ;;  %10543 = vmatprep.mubr.f32.mxu0 %v12320_v57 }
 0x171   : > { %11085 = vmatpush3.bf16.msra.mxu1 %v11082_v60  ;;  %11145 = vmatpush3.bf16.msra.mxu0 %v12246_v25  ;;  %v16046_v25 = vld [vmem:[#allocation20_spill] sm:$0xff] }
 0x172   : > { %11147 = vmatprep.subr.bf16.mxu0 %v12266_v28  ;;  %11087 = vmatprep.subr.bf16.mxu1 %v11086_v8  ;;  %v16072_v60 = vld [vmem:[#allocation72_spill] sm:$0xff] }
 0x173   : > { %9764 = vmatmul.mubr.f32.gmra.mrb[6].mxu1 %v12342_v27  ;;  %10544 = vmatmul.mubr.f32.gmra.mrb[6].mxu0 %v12342_v27 }
 0x174   : > { %9766 = vmatprep.mubr.f32.mxu1 %v12382_v35  ;;  %10546 = vmatprep.mubr.f32.mxu0 %v12382_v35 }
 0x175   : > { %11149 = vmatpush3.bf16.msra.mxu0 %v12266_v28  ;;  %v16047_v28 = vld [vmem:[#allocation21_spill] sm:$0xff]  ;;  %11089 = vmatpush3.bf16.msra.mxu1 %v11086_v8  ;;  %v16073_v8 = vld [vmem:[#allocation74_spill] sm:$0xff] }
 0x176   : > { %11151 = vmatprep.subr.bf16.mxu0 %v12280_v33 }
 0x177   : > { %9767 = vmatmul.mubr.f32.gmra.mrb[8].mxu1 %v12384_v36  ;;  %10547 = vmatmul.mubr.f32.gmra.mrb[8].mxu0 %v12384_v36 }
 0x178   : > { %9769 = vmatprep.mubr.f32.mxu1 %v12386_v29  ;;  %10549 = vmatprep.mubr.f32.mxu0 %v12386_v29 }
 0x179   : > { %11153 = vmatpush3.bf16.msra.mxu0 %v12280_v33  ;;  %v16048_v33 = vld [vmem:[#allocation23_spill] sm:$0xff] }
 0x17b   : > { %9770 = vmatmul.mubr.f32.gmra.mrb[10].mxu1 %v12402_v9  ;;  %10550 = vmatmul.mubr.f32.gmra.mrb[10].mxu0 %v12402_v9 }
 0x17c   : > { %9772 = vmatprep.mubr.f32.mxu1 %v12404_v47  ;;  %10552 = vmatprep.mubr.f32.mxu0 %v12404_v47 }
 0x17f   : > { %9773 = vmatmul.mubr.f32.gmra.mrb[12].mxu1 %v16044_v12  ;;  %10553 = vmatmul.mubr.f32.gmra.mrb[12].mxu0 %v16044_v12 }
 0x180   : > { %9775 = vmatprep.mubr.f32.mxu1 %v16045_v17  ;;  %10555 = vmatprep.mubr.f32.mxu0 %v16045_v17 }
 0x183   : > { %9776 = vmatmul.mubr.f32.gmra.mrb[14].mxu1 %v16046_v25  ;;  %10556 = vmatmul.mubr.f32.gmra.mrb[14].mxu0 %v16046_v25 }
 0x184   : > { %9778 = vmatprep.mubr.f32.mxu1 %v16047_v28  ;;  %10558 = vmatprep.mubr.f32.mxu0 %v16047_v28 }
 0x187   : > { %9779 = vmatmul.mubr.f32.gmra.mrb[16].mxu1 %v16048_v33  ;;  %10559 = vmatmul.mubr.f32.gmra.mrb[16].mxu0 %v16048_v33 }
 0x188   : > { %9781 = vmatprep.mubr.f32.mxu1 %v16049_v22  ;;  %10561 = vmatprep.mubr.f32.mxu0 %v16049_v22 }
 0x18b   : > { %9782 = vmatmul.mubr.f32.gmra.mrb[18].mxu1 %v16050_v30  ;;  %10562 = vmatmul.mubr.f32.gmra.mrb[18].mxu0 %v16050_v30 }
 0x18c   : > { %9784 = vmatprep.mubr.f32.mxu1 %v16051_v20  ;;  %10564 = vmatprep.mubr.f32.mxu0 %v16051_v20 }
 0x18f   : > { %9785 = vmatmul.mubr.f32.gmra.mrb[20].mxu1 %v16052_v19  ;;  %10565 = vmatmul.mubr.f32.gmra.mrb[20].mxu0 %v16052_v19 }
 0x190   : > { %9787 = vmatprep.mubr.f32.mxu1 %v16053_v15  ;;  %10567 = vmatprep.mubr.f32.mxu0 %v16053_v15 }
 0x193   : > { %9788 = vmatmul.mubr.f32.gmra.mrb[22].mxu1 %v16054_v45  ;;  %10568 = vmatmul.mubr.f32.gmra.mrb[22].mxu0 %v16054_v45 }
 0x194   : > { %9790 = vmatprep.mubr.f32.mxu1 %v16055_v23  ;;  %10570 = vmatprep.mubr.f32.mxu0 %v16055_v23 }
 0x197   : > { %9791 = vmatmul.mubr.f32.gmra.mrb[24].mxu1 %v16056_v61  ;;  %10571 = vmatmul.mubr.f32.gmra.mrb[24].mxu0 %v16056_v61 }
 0x198   : > { %9793 = vmatprep.mubr.f32.mxu1 %v16057_v1  ;;  %10573 = vmatprep.mubr.f32.mxu0 %v16057_v1 }
 0x19b   : > { %9794 = vmatmul.mubr.f32.gmra.mrb[26].mxu1 %v12574_v38  ;;  %10574 = vmatmul.mubr.f32.gmra.mrb[26].mxu0 %v12574_v38 }
 0x19c   : > { %9796 = vmatprep.mubr.f32.mxu1 %v16058_v2  ;;  %10576 = vmatprep.mubr.f32.mxu0 %v16058_v2 }
 0x19f   : > { %9797 = vmatmul.mubr.f32.gmra.mrb[28].mxu1 %v16059_v10  ;;  %10577 = vmatmul.mubr.f32.gmra.mrb[28].mxu0 %v16059_v10 }
 0x1a0   : > { %9799 = vmatprep.mubr.f32.mxu1 %v16060_v41  ;;  %10579 = vmatprep.mubr.f32.mxu0 %v16060_v41 }
 0x1a3   : > { %9800 = vmatmul.mubr.f32.gmra.mrb[30].mxu1 %v16061_v21  ;;  %10580 = vmatmul.mubr.f32.gmra.mrb[30].mxu0 %v16061_v21 }
 0x1a4   : > { %9802 = vmatprep.mubr.f32.mxu1 %v16062_v0  ;;  %10582 = vmatprep.mubr.f32.mxu0 %v16062_v0 }
 0x1a7   : > { %9803 = vmatmul.mubr.f32.gmra.mrb[32].mxu1 %v16063_v3  ;;  %10583 = vmatmul.mubr.f32.gmra.mrb[32].mxu0 %v16063_v3 }
 0x1a8   : > { %9805 = vmatprep.mubr.f32.mxu1 %v16064_v43  ;;  %10585 = vmatprep.mubr.f32.mxu0 %v16064_v43 }
 0x1ab   : > { %9806 = vmatmul.mubr.f32.gmra.mrb[34].mxu1 %v16065_v34  ;;  %10586 = vmatmul.mubr.f32.gmra.mrb[34].mxu0 %v16065_v34 }
 0x1ac   : > { %9808 = vmatprep.mubr.f32.mxu1 %v16066_v46  ;;  %10588 = vmatprep.mubr.f32.mxu0 %v16066_v46 }
 0x1af   : > { %9809 = vmatmul.mubr.f32.gmra.mrb[36].mxu1 %v16067_v51  ;;  %10589 = vmatmul.mubr.f32.gmra.mrb[36].mxu0 %v16067_v51 }
 0x1b0   : > { %9811 = vmatprep.mubr.f32.mxu1 %v16068_v37  ;;  %10591 = vmatprep.mubr.f32.mxu0 %v16068_v37 }
 0x1b3   : > { %9812 = vmatmul.mubr.f32.gmra.mrb[38].mxu1 %v16069_v13  ;;  %10592 = vmatmul.mubr.f32.gmra.mrb[38].mxu0 %v16069_v13 }
 0x1b4   : > { %9814 = vmatprep.mubr.f32.mxu1 %v16070_v4  ;;  %10594 = vmatprep.mubr.f32.mxu0 %v16070_v4 }
 0x1b7   : > { %9815 = vmatmul.mubr.f32.gmra.mrb[40].mxu1 %v16071_v16  ;;  %10595 = vmatmul.mubr.f32.gmra.mrb[40].mxu0 %v16071_v16 }
 0x1b8   : > { %9817 = vmatprep.mubr.f32.mxu1 %v16072_v60  ;;  %10597 = vmatprep.mubr.f32.mxu0 %v16072_v60 }
 0x1bb   : > { %9818 = vmatmul.mubr.f32.gmra.mrb[42].mxu1 %v16073_v8  ;;  %10598 = vmatmul.mubr.f32.gmra.mrb[42].mxu0 %v16073_v8 }
 0x1bc   : > { %9820 = vmatprep.mubr.f32.mxu1 %v16074_v49  ;;  %10600 = vmatprep.mubr.f32.mxu0 %v16074_v49 }
 0x1bf   : > { %9821 = vmatmul.mubr.f32.gmra.mrb[44].mxu1 %v16075_v18  ;;  %10601 = vmatmul.mubr.f32.gmra.mrb[44].mxu0 %v16075_v18  ;;  %v16081_v18 = vld [vmem:[#allocation90_spill] sm:$0xff] }
 0x1c0   : > { %9823 = vmatprep.mubr.f32.mxu1 %v16076_v32  ;;  %10603 = vmatprep.mubr.f32.mxu0 %v16076_v32  ;;  %v16082_v32 = vld [vmem:[#allocation91_spill] sm:$0xff] }
 0x1c3   : > { %9824 = vmatmul.mubr.f32.gmra.mrb[46].mxu1 %v16077_v63  ;;  %10604 = vmatmul.mubr.f32.gmra.mrb[46].mxu0 %v16077_v63  ;;  %v16083_v63 = vld [vmem:[#allocation95_spill] sm:$0xff] }
 0x1c4   : > { %9826 = vmatprep.mubr.f32.mxu1 %v16078_v11  ;;  %10606 = vmatprep.mubr.f32.mxu0 %v16078_v11 }
 0x1c7   : > { %9827 = vmatmul.mubr.f32.gmra.mrb[48].mxu1 %v16079_v53  ;;  %10607 = vmatmul.mubr.f32.gmra.mrb[48].mxu0 %v16079_v53  ;;  %v16084_v53 = vld [vmem:[#allocation98_spill] sm:$0xff] }
 0x1c8   : > { %9829 = vmatprep.mubr.f32.mxu1 %v16080_v58  ;;  %10609 = vmatprep.mubr.f32.mxu0 %v16080_v58  ;;  %v16085_v58 = vld [vmem:[#allocation100_spill] sm:$0xff] }
 0x1cb   : > { %9830 = vmatmul.mubr.f32.gmra.mrb[50].mxu1 %v16081_v18  ;;  %10610 = vmatmul.mubr.f32.gmra.mrb[50].mxu0 %v16081_v18  ;;  %v16086_v18 = vld [vmem:[#allocation101_spill] sm:$0xff] }
 0x1cc   : > { %9832 = vmatprep.mubr.f32.mxu1 %v16082_v32  ;;  %10612 = vmatprep.mubr.f32.mxu0 %v16082_v32  ;;  %v16087_v32 = vld [vmem:[#allocation104_spill] sm:$0xff] }
 0x1cf   : > { %9833 = vmatmul.mubr.f32.gmra.mrb[52].mxu1 %v16083_v63  ;;  %10613 = vmatmul.mubr.f32.gmra.mrb[52].mxu0 %v16083_v63  ;;  %v16088_v63 = vld [vmem:[#allocation106_spill] sm:$0xff] }
 0x1d0   : > { %9835 = vmatprep.mubr.f32.mxu1 %v12872_v52  ;;  %10615 = vmatprep.mubr.f32.mxu0 %v12872_v52  ;;  %v16089_v52 = vld [vmem:[#allocation107_spill] sm:$0xff] }
 0x1d3   : > { %9836 = vmatmul.mubr.f32.gmra.mrb[54].mxu1 %v16084_v53  ;;  %10616 = vmatmul.mubr.f32.gmra.mrb[54].mxu0 %v16084_v53  ;;  %v16090_v53 = vld [vmem:[#allocation111_spill] sm:$0xff] }
 0x1d4   : > { %9838 = vmatprep.mubr.f32.mxu1 %v16085_v58  ;;  %10618 = vmatprep.mubr.f32.mxu0 %v16085_v58  ;;  %v16091_v58 = vld [vmem:[#allocation112_spill] sm:$0xff] }
 0x1d7   : > { %9839 = vmatmul.mubr.f32.gmra.mrb[56].mxu1 %v16086_v18  ;;  %10619 = vmatmul.mubr.f32.gmra.mrb[56].mxu0 %v16086_v18  ;;  %v16092_v18 = vld [vmem:[#allocation115_spill] sm:$0xff] }
 0x1d8   : > { %9841 = vmatprep.mubr.f32.mxu1 %v16087_v32  ;;  %10621 = vmatprep.mubr.f32.mxu0 %v16087_v32  ;;  %v16093_v32 = vld [vmem:[#allocation116_spill] sm:$0xff] }
 0x1db   : > { %9842 = vmatmul.mubr.f32.gmra.mrb[58].mxu1 %v16088_v63  ;;  %10622 = vmatmul.mubr.f32.gmra.mrb[58].mxu0 %v16088_v63  ;;  %v16094_v63 = vld [vmem:[#allocation118_spill] sm:$0xff] }
 0x1dc   : > { %9844 = vmatprep.mubr.f32.mxu1 %v16089_v52  ;;  %10624 = vmatprep.mubr.f32.mxu0 %v16089_v52  ;;  %v16095_v52 = vld [vmem:[#allocation197_spill] sm:$0xff] }
 0x1dd   : > { %v11090_v11 = vpack.c.bf16 %v16095_v52, %v13413_v24  ;;  %v16101_v52 = vld [vmem:[#allocation129_spill] sm:$0xff]  ;;  %v16102_v24 = vld [vmem:[#allocation132_spill] sm:$0xff] }
 0x1df   : > { %9845 = vmatmul.mubr.f32.gmra.mrb[60].mxu1 %v16090_v53  ;;  %10625 = vmatmul.mubr.f32.gmra.mrb[60].mxu0 %v16090_v53  ;;  %v16096_v53 = vld [vmem:[#allocation120_spill] sm:$0xff] }
 0x1e0   : > { %9847 = vmatprep.mubr.f32.mxu1 %v16091_v58  ;;  %10627 = vmatprep.mubr.f32.mxu0 %v16091_v58  ;;  %v16097_v58 = vld [vmem:[#allocation121_spill] sm:$0xff] }
 0x1e1   : > { %11091 = vmatprep.subr.bf16.mxu1 %v11090_v11 }
 0x1e2   : > { %11093 = vmatpush3.bf16.msra.mxu1 %v11090_v11  ;;  %v16103_v11 = vld [vmem:[#allocation134_spill] sm:$0xff] }
 0x1e3   : > { %9848 = vmatmul.mubr.f32.gmra.mrb[62].mxu1 %v16092_v18  ;;  %10628 = vmatmul.mubr.f32.gmra.mrb[62].mxu0 %v16092_v18  ;;  %v16098_v18 = vld [vmem:[#allocation124_spill] sm:$0xff] }
 0x1e4   : > { %9850 = vmatprep.mubr.f32.mxu1 %v16093_v32  ;;  %10630 = vmatprep.mubr.f32.mxu0 %v16093_v32  ;;  %v16099_v32 = vld [vmem:[#allocation126_spill] sm:$0xff] }
 0x1e7   : > { %9851 = vmatmul.mubr.f32.gmra.mrb[64].mxu1 %v16094_v63  ;;  %10631 = vmatmul.mubr.f32.gmra.mrb[64].mxu0 %v16094_v63  ;;  %v16100_v63 = vld [vmem:[#allocation127_spill] sm:$0xff] }
 0x1e8   : > { %9853 = vmatprep.mubr.f32.mxu1 %v16096_v53  ;;  %10633 = vmatprep.mubr.f32.mxu0 %v16096_v53 }
 0x1eb   : > { %9854 = vmatmul.mubr.f32.gmra.mrb[66].mxu1 %v16097_v58  ;;  %10634 = vmatmul.mubr.f32.gmra.mrb[66].mxu0 %v16097_v58 }
 0x1ec   : > { %9856 = vmatprep.mubr.f32.mxu1 %v16098_v18  ;;  %10636 = vmatprep.mubr.f32.mxu0 %v16098_v18  ;;  %v16104_v18 = vld [vmem:[#allocation136_spill] sm:$0xff] }
 0x1ef   : > { %9857 = vmatmul.mubr.f32.gmra.mrb[68].mxu1 %v16099_v32  ;;  %10637 = vmatmul.mubr.f32.gmra.mrb[68].mxu0 %v16099_v32  ;;  %v16105_v32 = vld [vmem:[#allocation138_spill] sm:$0xff] }
 0x1f0   : > { %9859 = vmatprep.mubr.f32.mxu1 %v16100_v63  ;;  %10639 = vmatprep.mubr.f32.mxu0 %v16100_v63  ;;  %v16106_v63 = vld [vmem:[#allocation139_spill] sm:$0xff] }
 0x1f3   : > { %9860 = vmatmul.mubr.f32.gmra.mrb[70].mxu1 %v16101_v52  ;;  %10640 = vmatmul.mubr.f32.gmra.mrb[70].mxu0 %v16101_v52  ;;  %v16107_v52 = vld [vmem:[#allocation142_spill] sm:$0xff] }
 0x1f4   : > { %9862 = vmatprep.mubr.f32.mxu1 %v16102_v24  ;;  %10642 = vmatprep.mubr.f32.mxu0 %v16102_v24  ;;  %v16108_v24 = vld [vmem:[#allocation144_spill] sm:$0xff] }
 0x1f7   : > { %9863 = vmatmul.mubr.f32.gmra.mrb[72].mxu1 %v16103_v11  ;;  %10643 = vmatmul.mubr.f32.gmra.mrb[72].mxu0 %v16103_v11  ;;  %v16109_v11 = vld [vmem:[#allocation145_spill] sm:$0xff] }
 0x1f8   : > { %9865 = vmatprep.mubr.f32.mxu1 %v16104_v18  ;;  %10645 = vmatprep.mubr.f32.mxu0 %v16104_v18  ;;  %v16110_v18 = vld [vmem:[#allocation148_spill] sm:$0xff] }
 0x1fb   : > { %9866 = vmatmul.mubr.f32.gmra.mrb[74].mxu1 %v16105_v32  ;;  %10646 = vmatmul.mubr.f32.gmra.mrb[74].mxu0 %v16105_v32  ;;  %v16111_v32 = vld [vmem:[#allocation149_spill] sm:$0xff] }
 0x1fc   : > { %9868 = vmatprep.mubr.f32.mxu1 %v16106_v63  ;;  %10648 = vmatprep.mubr.f32.mxu0 %v16106_v63  ;;  %v16112_v63 = vld [vmem:[#allocation152_spill] sm:$0xff] }
 0x1ff   : > { %9869 = vmatmul.mubr.f32.gmra.mrb[76].mxu1 %v16107_v52  ;;  %10649 = vmatmul.mubr.f32.gmra.mrb[76].mxu0 %v16107_v52  ;;  %v16113_v52 = vld [vmem:[#allocation154_spill] sm:$0xff] }
 0x200   : > { %9871 = vmatprep.mubr.f32.mxu1 %v16108_v24  ;;  %10651 = vmatprep.mubr.f32.mxu0 %v16108_v24  ;;  %v16114_v24 = vld [vmem:[#allocation156_spill] sm:$0xff] }
 0x203   : > { %9872 = vmatmul.mubr.f32.gmra.mrb[78].mxu1 %v16109_v11  ;;  %10652 = vmatmul.mubr.f32.gmra.mrb[78].mxu0 %v16109_v11  ;;  %v16115_v11 = vld [vmem:[#allocation158_spill] sm:$0xff] }
 0x204   : > { %9874 = vmatprep.mubr.f32.mxu1 %v16110_v18  ;;  %10654 = vmatprep.mubr.f32.mxu0 %v16110_v18  ;;  %v16116_v18 = vld [vmem:[#allocation159_spill] sm:$0xff] }
 0x207   : > { %9875 = vmatmul.mubr.f32.gmra.mrb[80].mxu1 %v16111_v32  ;;  %10655 = vmatmul.mubr.f32.gmra.mrb[80].mxu0 %v16111_v32  ;;  %v16117_v32 = vld [vmem:[#allocation161_spill] sm:$0xff] }
 0x208   : > { %9877 = vmatprep.mubr.f32.mxu1 %v16112_v63  ;;  %10657 = vmatprep.mubr.f32.mxu0 %v16112_v63  ;;  %v16118_v63 = vld [vmem:[#allocation164_spill] sm:$0xff] }
 0x20b   : > { %9878 = vmatmul.mubr.f32.gmra.mrb[82].mxu1 %v16113_v52  ;;  %10658 = vmatmul.mubr.f32.gmra.mrb[82].mxu0 %v16113_v52  ;;  %v16119_v52 = vld [vmem:[#allocation166_spill] sm:$0xff] }
 0x20c   : > { %9880 = vmatprep.mubr.f32.mxu1 %v16114_v24  ;;  %10660 = vmatprep.mubr.f32.mxu0 %v16114_v24  ;;  %v16120_v24 = vld [vmem:[#allocation167_spill] sm:$0xff] }
 0x20f   : > { %9881 = vmatmul.mubr.f32.gmra.mrb[84].mxu1 %v16115_v11  ;;  %10661 = vmatmul.mubr.f32.gmra.mrb[84].mxu0 %v16115_v11  ;;  %v16121_v11 = vld [vmem:[#allocation171_spill] sm:$0xff] }
 0x210   : > { %9883 = vmatprep.mubr.f32.mxu1 %v16116_v18  ;;  %10663 = vmatprep.mubr.f32.mxu0 %v16116_v18  ;;  %v16122_v18 = vld [vmem:[#allocation172_spill] sm:$0xff] }
 0x213   : > { %9884 = vmatmul.mubr.f32.gmra.mrb[86].mxu1 %v16117_v32  ;;  %10664 = vmatmul.mubr.f32.gmra.mrb[86].mxu0 %v16117_v32  ;;  %v16123_v32 = vld [vmem:[#allocation174_spill] sm:$0xff] }
 0x214   : > { %9886 = vmatprep.mubr.f32.mxu1 %v16118_v63  ;;  %10666 = vmatprep.mubr.f32.mxu0 %v16118_v63  ;;  %v16124_v63 = vld [vmem:[#allocation176_spill] sm:$0xff] }
 0x217   : > { %9887 = vmatmul.mubr.f32.gmra.mrb[88].mxu1 %v16119_v52  ;;  %10667 = vmatmul.mubr.f32.gmra.mrb[88].mxu0 %v16119_v52  ;;  %v16125_v52 = vld [vmem:[#allocation178_spill] sm:$0xff] }
 0x218   : > { %9889 = vmatprep.mubr.f32.mxu1 %v16120_v24  ;;  %10669 = vmatprep.mubr.f32.mxu0 %v16120_v24  ;;  %v16126_v24 = vld [vmem:[#allocation179_spill] sm:$0xff] }
 0x21b   : > { %9890 = vmatmul.mubr.f32.gmra.mrb[90].mxu1 %v16121_v11  ;;  %10670 = vmatmul.mubr.f32.gmra.mrb[90].mxu0 %v16121_v11  ;;  %v16127_v11 = vld [vmem:[#allocation181_spill] sm:$0xff] }
 0x21c   : > { %9892 = vmatprep.mubr.f32.mxu1 %v16122_v18  ;;  %10672 = vmatprep.mubr.f32.mxu0 %v16122_v18  ;;  %v16128_v18 = vld [vmem:[#allocation182_spill] sm:$0xff] }
 0x21f   : > { %9893 = vmatmul.mubr.f32.gmra.mrb[92].mxu1 %v16123_v32  ;;  %10673 = vmatmul.mubr.f32.gmra.mrb[92].mxu0 %v16123_v32  ;;  %v16129_v32 = vld [vmem:[#allocation186_spill] sm:$0xff] }
 0x220   : > { %9895 = vmatprep.mubr.f32.mxu1 %v16124_v63  ;;  %10675 = vmatprep.mubr.f32.mxu0 %v16124_v63  ;;  %v16130_v63 = vld [vmem:[#allocation188_spill] sm:$0xff] }
 0x223   : > { %9896 = vmatmul.mubr.f32.gmra.mrb[94].mxu1 %v16125_v52  ;;  %10676 = vmatmul.mubr.f32.gmra.mrb[94].mxu0 %v16125_v52  ;;  %v16131_v52 = vld [vmem:[#allocation190_spill] sm:$0xff] }
 0x224   : > { %9898 = vmatprep.mubr.f32.mxu1 %v16126_v24  ;;  %10678 = vmatprep.mubr.f32.mxu0 %v16126_v24  ;;  %v16132_v24 = vld [vmem:[#allocation191_spill] sm:$0xff] }
 0x227   : > { %9899 = vmatmul.mubr.f32.gmra.mrb[96].mxu1 %v16127_v11  ;;  %10679 = vmatmul.mubr.f32.gmra.mrb[96].mxu0 %v16127_v11  ;;  %v16133_v11 = vld [vmem:[#allocation195_spill] sm:$0xff] }
 0x228   : > { %9901 = vmatprep.mubr.f32.mxu1 %v16128_v18  ;;  %10681 = vmatprep.mubr.f32.mxu0 %v16128_v18  ;;  %v16134_v18 = vld [vmem:[#allocation196_spill] sm:$0xff] }
 0x22b   : > { %9902 = vmatmul.mubr.f32.gmra.mrb[98].mxu1 %v16129_v32  ;;  %10682 = vmatmul.mubr.f32.gmra.mrb[98].mxu0 %v16129_v32  ;;  %v16135_v32 = vld [vmem:[#allocation200_spill] sm:$0xff] }
 0x22c   : > { %9904 = vmatprep.mubr.f32.mxu1 %v16130_v63  ;;  %10684 = vmatprep.mubr.f32.mxu0 %v16130_v63 }
 0x22f   : > { %9905 = vmatmul.mubr.f32.gmra.mrb[100].mxu1 %v16131_v52  ;;  %10685 = vmatmul.mubr.f32.gmra.mrb[100].mxu0 %v16131_v52 }
 0x230   : > { %9907 = vmatprep.mubr.f32.mxu1 %v16132_v24  ;;  %10687 = vmatprep.mubr.f32.mxu0 %v16132_v24 }
 0x233   : > { %9908 = vmatmul.mubr.f32.gmra.mrb[102].mxu1 %v16133_v11  ;;  %10688 = vmatmul.mubr.f32.gmra.mrb[102].mxu0 %v16133_v11  ;;  %v16136_v11 = vld [vmem:[#allocation207_spill] sm:$0xff] }
 0x234   : > { %9910 = vmatprep.mubr.f32.mxu1 %v16134_v18  ;;  %10690 = vmatprep.mubr.f32.mxu0 %v16134_v18  ;;  %v16137_v18 = vld [vmem:[#allocation209_spill] sm:$0xff] }
 0x237   : > { %9911 = vmatmul.mubr.f32.gmra.mrb[104].mxu1 %v16135_v32  ;;  %10691 = vmatmul.mubr.f32.gmra.mrb[104].mxu0 %v16135_v32  ;;  %v16138_v32 = vld [vmem:[#allocation211_spill] sm:$0xff] }
 0x238   : > { %9913 = vmatprep.mubr.f32.mxu1 %v13451_v44  ;;  %10693 = vmatprep.mubr.f32.mxu0 %v13451_v44  ;;  %v16139_v44 = vld [vmem:[#allocation213_spill] sm:$0xff] }
 0x23b   : > { %9914 = vmatmul.mubr.f32.gmra.mrb[106].mxu1 %v13463_v26  ;;  %10694 = vmatmul.mubr.f32.gmra.mrb[106].mxu0 %v13463_v26  ;;  %v16140_v26 = vld [vmem:[#allocation215_spill] sm:$0xff] }
 0x23c   : > { %9916 = vmatprep.mubr.f32.mxu1 %v13470_v62  ;;  %10696 = vmatprep.mubr.f32.mxu0 %v13470_v62  ;;  %v16141_v62 = vld [vmem:[#allocation217_spill] sm:$0xff] }
 0x23f   : > { %9917 = vmatmul.mubr.f32.gmra.mrb[108].mxu1 %v16136_v11  ;;  %10697 = vmatmul.mubr.f32.gmra.mrb[108].mxu0 %v16136_v11  ;;  %v16142_v11 = vld [vmem:[#allocation219_spill] sm:$0xff] }
 0x240   : > { %9919 = vmatprep.mubr.f32.mxu1 %v16137_v18  ;;  %10699 = vmatprep.mubr.f32.mxu0 %v16137_v18  ;;  %v16143_v18 = vld [vmem:[#allocation221_spill] sm:$0xff] }
 0x243   : > { %9920 = vmatmul.mubr.f32.gmra.mrb[110].mxu1 %v16138_v32  ;;  %10700 = vmatmul.mubr.f32.gmra.mrb[110].mxu0 %v16138_v32  ;;  %v16144_v32 = vld [vmem:[#allocation222_spill] sm:$0xff] }
 0x244   : > { %9922 = vmatprep.mubr.f32.mxu1 %v16139_v44  ;;  %10702 = vmatprep.mubr.f32.mxu0 %v16139_v44  ;;  %v16145_v44 = vld [vmem:[#allocation224_spill] sm:$0xff] }
 0x247   : > { %9923 = vmatmul.mubr.f32.gmra.mrb[112].mxu1 %v16140_v26  ;;  %10703 = vmatmul.mubr.f32.gmra.mrb[112].mxu0 %v16140_v26  ;;  %v16146_v26 = vld [vmem:[#allocation227_spill] sm:$0xff] }
 0x248   : > { %9925 = vmatprep.mubr.f32.mxu1 %v16141_v62  ;;  %10705 = vmatprep.mubr.f32.mxu0 %v16141_v62  ;;  %v16147_v62 = vld [vmem:[#allocation229_spill] sm:$0xff] }
 0x24b   : > { %9926 = vmatmul.mubr.f32.gmra.mrb[114].mxu1 %v16142_v11  ;;  %10706 = vmatmul.mubr.f32.gmra.mrb[114].mxu0 %v16142_v11  ;;  %v16148_v11 = vld [vmem:[#allocation231_spill] sm:$0xff] }
 0x24c   : > { %9928 = vmatprep.mubr.f32.mxu1 %v16143_v18  ;;  %10708 = vmatprep.mubr.f32.mxu0 %v16143_v18  ;;  %v16149_v18 = vld [vmem:[#allocation233_spill] sm:$0xff] }
 0x24f   : > { %9929 = vmatmul.mubr.f32.gmra.mrb[116].mxu1 %v16144_v32  ;;  %10709 = vmatmul.mubr.f32.gmra.mrb[116].mxu0 %v16144_v32  ;;  %v16150_v32 = vld [vmem:[#allocation235_spill] sm:$0xff] }
 0x250   : > { %9931 = vmatprep.mubr.f32.mxu1 %v16145_v44  ;;  %10711 = vmatprep.mubr.f32.mxu0 %v16145_v44  ;;  %v16151_v44 = vld [vmem:[#allocation237_spill] sm:$0xff] }
 0x253   : > { %9932 = vmatmul.mubr.f32.gmra.mrb[118].mxu1 %v16146_v26  ;;  %10712 = vmatmul.mubr.f32.gmra.mrb[118].mxu0 %v16146_v26  ;;  %v16152_v26 = vld [vmem:[#allocation238_spill] sm:$0xff] }
 0x254   : > { %9934 = vmatprep.mubr.f32.mxu1 %v16147_v62  ;;  %10714 = vmatprep.mubr.f32.mxu0 %v16147_v62  ;;  %v16153_v62 = vld [vmem:[#allocation241_spill] sm:$0xff] }
 0x257   : > { %9935 = vmatmul.mubr.f32.gmra.mrb[120].mxu1 %v16148_v11  ;;  %10715 = vmatmul.mubr.f32.gmra.mrb[120].mxu0 %v16148_v11  ;;  %v16154_v11 = vld [vmem:[#allocation243_spill] sm:$0xff] }
 0x258   : > { %9937 = vmatprep.mubr.f32.mxu1 %v16149_v18  ;;  %10717 = vmatprep.mubr.f32.mxu0 %v16149_v18  ;;  %v16155_v18 = vld [vmem:[#allocation244_spill] sm:$0xff] }
 0x25b   : > { %9938 = vmatmul.mubr.f32.gmra.mrb[122].mxu1 %v16150_v32  ;;  %10718 = vmatmul.mubr.f32.gmra.mrb[122].mxu0 %v16150_v32  ;;  %v16156_v32 = vld [vmem:[#allocation247_spill] sm:$0xff] }
 0x25c   : > { %9940 = vmatprep.mubr.f32.mxu1 %v16151_v44  ;;  %10720 = vmatprep.mubr.f32.mxu0 %v16151_v44  ;;  %v16157_v44 = vld [vmem:[#allocation249_spill] sm:$0xff] }
 0x25f   : > { %9941 = vmatmul.mubr.f32.gmra.mrb[124].mxu1 %v16152_v26  ;;  %10721 = vmatmul.mubr.f32.gmra.mrb[124].mxu0 %v16152_v26  ;;  %v16158_v26 = vld [vmem:[#allocation251_spill] sm:$0xff] }
 0x260   : > { %9943 = vmatprep.mubr.f32.mxu1 %v16153_v62  ;;  %10723 = vmatprep.mubr.f32.mxu0 %v16153_v62 }
 0x263   : > { %9944 = vmatmul.mubr.f32.gmra.mrb[126].mxu1 %v16154_v11  ;;  %10724 = vmatmul.mubr.f32.gmra.mrb[126].mxu0 %v16154_v11  ;;  %v16159_v11 = vld [vmem:[#allocation255_spill] sm:$0xff] }
 0x264   : > { %9946 = vmatprep.mubr.f32.mxu1 %v16155_v18  ;;  %10726 = vmatprep.mubr.f32.mxu0 %v16155_v18  ;;  %v16160_v18 = vld [vmem:[#allocation256_spill] sm:$0xff] }
 0x267   : > { %9947 = vmatmul.mubr.f32.gmra.mrb[128].mxu1 %v16156_v32  ;;  %10727 = vmatmul.mubr.f32.gmra.mrb[128].mxu0 %v16156_v32  ;;  %v16161_v32 = vld [vmem:[#allocation259_spill] sm:$0xff] }
 0x268   : > { %9949 = vmatprep.mubr.f32.mxu1 %v16157_v44  ;;  %10729 = vmatprep.mubr.f32.mxu0 %v16157_v44  ;;  %v16162_v44 = vld [vmem:[#allocation261_spill] sm:$0xff] }
 0x26b   : > { %9950 = vmatmul.mubr.f32.gmra.mrb[130].mxu1 %v16158_v26  ;;  %10730 = vmatmul.mubr.f32.gmra.mrb[130].mxu0 %v16158_v26  ;;  %v16163_v26 = vld [vmem:[#allocation263_spill] sm:$0xff] }
 0x26c   : > { %9952 = vmatprep.mubr.f32.mxu1 %v13707_v48  ;;  %10732 = vmatprep.mubr.f32.mxu0 %v13707_v48  ;;  %v16164_v48 = vld [vmem:[#allocation264_spill] sm:$0xff] }
 0x26f   : > { %9953 = vmatmul.mubr.f32.gmra.mrb[132].mxu1 %v16159_v11  ;;  %10733 = vmatmul.mubr.f32.gmra.mrb[132].mxu0 %v16159_v11  ;;  %v16165_v11 = vld [vmem:[#allocation266_spill] sm:$0xff] }
 0x270   : > { %9955 = vmatprep.mubr.f32.mxu1 %v16160_v18  ;;  %10735 = vmatprep.mubr.f32.mxu0 %v16160_v18  ;;  %v16166_v18 = vld [vmem:[#allocation269_spill] sm:$0xff] }
 0x273   : > { %9956 = vmatmul.mubr.f32.gmra.mrb[134].mxu1 %v16161_v32  ;;  %10736 = vmatmul.mubr.f32.gmra.mrb[134].mxu0 %v16161_v32  ;;  %v16167_v32 = vld [vmem:[#allocation271_spill] sm:$0xff] }
 0x274   : > { %9958 = vmatprep.mubr.f32.mxu1 %v16162_v44  ;;  %10738 = vmatprep.mubr.f32.mxu0 %v16162_v44  ;;  %v16168_v44 = vld [vmem:[#allocation272_spill] sm:$0xff] }
 0x277   : > { %9959 = vmatmul.mubr.f32.gmra.mrb[136].mxu1 %v16163_v26  ;;  %10739 = vmatmul.mubr.f32.gmra.mrb[136].mxu0 %v16163_v26  ;;  %v16169_v26 = vld [vmem:[#allocation276_spill] sm:$0xff] }
 0x278   : > { %9961 = vmatprep.mubr.f32.mxu1 %v16164_v48  ;;  %10741 = vmatprep.mubr.f32.mxu0 %v16164_v48  ;;  %v16170_v48 = vld [vmem:[#allocation277_spill] sm:$0xff] }
 0x27b   : > { %9962 = vmatmul.mubr.f32.gmra.mrb[138].mxu1 %v16165_v11  ;;  %10742 = vmatmul.mubr.f32.gmra.mrb[138].mxu0 %v16165_v11  ;;  %v16171_v11 = vld [vmem:[#allocation279_spill] sm:$0xff] }
 0x27c   : > { %9964 = vmatprep.mubr.f32.mxu1 %v16166_v18  ;;  %10744 = vmatprep.mubr.f32.mxu0 %v16166_v18  ;;  %v16172_v18 = vld [vmem:[#allocation281_spill] sm:$0xff] }
 0x27f   : > { %9965 = vmatmul.mubr.f32.gmra.mrb[140].mxu1 %v16167_v32  ;;  %10745 = vmatmul.mubr.f32.gmra.mrb[140].mxu0 %v16167_v32  ;;  %v16173_v32 = vld [vmem:[#allocation283_spill] sm:$0xff] }
 0x280   : > { %9967 = vmatprep.mubr.f32.mxu1 %v16168_v44  ;;  %10747 = vmatprep.mubr.f32.mxu0 %v16168_v44  ;;  %v16174_v44 = vld [vmem:[#allocation285_spill] sm:$0xff] }
 0x283   : > { %9968 = vmatmul.mubr.f32.gmra.mrb[142].mxu1 %v16169_v26  ;;  %10748 = vmatmul.mubr.f32.gmra.mrb[142].mxu0 %v16169_v26  ;;  %v16175_v26 = vld [vmem:[#allocation286_spill] sm:$0xff] }
 0x284   : > { %9970 = vmatprep.mubr.f32.mxu1 %v16170_v48  ;;  %10750 = vmatprep.mubr.f32.mxu0 %v16170_v48  ;;  %v16176_v48 = vld [vmem:[#allocation287_spill] sm:$0xff] }
 0x287   : > { %9971 = vmatmul.mubr.f32.gmra.mrb[144].mxu1 %v16171_v11  ;;  %10751 = vmatmul.mubr.f32.gmra.mrb[144].mxu0 %v16171_v11  ;;  %v16177_v11 = vld [vmem:[#allocation292_spill] sm:$0xff] }
 0x288   : > { %9973 = vmatprep.mubr.f32.mxu1 %v16172_v18  ;;  %10753 = vmatprep.mubr.f32.mxu0 %v16172_v18  ;;  %v16178_v18 = vld [vmem:[#allocation293_spill] sm:$0xff] }
 0x28b   : > { %9974 = vmatmul.mubr.f32.gmra.mrb[146].mxu1 %v16173_v32  ;;  %10754 = vmatmul.mubr.f32.gmra.mrb[146].mxu0 %v16173_v32 }
 0x28c   : > { %9976 = vmatprep.mubr.f32.mxu1 %v16174_v44  ;;  %10756 = vmatprep.mubr.f32.mxu0 %v16174_v44 }
 0x28f   : > { %9977 = vmatmul.mubr.f32.gmra.mrb[148].mxu1 %v16175_v26  ;;  %10757 = vmatmul.mubr.f32.gmra.mrb[148].mxu0 %v16175_v26 }
 0x290   : > { %9979 = vmatprep.mubr.f32.mxu1 %v16176_v48  ;;  %10759 = vmatprep.mubr.f32.mxu0 %v16176_v48 }
 0x293   : > { %9980 = vmatmul.mubr.f32.gmra.mrb[150].mxu1 %v16177_v11  ;;  %10760 = vmatmul.mubr.f32.gmra.mrb[150].mxu0 %v16177_v11 }
 0x294   : > { %9982 = vmatprep.mubr.f32.mxu1 %v16178_v18  ;;  %10762 = vmatprep.mubr.f32.mxu0 %v16178_v18 }
 0x297   : > { %9983 = vmatmul.mubr.f32.gmra.mrb[152].mxu1 %v13901_v31  ;;  %10763 = vmatmul.mubr.f32.gmra.mrb[152].mxu0 %v13901_v31 }
 0x298   : > { %9985 = vmatprep.mubr.f32.mxu1 %v13904_v5  ;;  %10765 = vmatprep.mubr.f32.mxu0 %v13904_v5  ;;  %v16179_v5 = vld [vmem:[#allocation3_spill] sm:$0xff] }
 0x29b   : > { %9986 = vmatmul.mubr.f32.gmra.mrb[154].mxu1 %v13917_v14  ;;  %10766 = vmatmul.mubr.f32.gmra.mrb[154].mxu0 %v13917_v14  ;;  %v16180_v14 = vld [vmem:[#allocation4_spill] sm:$0xff] }
 0x29c   : > { %9988 = vmatprep.mubr.f32.mxu1 %v13922_v50  ;;  %10768 = vmatprep.mubr.f32.mxu0 %v13922_v50  ;;  %v16181_v50 = vld [vmem:[#allocation5_spill] sm:$0xff] }
 0x29f   : > { %9989 = vmatmul.mubr.f32.gmra.mrb[156].mxu1 %v13933_v59  ;;  %10769 = vmatmul.mubr.f32.gmra.mrb[156].mxu0 %v13933_v59  ;;  %v16182_v59 = vld [vmem:[#allocation6_spill] sm:$0xff] }
 0x2a0   : > { %9991 = vmatprep.mubr.f32.mxu1 %v13939_v6  ;;  %10771 = vmatprep.mubr.f32.mxu0 %v13939_v6  ;;  %v16183_v6 = vld [vmem:[#allocation7_spill] sm:$0xff] }
 0x2a3   : > { %9992 = vmatmul.mubr.f32.gmra.mrb[158].mxu1 %v13947_v7  ;;  %10772 = vmatmul.mubr.f32.gmra.mrb[158].mxu0 %v13947_v7  ;;  %v16184_v7 = vld [vmem:[#allocation8_spill] sm:$0xff] }
 0x2a4   : > { %10014 = vmatprep.mubr.f32.mxu1 %v16179_v5  ;;  %10794 = vmatprep.mubr.f32.mxu0 %v12289_v39  ;;  %v16185_v39 = vld [vmem:[#allocation9_spill] sm:$0xff]  ;;  %v16198_v5 = vld [vmem:[#allocation31_spill] sm:$0xff] }
 0x2a7   : > { %10015 = vmatmul.mubr.f32.vlgmr.msra.gmra.mrb[0].mxu1 %v16180_v14  ;;  %10795 = vmatmul.mubr.f32.vlgmr.msra.gmra.mrb[0].mxu0 %v12291_v40  ;;  %v16186_v40 = vld [vmem:[#allocation10_spill] sm:$0xff] }
 0x2a8   : > { %10017 = vmatprep.mubr.f32.mxu1 %v16181_v50  ;;  %10797 = vmatprep.mubr.f32.mxu0 %v12294_v42  ;;  %v16187_v42 = vld [vmem:[#allocation11_spill] sm:$0xff]  ;;  %v16199_v50 = vld [vmem:[#allocation33_spill] sm:$0xff]  ;;  %v16200_v14 = vld [vmem:[#allocation34_spill] sm:$0xff] }
 0x2ab   : > { %10018 = vmatmul.mubr.f32.gmra.mrb[2].mxu1 %v16182_v59  ;;  %10798 = vmatmul.mubr.f32.gmra.mrb[2].mxu0 %v12314_v54  ;;  %v16188_v54 = vld [vmem:[#allocation12_spill] sm:$0xff] }
 0x2ac   : > { %10020 = vmatprep.mubr.f32.mxu1 %v16183_v6  ;;  %10800 = vmatprep.mubr.f32.mxu0 %v12316_v55  ;;  %v16189_v55 = vld [vmem:[#allocation13_spill] sm:$0xff]  ;;  %v16201_v59 = vld [vmem:[#allocation36_spill] sm:$0xff]  ;;  %v16202_v6 = vld [vmem:[#allocation38_spill] sm:$0xff] }
 0x2af   : > { %10021 = vmatmul.mubr.f32.gmra.mrb[4].mxu1 %v16184_v7  ;;  %10801 = vmatmul.mubr.f32.gmra.mrb[4].mxu0 %v12318_v56  ;;  %v16190_v56 = vld [vmem:[#allocation16_spill] sm:$0xff]  ;;  %v16203_v7 = vld [vmem:[#allocation41_spill] sm:$0xff] }
 0x2b0   : > { %10023 = vmatprep.mubr.f32.mxu1 %v16185_v39  ;;  %10803 = vmatprep.mubr.f32.mxu0 %v12320_v57  ;;  %v16191_v57 = vld [vmem:[#allocation17_spill] sm:$0xff] }
 0x2b1   : > { %v16236_v39 = vld [vmem:[#allocation93_spill] sm:$0xff] }
 0x2b3   : > { %10024 = vmatmul.mubr.f32.gmra.mrb[6].mxu1 %v16186_v40  ;;  %10804 = vmatmul.mubr.f32.gmra.mrb[6].mxu0 %v12342_v27  ;;  %v16192_v27 = vld [vmem:[#allocation18_spill] sm:$0xff] }
 0x2b4   : > { %10026 = vmatprep.mubr.f32.mxu1 %v16187_v42  ;;  %10806 = vmatprep.mubr.f32.mxu0 %v12382_v35  ;;  %v16193_v35 = vld [vmem:[#allocation19_spill] sm:$0xff]  ;;  %v16237_v40 = vld [vmem:[#allocation90_spill] sm:$0xff] }
 0x2b5   : > { %v16238_v42 = vld [vmem:[#allocation94_spill] sm:$0xff] }
 0x2b7   : > { %10027 = vmatmul.mubr.f32.gmra.mrb[8].mxu1 %v16188_v54  ;;  %10807 = vmatmul.mubr.f32.gmra.mrb[8].mxu0 %v12384_v36  ;;  %v16194_v36 = vld [vmem:[#allocation22_spill] sm:$0xff]  ;;  %v16239_v54 = vld [vmem:[#allocation91_spill] sm:$0xff] }
 0x2b8   : > { %10029 = vmatprep.mubr.f32.mxu1 %v16189_v55  ;;  %10809 = vmatprep.mubr.f32.mxu0 %v12386_v29  ;;  %v16195_v29 = vld [vmem:[#allocation25_spill] sm:$0xff] }
 0x2b9   : > { %v16240_v55 = vld [vmem:[#allocation97_spill] sm:$0xff] }
 0x2bb   : > { %10030 = vmatmul.mubr.f32.gmra.mrb[10].mxu1 %v16190_v56  ;;  %10810 = vmatmul.mubr.f32.gmra.mrb[10].mxu0 %v12402_v9  ;;  %v16196_v9 = vld [vmem:[#allocation27_spill] sm:$0xff] }
 0x2bc   : > { %10032 = vmatprep.mubr.f32.mxu1 %v16191_v57  ;;  %10812 = vmatprep.mubr.f32.mxu0 %v12404_v47  ;;  %v16197_v47 = vld [vmem:[#allocation28_spill] sm:$0xff]  ;;  %v16241_v56 = vld [vmem:[#allocation95_spill] sm:$0xff] }
 0x2bd   : > { %v16242_v57 = vld [vmem:[#allocation99_spill] sm:$0xff] }
 0x2bf   : > { %10033 = vmatmul.mubr.f32.gmra.mrb[12].mxu1 %v16192_v27  ;;  %10813 = vmatmul.mubr.f32.gmra.mrb[12].mxu0 %v16044_v12  ;;  %v16204_v12 = vld [vmem:[#allocation42_spill] sm:$0xff]  ;;  %v16243_v27 = vld [vmem:[#allocation96_spill] sm:$0xff] }
 0x2c0   : > { %10035 = vmatprep.mubr.f32.mxu1 %v16193_v35  ;;  %10815 = vmatprep.mubr.f32.mxu0 %v16045_v17  ;;  %v16205_v17 = vld [vmem:[#allocation43_spill] sm:$0xff]  ;;  %v16244_v35 = vld [vmem:[#allocation102_spill] sm:$0xff] }
 0x2c3   : > { %10036 = vmatmul.mubr.f32.gmra.mrb[14].mxu1 %v16194_v36  ;;  %10816 = vmatmul.mubr.f32.gmra.mrb[14].mxu0 %v16046_v25  ;;  %v16206_v25 = vld [vmem:[#allocation47_spill] sm:$0xff]  ;;  %v16245_v36 = vld [vmem:[#allocation98_spill] sm:$0xff] }
 0x2c4   : > { %10038 = vmatprep.mubr.f32.mxu1 %v16195_v29  ;;  %10818 = vmatprep.mubr.f32.mxu0 %v16047_v28  ;;  %v16207_v28 = vld [vmem:[#allocation48_spill] sm:$0xff]  ;;  %v16246_v29 = vld [vmem:[#allocation103_spill] sm:$0xff] }
 0x2c7   : > { %10039 = vmatmul.mubr.f32.gmra.mrb[16].mxu1 %v16196_v9  ;;  %10819 = vmatmul.mubr.f32.gmra.mrb[16].mxu0 %v16048_v33  ;;  %v16208_v33 = vld [vmem:[#allocation49_spill] sm:$0xff]  ;;  %v16247_v9 = vld [vmem:[#allocation100_spill] sm:$0xff] }
 0x2c8   : > { %10041 = vmatprep.mubr.f32.mxu1 %v16197_v47  ;;  %10821 = vmatprep.mubr.f32.mxu0 %v16049_v22  ;;  %v16209_v22 = vld [vmem:[#allocation50_spill] sm:$0xff]  ;;  %v16248_v47 = vld [vmem:[#allocation105_spill] sm:$0xff] }
 0x2cb   : > { %10042 = vmatmul.mubr.f32.gmra.mrb[18].mxu1 %v16198_v5  ;;  %10822 = vmatmul.mubr.f32.gmra.mrb[18].mxu0 %v16050_v30  ;;  %v16210_v30 = vld [vmem:[#allocation53_spill] sm:$0xff] }
 0x2cc   : > { %10044 = vmatprep.mubr.f32.mxu1 %v16199_v50  ;;  %10824 = vmatprep.mubr.f32.mxu0 %v16051_v20  ;;  %v16211_v20 = vld [vmem:[#allocation55_spill] sm:$0xff]  ;;  %v16249_v5 = vld [vmem:[#allocation101_spill] sm:$0xff]  ;;  %v16250_v50 = vld [vmem:[#allocation108_spill] sm:$0xff] }
 0x2cf   : > { %10045 = vmatmul.mubr.f32.gmra.mrb[20].mxu1 %v16200_v14  ;;  %10825 = vmatmul.mubr.f32.gmra.mrb[20].mxu0 %v16052_v19  ;;  %v16213_v19 = vld [vmem:[#allocation60_spill] sm:$0xff] }
 0x2d0   : > { %10047 = vmatprep.mubr.f32.mxu1 %v16201_v59  ;;  %10827 = vmatprep.mubr.f32.mxu0 %v16053_v15  ;;  %v16214_v15 = vld [vmem:[#allocation62_spill] sm:$0xff]  ;;  %v16251_v14 = vld [vmem:[#allocation104_spill] sm:$0xff]  ;;  %v16252_v59 = vld [vmem:[#allocation109_spill] sm:$0xff] }
 0x2d3   : > { %10048 = vmatmul.mubr.f32.gmra.mrb[22].mxu1 %v16202_v6  ;;  %10828 = vmatmul.mubr.f32.gmra.mrb[22].mxu0 %v16054_v45  ;;  %v16215_v45 = vld [vmem:[#allocation63_spill] sm:$0xff]  ;;  %v16253_v6 = vld [vmem:[#allocation106_spill] sm:$0xff] }
 0x2d4   : > { %10050 = vmatprep.mubr.f32.mxu1 %v16203_v7  ;;  %10830 = vmatprep.mubr.f32.mxu0 %v16055_v23  ;;  %v16216_v23 = vld [vmem:[#allocation65_spill] sm:$0xff]  ;;  %v16254_v7 = vld [vmem:[#allocation110_spill] sm:$0xff] }
 0x2d7   : > { %10051 = vmatmul.mubr.f32.gmra.mrb[24].mxu1 %v16204_v12  ;;  %10831 = vmatmul.mubr.f32.gmra.mrb[24].mxu0 %v16056_v61  ;;  %v16217_v61 = vld [vmem:[#allocation66_spill] sm:$0xff]  ;;  %v16255_v12 = vld [vmem:[#allocation107_spill] sm:$0xff] }
 0x2d8   : > { %10053 = vmatprep.mubr.f32.mxu1 %v16205_v17  ;;  %10833 = vmatprep.mubr.f32.mxu0 %v16057_v1  ;;  %v16218_v1 = vld [vmem:[#allocation70_spill] sm:$0xff]  ;;  %v16256_v17 = vld [vmem:[#allocation113_spill] sm:$0xff] }
 0x2db   : > { %10054 = vmatmul.mubr.f32.gmra.mrb[26].mxu1 %v16206_v25  ;;  %10834 = vmatmul.mubr.f32.gmra.mrb[26].mxu0 %v12574_v38  ;;  %v16212_v38 = vld [vmem:[#allocation59_spill] sm:$0xff] }
 0x2dc   : > { %10056 = vmatprep.mubr.f32.mxu1 %v16207_v28  ;;  %10836 = vmatprep.mubr.f32.mxu0 %v16058_v2  ;;  %v16219_v2 = vld [vmem:[#allocation71_spill] sm:$0xff]  ;;  %v16258_v28 = vld [vmem:[#allocation114_spill] sm:$0xff] }
 0x2dd   : > { %v16257_v25 = vld [vmem:[#allocation111_spill] sm:$0xff] }
 0x2df   : > { %10057 = vmatmul.mubr.f32.gmra.mrb[28].mxu1 %v16208_v33  ;;  %10837 = vmatmul.mubr.f32.gmra.mrb[28].mxu0 %v16059_v10  ;;  %v16220_v10 = vld [vmem:[#allocation73_spill] sm:$0xff]  ;;  %v16259_v33 = vld [vmem:[#allocation112_spill] sm:$0xff] }
 0x2e0   : > { %10059 = vmatprep.mubr.f32.mxu1 %v16209_v22  ;;  %10839 = vmatprep.mubr.f32.mxu0 %v16060_v41  ;;  %v16221_v41 = vld [vmem:[#allocation76_spill] sm:$0xff]  ;;  %v16260_v22 = vld [vmem:[#allocation117_spill] sm:$0xff] }
 0x2e3   : > { %10060 = vmatmul.mubr.f32.gmra.mrb[30].mxu1 %v16210_v30  ;;  %10840 = vmatmul.mubr.f32.gmra.mrb[30].mxu0 %v16061_v21  ;;  %v16222_v21 = vld [vmem:[#allocation77_spill] sm:$0xff]  ;;  %v16261_v30 = vld [vmem:[#allocation115_spill] sm:$0xff] }
 0x2e4   : > { %10062 = vmatprep.mubr.f32.mxu1 %v16211_v20  ;;  %10842 = vmatprep.mubr.f32.mxu0 %v16062_v0  ;;  %v16223_v0 = vld [vmem:[#allocation81_spill] sm:$0xff]  ;;  %v16262_v20 = vld [vmem:[#allocation119_spill] sm:$0xff] }
 0x2e7   : > { %10063 = vmatmul.mubr.f32.gmra.mrb[32].mxu1 %v16212_v38  ;;  %10843 = vmatmul.mubr.f32.gmra.mrb[32].mxu0 %v16063_v3  ;;  %v16224_v3 = vld [vmem:[#allocation82_spill] sm:$0xff]  ;;  %v16263_v38 = vld [vmem:[#allocation116_spill] sm:$0xff] }
 0x2e8   : > { %10065 = vmatprep.mubr.f32.mxu1 %v16213_v19  ;;  %10845 = vmatprep.mubr.f32.mxu0 %v16064_v43  ;;  %v16225_v43 = vld [vmem:[#allocation78_spill] sm:$0xff] }
 0x2e9   : > { %v16264_v19 = vld [vmem:[#allocation122_spill] sm:$0xff] }
 0x2eb   : > { %10066 = vmatmul.mubr.f32.gmra.mrb[34].mxu1 %v16214_v15  ;;  %10846 = vmatmul.mubr.f32.gmra.mrb[34].mxu0 %v16065_v34  ;;  %v16226_v34 = vld [vmem:[#allocation83_spill] sm:$0xff]  ;;  %v16265_v15 = vld [vmem:[#allocation118_spill] sm:$0xff] }
 0x2ec   : > { %10068 = vmatprep.mubr.f32.mxu1 %v16215_v45  ;;  %10848 = vmatprep.mubr.f32.mxu0 %v16066_v46  ;;  %v16227_v46 = vld [vmem:[#allocation79_spill] sm:$0xff] }
 0x2ed   : > { %v16266_v45 = vld [vmem:[#allocation123_spill] sm:$0xff] }
 0x2ef   : > { %10069 = vmatmul.mubr.f32.gmra.mrb[36].mxu1 %v16216_v23  ;;  %10849 = vmatmul.mubr.f32.gmra.mrb[36].mxu0 %v16067_v51  ;;  %v16228_v51 = vld [vmem:[#allocation84_spill] sm:$0xff]  ;;  %v16267_v23 = vld [vmem:[#allocation125_spill] sm:$0xff] }
 0x2f0   : > { %10071 = vmatprep.mubr.f32.mxu1 %v16217_v61  ;;  %10851 = vmatprep.mubr.f32.mxu0 %v16068_v37  ;;  %v16229_v37 = vld [vmem:[#allocation80_spill] sm:$0xff] }
 0x2f1   : > { %v16268_v61 = vld [vmem:[#allocation128_spill] sm:$0xff] }
 0x2f3   : > { %10072 = vmatmul.mubr.f32.gmra.mrb[38].mxu1 %v16218_v1  ;;  %10852 = vmatmul.mubr.f32.gmra.mrb[38].mxu0 %v16069_v13  ;;  %v16230_v13 = vld [vmem:[#allocation87_spill] sm:$0xff]  ;;  %v16269_v1 = vld [vmem:[#allocation124_spill] sm:$0xff] }
 0x2f4   : > { %10074 = vmatprep.mubr.f32.mxu1 %v16219_v2  ;;  %10854 = vmatprep.mubr.f32.mxu0 %v16070_v4  ;;  %v16231_v4 = vld [vmem:[#allocation85_spill] sm:$0xff]  ;;  %v16270_v2 = vld [vmem:[#allocation130_spill] sm:$0xff] }
 0x2f7   : > { %10075 = vmatmul.mubr.f32.gmra.mrb[40].mxu1 %v16220_v10  ;;  %10855 = vmatmul.mubr.f32.gmra.mrb[40].mxu0 %v16071_v16  ;;  %v16232_v16 = vld [vmem:[#allocation89_spill] sm:$0xff]  ;;  %v16271_v10 = vld [vmem:[#allocation126_spill] sm:$0xff] }
 0x2f8   : > { %10077 = vmatprep.mubr.f32.mxu1 %v16221_v41  ;;  %10857 = vmatprep.mubr.f32.mxu0 %v16072_v60  ;;  %v16233_v60 = vld [vmem:[#allocation86_spill] sm:$0xff]  ;;  %v16272_v41 = vld [vmem:[#allocation131_spill] sm:$0xff] }
 0x2fb   : > { %10078 = vmatmul.mubr.f32.gmra.mrb[42].mxu1 %v16222_v21  ;;  %10858 = vmatmul.mubr.f32.gmra.mrb[42].mxu0 %v16073_v8  ;;  %v16235_v8 = vld [vmem:[#allocation88_spill] sm:$0xff]  ;;  %v16273_v21 = vld [vmem:[#allocation127_spill] sm:$0xff] }
 0x2fc   : > { %10080 = vmatprep.mubr.f32.mxu1 %v16223_v0  ;;  %10860 = vmatprep.mubr.f32.mxu0 %v16074_v49  ;;  %v16234_v49 = vld [vmem:[#allocation92_spill] sm:$0xff]  ;;  %v16274_v0 = vld [vmem:[#allocation133_spill] sm:$0xff] }
 0x2ff   : > { %10081 = vmatmul.mubr.f32.gmra.mrb[44].mxu1 %v16224_v3  ;;  %10861 = vmatmul.mubr.f32.gmra.mrb[44].mxu0 %v16225_v43  ;;  %v16275_v3 = vld [vmem:[#allocation129_spill] sm:$0xff]  ;;  %v16277_v43 = vld [vmem:[#allocation132_spill] sm:$0xff] }
 0x300   : > { %10083 = vmatprep.mubr.f32.mxu1 %v16226_v34  ;;  %10863 = vmatprep.mubr.f32.mxu0 %v16227_v46  ;;  %v16279_v34 = vld [vmem:[#allocation134_spill] sm:$0xff]  ;;  %v16280_v46 = vld [vmem:[#allocation140_spill] sm:$0xff] }
 0x303   : > { %10084 = vmatmul.mubr.f32.gmra.mrb[46].mxu1 %v16228_v51  ;;  %10864 = vmatmul.mubr.f32.gmra.mrb[46].mxu0 %v16229_v37  ;;  %v16281_v51 = vld [vmem:[#allocation136_spill] sm:$0xff]  ;;  %v16282_v37 = vld [vmem:[#allocation141_spill] sm:$0xff] }
 0x304   : > { %10086 = vmatprep.mubr.f32.mxu1 %v16230_v13  ;;  %10866 = vmatprep.mubr.f32.mxu0 %v16231_v4  ;;  %v16283_v13 = vld [vmem:[#allocation138_spill] sm:$0xff]  ;;  %v16284_v4 = vld [vmem:[#allocation143_spill] sm:$0xff] }
 0x307   : > { %10087 = vmatmul.mubr.f32.gmra.mrb[48].mxu1 %v16232_v16  ;;  %10867 = vmatmul.mubr.f32.gmra.mrb[48].mxu0 %v16233_v60  ;;  %v16285_v16 = vld [vmem:[#allocation139_spill] sm:$0xff]  ;;  %v16286_v60 = vld [vmem:[#allocation146_spill] sm:$0xff] }
 0x308   : > { %10089 = vmatprep.mubr.f32.mxu1 %v16234_v49  ;;  %10869 = vmatprep.mubr.f32.mxu0 %v16235_v8  ;;  %v16287_v49 = vld [vmem:[#allocation142_spill] sm:$0xff]  ;;  %v16288_v8 = vld [vmem:[#allocation147_spill] sm:$0xff] }
 0x30b   : > { %10090 = vmatmul.mubr.f32.gmra.mrb[50].mxu1 %v16236_v39  ;;  %10870 = vmatmul.mubr.f32.gmra.mrb[50].mxu0 %v16237_v40  ;;  %v16289_v39 = vld [vmem:[#allocation144_spill] sm:$0xff]  ;;  %v16290_v40 = vld [vmem:[#allocation150_spill] sm:$0xff] }
 0x30c   : > { %10092 = vmatprep.mubr.f32.mxu1 %v16238_v42  ;;  %10872 = vmatprep.mubr.f32.mxu0 %v16239_v54  ;;  %v16291_v42 = vld [vmem:[#allocation145_spill] sm:$0xff]  ;;  %v16292_v54 = vld [vmem:[#allocation151_spill] sm:$0xff] }
 0x30f   : > { %10093 = vmatmul.mubr.f32.gmra.mrb[52].mxu1 %v16240_v55  ;;  %10873 = vmatmul.mubr.f32.gmra.mrb[52].mxu0 %v16241_v56  ;;  %v16293_v55 = vld [vmem:[#allocation148_spill] sm:$0xff]  ;;  %v16294_v56 = vld [vmem:[#allocation153_spill] sm:$0xff] }
 0x310   : > { %10095 = vmatprep.mubr.f32.mxu1 %v16242_v57  ;;  %10875 = vmatprep.mubr.f32.mxu0 %v16243_v27  ;;  %v16295_v57 = vld [vmem:[#allocation149_spill] sm:$0xff]  ;;  %v16296_v27 = vld [vmem:[#allocation155_spill] sm:$0xff] }
 0x313   : > { %10096 = vmatmul.mubr.f32.gmra.mrb[54].mxu1 %v16244_v35  ;;  %10876 = vmatmul.mubr.f32.gmra.mrb[54].mxu0 %v16245_v36  ;;  %v16297_v35 = vld [vmem:[#allocation152_spill] sm:$0xff]  ;;  %v16298_v36 = vld [vmem:[#allocation157_spill] sm:$0xff] }
 0x314   : > { %10098 = vmatprep.mubr.f32.mxu1 %v16246_v29  ;;  %10878 = vmatprep.mubr.f32.mxu0 %v16247_v9  ;;  %v16299_v29 = vld [vmem:[#allocation154_spill] sm:$0xff]  ;;  %v16300_v9 = vld [vmem:[#allocation160_spill] sm:$0xff] }
 0x317   : > { %10099 = vmatmul.mubr.f32.gmra.mrb[56].mxu1 %v16248_v47  ;;  %10879 = vmatmul.mubr.f32.gmra.mrb[56].mxu0 %v16249_v5  ;;  %v16301_v47 = vld [vmem:[#allocation156_spill] sm:$0xff]  ;;  %v16302_v5 = vld [vmem:[#allocation162_spill] sm:$0xff] }
 0x318   : > { %10101 = vmatprep.mubr.f32.mxu1 %v16250_v50  ;;  %10881 = vmatprep.mubr.f32.mxu0 %v16251_v14  ;;  %v16303_v50 = vld [vmem:[#allocation158_spill] sm:$0xff]  ;;  %v16304_v14 = vld [vmem:[#allocation163_spill] sm:$0xff] }
 0x31b   : > { %10102 = vmatmul.mubr.f32.gmra.mrb[58].mxu1 %v16252_v59  ;;  %10882 = vmatmul.mubr.f32.gmra.mrb[58].mxu0 %v16253_v6  ;;  %v16305_v59 = vld [vmem:[#allocation159_spill] sm:$0xff]  ;;  %v16306_v6 = vld [vmem:[#allocation165_spill] sm:$0xff] }
 0x31c   : > { %10104 = vmatprep.mubr.f32.mxu1 %v16254_v7  ;;  %10884 = vmatprep.mubr.f32.mxu0 %v16255_v12  ;;  %v16307_v7 = vld [vmem:[#allocation161_spill] sm:$0xff]  ;;  %v16308_v12 = vld [vmem:[#allocation168_spill] sm:$0xff] }
 0x31f   : > { %10105 = vmatmul.mubr.f32.gmra.mrb[60].mxu1 %v16256_v17  ;;  %10885 = vmatmul.mubr.f32.gmra.mrb[60].mxu0 %v16257_v25  ;;  %v16309_v17 = vld [vmem:[#allocation164_spill] sm:$0xff]  ;;  %v16310_v25 = vld [vmem:[#allocation169_spill] sm:$0xff] }
 0x320   : > { %10107 = vmatprep.mubr.f32.mxu1 %v16258_v28  ;;  %10887 = vmatprep.mubr.f32.mxu0 %v16259_v33  ;;  %v16311_v28 = vld [vmem:[#allocation166_spill] sm:$0xff] }
 0x321   : > { %v16312_v33 = vld [vmem:[#allocation170_spill] sm:$0xff] }
 0x323   : > { %10108 = vmatmul.mubr.f32.gmra.mrb[62].mxu1 %v16260_v22  ;;  %10888 = vmatmul.mubr.f32.gmra.mrb[62].mxu0 %v16261_v30  ;;  %v16313_v22 = vld [vmem:[#allocation167_spill] sm:$0xff]  ;;  %v16314_v30 = vld [vmem:[#allocation173_spill] sm:$0xff] }
 0x324   : > { %10110 = vmatprep.mubr.f32.mxu1 %v16262_v20  ;;  %10890 = vmatprep.mubr.f32.mxu0 %v16263_v38  ;;  %v16315_v20 = vld [vmem:[#allocation171_spill] sm:$0xff] }
 0x325   : > { %v16316_v38 = vld [vmem:[#allocation175_spill] sm:$0xff] }
 0x327   : > { %10111 = vmatmul.mubr.f32.gmra.mrb[64].mxu1 %v16264_v19  ;;  %10891 = vmatmul.mubr.f32.gmra.mrb[64].mxu0 %v16265_v15  ;;  %v16317_v19 = vld [vmem:[#allocation172_spill] sm:$0xff]  ;;  %v16318_v15 = vld [vmem:[#allocation177_spill] sm:$0xff] }
 0x328   : > { %10113 = vmatprep.mubr.f32.mxu1 %v16266_v45  ;;  %10893 = vmatprep.mubr.f32.mxu0 %v16096_v53  ;;  %v16276_v53 = vld [vmem:[#allocation135_spill] sm:$0xff]  ;;  %v16319_v45 = vld [vmem:[#allocation174_spill] sm:$0xff] }
 0x32b   : > { %10114 = vmatmul.mubr.f32.gmra.mrb[66].mxu1 %v16267_v23  ;;  %10894 = vmatmul.mubr.f32.gmra.mrb[66].mxu0 %v16097_v58  ;;  %v16278_v58 = vld [vmem:[#allocation137_spill] sm:$0xff]  ;;  %v16320_v23 = vld [vmem:[#allocation180_spill] sm:$0xff] }
 0x32c   : > { %10116 = vmatprep.mubr.f32.mxu1 %v16268_v61  ;;  %10896 = vmatprep.mubr.f32.mxu0 %v16269_v1  ;;  %v16321_v61 = vld [vmem:[#allocation176_spill] sm:$0xff]  ;;  %v16322_v1 = vld [vmem:[#allocation183_spill] sm:$0xff] }
 0x32f   : > { %10117 = vmatmul.mubr.f32.gmra.mrb[68].mxu1 %v16270_v2  ;;  %10897 = vmatmul.mubr.f32.gmra.mrb[68].mxu0 %v16271_v10  ;;  %v16323_v2 = vld [vmem:[#allocation178_spill] sm:$0xff]  ;;  %v16324_v10 = vld [vmem:[#allocation184_spill] sm:$0xff] }
 0x330   : > { %10119 = vmatprep.mubr.f32.mxu1 %v16272_v41  ;;  %10899 = vmatprep.mubr.f32.mxu0 %v16273_v21  ;;  %v16325_v41 = vld [vmem:[#allocation179_spill] sm:$0xff]  ;;  %v16326_v21 = vld [vmem:[#allocation185_spill] sm:$0xff] }
 0x333   : > { %10120 = vmatmul.mubr.f32.gmra.mrb[70].mxu1 %v16274_v0  ;;  %10900 = vmatmul.mubr.f32.gmra.mrb[70].mxu0 %v16275_v3  ;;  %v16327_v0 = vld [vmem:[#allocation181_spill] sm:$0xff]  ;;  %v16328_v3 = vld [vmem:[#allocation187_spill] sm:$0xff] }
 0x334   : > { %10122 = vmatprep.mubr.f32.mxu1 %v16276_v53  ;;  %10902 = vmatprep.mubr.f32.mxu0 %v16277_v43  ;;  %v16329_v53 = vld [vmem:[#allocation182_spill] sm:$0xff]  ;;  %v16330_v43 = vld [vmem:[#allocation189_spill] sm:$0xff] }
 0x337   : > { %10123 = vmatmul.mubr.f32.gmra.mrb[72].mxu1 %v16278_v58  ;;  %10903 = vmatmul.mubr.f32.gmra.mrb[72].mxu0 %v16279_v34  ;;  %v16331_v58 = vld [vmem:[#allocation186_spill] sm:$0xff]  ;;  %v16332_v34 = vld [vmem:[#allocation192_spill] sm:$0xff] }
 0x338   : > { %10125 = vmatprep.mubr.f32.mxu1 %v16280_v46  ;;  %10905 = vmatprep.mubr.f32.mxu0 %v16281_v51  ;;  %v16333_v46 = vld [vmem:[#allocation193_spill] sm:$0xff]  ;;  %v16334_v51 = vld [vmem:[#allocation194_spill] sm:$0xff] }
 0x33b   : > { %10126 = vmatmul.mubr.f32.gmra.mrb[74].mxu1 %v16282_v37  ;;  %10906 = vmatmul.mubr.f32.gmra.mrb[74].mxu0 %v16283_v13  ;;  %v16335_v37 = vld [vmem:[#allocation198_spill] sm:$0xff]  ;;  %v16336_v13 = vld [vmem:[#allocation195_spill] sm:$0xff] }
 0x33c   : > { %10128 = vmatprep.mubr.f32.mxu1 %v16284_v4  ;;  %10908 = vmatprep.mubr.f32.mxu0 %v16285_v16  ;;  %v16337_v4 = vld [vmem:[#allocation199_spill] sm:$0xff]  ;;  %v16338_v16 = vld [vmem:[#allocation196_spill] sm:$0xff] }
 0x33f   : > { %10129 = vmatmul.mubr.f32.gmra.mrb[76].mxu1 %v16286_v60  ;;  %10909 = vmatmul.mubr.f32.gmra.mrb[76].mxu0 %v16287_v49  ;;  %v16339_v60 = vld [vmem:[#allocation203_spill] sm:$0xff]  ;;  %v14515_v49 = vstv %s345_s26 }
 0x340   : > { %10131 = vmatprep.mubr.f32.mxu1 %v16288_v8  ;;  %10911 = vmatprep.mubr.f32.mxu0 %v16289_v39  ;;  %v16342_v8 = vld [vmem:[#allocation201_spill] sm:$0xff] }
 0x343   : > { %10132 = vmatmul.mubr.f32.gmra.mrb[78].mxu1 %v16290_v40  ;;  %10912 = vmatmul.mubr.f32.gmra.mrb[78].mxu0 %v16291_v42 }
 0x344   : > { %10134 = vmatprep.mubr.f32.mxu1 %v16292_v54  ;;  %10914 = vmatprep.mubr.f32.mxu0 %v16293_v55  ;;  %v16343_v54 = vld [vmem:[#allocation206_spill] sm:$0xff] }
 0x347   : > { %10135 = vmatmul.mubr.f32.gmra.mrb[80].mxu1 %v16294_v56  ;;  %10915 = vmatmul.mubr.f32.gmra.mrb[80].mxu0 %v16295_v57  ;;  %v16344_v56 = vld [vmem:[#allocation202_spill] sm:$0xff] }
 0x348   : > { %10137 = vmatprep.mubr.f32.mxu1 %v16296_v27  ;;  %10917 = vmatprep.mubr.f32.mxu0 %v16297_v35  ;;  %v16345_v27 = vld [vmem:[#allocation208_spill] sm:$0xff] }
 0x349   : > { %v16346_v35 = vld [vmem:[#allocation204_spill] sm:$0xff] }
 0x34b   : > { %10138 = vmatmul.mubr.f32.gmra.mrb[82].mxu1 %v16298_v36  ;;  %10918 = vmatmul.mubr.f32.gmra.mrb[82].mxu0 %v16299_v29 }
 0x34c   : > { %10140 = vmatprep.mubr.f32.mxu1 %v16300_v9  ;;  %10920 = vmatprep.mubr.f32.mxu0 %v16301_v47 }
 0x34f   : > { %10141 = vmatmul.mubr.f32.gmra.mrb[84].mxu1 %v16302_v5  ;;  %10921 = vmatmul.mubr.f32.gmra.mrb[84].mxu0 %v16303_v50 }
 0x350   : > { %10143 = vmatprep.mubr.f32.mxu1 %v16304_v14  ;;  %10923 = vmatprep.mubr.f32.mxu0 %v16305_v59  ;;  %v16347_v14 = vld [vmem:[#allocation210_spill] sm:$0xff] }
 0x353   : > { %10144 = vmatmul.mubr.f32.gmra.mrb[86].mxu1 %v16306_v6  ;;  %10924 = vmatmul.mubr.f32.gmra.mrb[86].mxu0 %v16307_v7  ;;  %v16348_v6 = vld [vmem:[#allocation207_spill] sm:$0xff] }
 0x354   : > { %10146 = vmatprep.mubr.f32.mxu1 %v16308_v12  ;;  %10926 = vmatprep.mubr.f32.mxu0 %v16309_v17  ;;  %v16349_v12 = vld [vmem:[#allocation212_spill] sm:$0xff]  ;;  %v16350_v17 = vld [vmem:[#allocation209_spill] sm:$0xff] }
 0x357   : > { %10147 = vmatmul.mubr.f32.gmra.mrb[88].mxu1 %v16310_v25  ;;  %10927 = vmatmul.mubr.f32.gmra.mrb[88].mxu0 %v16311_v28 }
 0x358   : > { %10149 = vmatprep.mubr.f32.mxu1 %v16312_v33  ;;  %10929 = vmatprep.mubr.f32.mxu0 %v16313_v22 }
 0x35b   : > { %10150 = vmatmul.mubr.f32.gmra.mrb[90].mxu1 %v16314_v30  ;;  %10930 = vmatmul.mubr.f32.gmra.mrb[90].mxu0 %v16315_v20 }
 0x35c   : > { %10152 = vmatprep.mubr.f32.mxu1 %v16316_v38  ;;  %10932 = vmatprep.mubr.f32.mxu0 %v16317_v19  ;;  %v16351_v38 = vld [vmem:[#allocation214_spill] sm:$0xff] }
 0x35f   : > { %10153 = vmatmul.mubr.f32.gmra.mrb[92].mxu1 %v16318_v15  ;;  %10933 = vmatmul.mubr.f32.gmra.mrb[92].mxu0 %v16319_v45  ;;  %v16352_v15 = vld [vmem:[#allocation211_spill] sm:$0xff] }
 0x360   : > { %10155 = vmatprep.mubr.f32.mxu1 %v16320_v23  ;;  %10935 = vmatprep.mubr.f32.mxu0 %v16321_v61  ;;  %v16353_v23 = vld [vmem:[#allocation216_spill] sm:$0xff]  ;;  %v16354_v61 = vld [vmem:[#allocation213_spill] sm:$0xff] }
 0x363   : > { %10156 = vmatmul.mubr.f32.gmra.mrb[94].mxu1 %v16322_v1  ;;  %10936 = vmatmul.mubr.f32.gmra.mrb[94].mxu0 %v16323_v2 }
 0x364   : > { %10158 = vmatprep.mubr.f32.mxu1 %v16324_v10  ;;  %10938 = vmatprep.mubr.f32.mxu0 %v16325_v41 }
 0x367   : > { %10159 = vmatmul.mubr.f32.gmra.mrb[96].mxu1 %v16326_v21  ;;  %10939 = vmatmul.mubr.f32.gmra.mrb[96].mxu0 %v16327_v0 }
 0x368   : > { %10161 = vmatprep.mubr.f32.mxu1 %v16328_v3  ;;  %10941 = vmatprep.mubr.f32.mxu0 %v16329_v53  ;;  %v16355_v3 = vld [vmem:[#allocation218_spill] sm:$0xff] }
 0x36b   : > { %10162 = vmatmul.mubr.f32.gmra.mrb[98].mxu1 %v16330_v43  ;;  %10942 = vmatmul.mubr.f32.gmra.mrb[98].mxu0 %v16331_v58  ;;  %v16356_v43 = vld [vmem:[#allocation215_spill] sm:$0xff] }
 0x36c   : > { %10164 = vmatprep.mubr.f32.mxu1 %v16332_v34  ;;  %10944 = vmatprep.mubr.f32.mxu0 %v16130_v63  ;;  %v16340_v63 = vld [vmem:[#allocation200_spill] sm:$0xff] }
 0x36d   : > { %v16357_v34 = vld [vmem:[#allocation220_spill] sm:$0xff] }
 0x36f   : > { %10165 = vmatmul.mubr.f32.gmra.mrb[100].mxu1 %v16333_v46  ;;  %10945 = vmatmul.mubr.f32.gmra.mrb[100].mxu0 %v16131_v52  ;;  %v16341_v52 = vld [vmem:[#allocation205_spill] sm:$0xff] }
 0x370   : > { %10167 = vmatprep.mubr.f32.mxu1 %v16334_v51  ;;  %10947 = vmatprep.mubr.f32.mxu0 %v16132_v24  ;;  %v16358_v46 = vld [vmem:[#allocation217_spill] sm:$0xff] }
 0x373   : > { %10168 = vmatmul.mubr.f32.gmra.mrb[102].mxu1 %v16335_v37  ;;  %10948 = vmatmul.mubr.f32.gmra.mrb[102].mxu0 %v16336_v13 }
 0x374   : > { %10170 = vmatprep.mubr.f32.mxu1 %v16337_v4  ;;  %10950 = vmatprep.mubr.f32.mxu0 %v16338_v16 }
 0x377   : > { %10171 = vmatmul.mubr.f32.gmra.mrb[104].mxu1 %v16339_v60  ;;  %10951 = vmatmul.mubr.f32.gmra.mrb[104].mxu0 %v16340_v63  ;;  %v16359_v63 = vld [vmem:[#allocation223_spill] sm:$0xff] }
 0x378   : > { %10173 = vmatprep.mubr.f32.mxu1 %v16341_v52  ;;  %10953 = vmatprep.mubr.f32.mxu0 %v16342_v8  ;;  %v16360_v8 = vld [vmem:[#allocation219_spill] sm:$0xff] }
 0x37a   : > { %v10016_v24 = vpop.f32.mrb[0].mxu1  ;;  %v10796_v39 = vpop.f32.mrb[0].mxu0 }
 0x37b   : > { %v11154_v40 = vadd.f32 %v10016_v24, %v14515_v49  ;;  %v3666_v42 = vpop.f32.mrb[1].mxu1  ;;  %10174 = vmatmul.mubr.f32.gmra.mrb[106].mxu1 %v16343_v54  ;;  %v7270_v55 = vpop.f32.mrb[1].mxu0  ;;  %10954 = vmatmul.mubr.f32.gmra.mrb[106].mxu0 %v16344_v56 }
 0x37c   : > { %v11156_v57 = vadd.f32 %v3666_v42, %v14515_v49  ;;  %10176 = vmatprep.mubr.f32.mxu1 %v16345_v27  ;;  %10956 = vmatprep.mubr.f32.mxu0 %v16346_v35  ;;  %v16363_v35 = vld [vmem:[#allocation226_spill] sm:$0xff] }
 0x37d   : > { %v11155_v36 = vadd.f32 %v11154_v40, %v10796_v39  ;;  %v16361_v39 = vld [vmem:[#allocation225_spill] sm:$0xff] }
 0x37e   : > { %v11157_v29 = vadd.f32 %v11156_v57, %v7270_v55  ;;  %v10019_v9 = vpop.f32.mrb[2].mxu1  ;;  %v10799_v47 = vpop.f32.mrb[2].mxu0  ;;  %v16362_v40 = vld [vmem:[#allocation221_spill] sm:$0xff] }
 0x37f   : > { %8230 = vst.msk [vmem:[%s14527_s29 + $0x8] sm:$0xff] %vm8228_vm1, %v11155_v36  ;;  %v11158_v5 = vadd.f32 %v10019_v9, %v14515_v49  ;;  %v3680_v50 = vpop.f32.mrb[3].mxu1  ;;  %10177 = vmatmul.mubr.f32.gmra.mrb[108].mxu1 %v16347_v14  ;;  %v7282_v59 = vpop.f32.mrb[3].mxu0  ;;  %10957 = vmatmul.mubr.f32.gmra.mrb[108].mxu0 %v16348_v6 }
 0x380   : > { %8229 = vst.msk [vmem:[%s14527_s29] sm:$0xff] %vm8228_vm1, %v11157_v29  ;;  %v11160_v7 = vadd.f32 %v3680_v50, %v14515_v49  ;;  %10179 = vmatprep.mubr.f32.mxu1 %v16349_v12  ;;  %10959 = vmatprep.mubr.f32.mxu0 %v16350_v17  ;;  %v16364_v29 = vld [vmem:[#allocation222_spill] sm:$0xff] }
 0x381   : > { %v11159_v25 = vadd.f32 %v11158_v5, %v10799_v47  ;;  %v16365_v47 = vld [vmem:[#allocation228_spill] sm:$0xff]  ;;  %v16367_v17 = vld [vmem:[#allocation230_spill] sm:$0xff] }
 0x382   : > { %v11161_v28 = vadd.f32 %v11160_v7, %v7282_v59  ;;  %v10022_v33 = vpop.f32.mrb[4].mxu1  ;;  %v10802_v22 = vpop.f32.mrb[4].mxu0  ;;  %v16366_v5 = vld [vmem:[#allocation224_spill] sm:$0xff] }
 0x383   : > { %8232 = vst.msk [vmem:[%s14527_s29 + $0x18] sm:$0xff] %vm8228_vm1, %v11159_v25  ;;  %v11162_v30 = vadd.f32 %v10022_v33, %v14515_v49  ;;  %v3694_v20 = vpop.f32.mrb[5].mxu1  ;;  %10180 = vmatmul.mubr.f32.gmra.mrb[110].mxu1 %v16351_v38  ;;  %v7294_v19 = vpop.f32.mrb[5].mxu0  ;;  %10960 = vmatmul.mubr.f32.gmra.mrb[110].mxu0 %v16352_v15 }
 0x384   : > { %8231 = vst.msk [vmem:[%s14527_s29 + $0x10] sm:$0xff] %vm8228_vm1, %v11161_v28  ;;  %v11164_v45 = vadd.f32 %v3694_v20, %v14515_v49  ;;  %10182 = vmatprep.mubr.f32.mxu1 %v16353_v23  ;;  %10962 = vmatprep.mubr.f32.mxu0 %v16354_v61  ;;  %v16368_v28 = vld [vmem:[#allocation227_spill] sm:$0xff]  ;;  %v16371_v61 = vld [vmem:[#allocation234_spill] sm:$0xff] }
 0x385   : > { %v11163_v1 = vadd.f32 %v11162_v30, %v10802_v22  ;;  %v16369_v22 = vld [vmem:[#allocation232_spill] sm:$0xff]  ;;  %v16370_v30 = vld [vmem:[#allocation229_spill] sm:$0xff] }
 0x386   : > { %v11165_v2 = vadd.f32 %v11164_v45, %v7294_v19  ;;  %v10025_v10 = vpop.f32.mrb[6].mxu1  ;;  %v10805_v41 = vpop.f32.mrb[6].mxu0 }
 0x387   : > { %8234 = vst.msk [vmem:[%s14527_s29 + $0x28] sm:$0xff] %vm8228_vm1, %v11163_v1  ;;  %v11166_v21 = vadd.f32 %v10025_v10, %v14515_v49  ;;  %v3708_v0 = vpop.f32.mrb[7].mxu1  ;;  %10183 = vmatmul.mubr.f32.gmra.mrb[112].mxu1 %v16355_v3  ;;  %v7306_v53 = vpop.f32.mrb[7].mxu0  ;;  %10963 = vmatmul.mubr.f32.gmra.mrb[112].mxu0 %v16356_v43 }
 0x388   : > { %8233 = vst.msk [vmem:[%s14527_s29 + $0x20] sm:$0xff] %vm8228_vm1, %v11165_v2  ;;  %v11168_v58 = vadd.f32 %v3708_v0, %v14515_v49  ;;  %10185 = vmatprep.mubr.f32.mxu1 %v16357_v34  ;;  %10965 = vmatprep.mubr.f32.mxu0 %v16358_v46  ;;  %v16372_v2 = vld [vmem:[#allocation231_spill] sm:$0xff] }
 0x389   : > { %v11167_v51 = vadd.f32 %v11166_v21, %v10805_v41  ;;  %v16373_v41 = vld [vmem:[#allocation236_spill] sm:$0xff]  ;;  %v16374_v21 = vld [vmem:[#allocation233_spill] sm:$0xff]  ;;  %v16375_v46 = vld [vmem:[#allocation239_spill] sm:$0xff] }
 0x38a   : > { %v11169_v37 = vadd.f32 %v11168_v58, %v7306_v53  ;;  %v10028_v13 = vpop.f32.mrb[8].mxu1  ;;  %v10808_v4 = vpop.f32.mrb[8].mxu0 }
 0x38b   : > { %8236 = vst.msk [vmem:[%s14527_s29 + $0x38] sm:$0xff] %vm8228_vm1, %v11167_v51  ;;  %v11170_v16 = vadd.f32 %v10028_v13, %v14515_v49  ;;  %v3722_v60 = vpop.f32.mrb[9].mxu1  ;;  %10186 = vmatmul.mubr.f32.gmra.mrb[114].mxu1 %v16359_v63  ;;  %v7318_v52 = vpop.f32.mrb[9].mxu0  ;;  %10966 = vmatmul.mubr.f32.gmra.mrb[114].mxu0 %v16360_v8 }
 0x38c   : > { %8235 = vst.msk [vmem:[%s14527_s29 + $0x30] sm:$0xff] %vm8228_vm1, %v11169_v37  ;;  %v11172_v24 = vadd.f32 %v3722_v60, %v14515_v49  ;;  %10188 = vmatprep.mubr.f32.mxu1 %v16361_v39  ;;  %10968 = vmatprep.mubr.f32.mxu0 %v16362_v40  ;;  %v16376_v37 = vld [vmem:[#allocation235_spill] sm:$0xff]  ;;  %v16379_v40 = vld [vmem:[#allocation242_spill] sm:$0xff] }
 0x38d   : > { %v11171_v42 = vadd.f32 %v11170_v16, %v10808_v4  ;;  %v16377_v4 = vld [vmem:[#allocation240_spill] sm:$0xff]  ;;  %v16378_v16 = vld [vmem:[#allocation237_spill] sm:$0xff] }
 0x38e   : > { %v11173_v54 = vadd.f32 %v11172_v24, %v7318_v52  ;;  %v10031_v55 = vpop.f32.mrb[10].mxu1  ;;  %v10811_v56 = vpop.f32.mrb[10].mxu0 }
 0x38f   : > { %8238 = vst.msk [vmem:[%s14527_s29 + $0x48] sm:$0xff] %vm8228_vm1, %v11171_v42  ;;  %v11174_v57 = vadd.f32 %v10031_v55, %v14515_v49  ;;  %v3736_v27 = vpop.f32.mrb[11].mxu1  ;;  %10189 = vmatmul.mubr.f32.gmra.mrb[116].mxu1 %v16363_v35  ;;  %v7330_v36 = vpop.f32.mrb[11].mxu0  ;;  %10969 = vmatmul.mubr.f32.gmra.mrb[116].mxu0 %v16364_v29 }
 0x390   : > { %8237 = vst.msk [vmem:[%s14527_s29 + $0x40] sm:$0xff] %vm8228_vm1, %v11173_v54  ;;  %v11176_v9 = vadd.f32 %v3736_v27, %v14515_v49  ;;  %10191 = vmatprep.mubr.f32.mxu1 %v16365_v47  ;;  %10971 = vmatprep.mubr.f32.mxu0 %v16366_v5  ;;  %v16380_v54 = vld [vmem:[#allocation238_spill] sm:$0xff] }
 0x391   : > { %v11175_v50 = vadd.f32 %v11174_v57, %v10811_v56  ;;  %v16381_v56 = vld [vmem:[#allocation245_spill] sm:$0xff]  ;;  %v16382_v47 = vld [vmem:[#allocation246_spill] sm:$0xff] }
 0x392   : > { %v11177_v14 = vadd.f32 %v11176_v9, %v7330_v36  ;;  %v10034_v59 = vpop.f32.mrb[12].mxu1  ;;  %v10814_v6 = vpop.f32.mrb[12].mxu0 }
 0x393   : > { %8240 = vst.msk [vmem:[%s14527_s29 + $0x58] sm:$0xff] %vm8228_vm1, %v11175_v50  ;;  %v11178_v7 = vadd.f32 %v10034_v59, %v14515_v49  ;;  %v3750_v12 = vpop.f32.mrb[13].mxu1  ;;  %10192 = vmatmul.mubr.f32.gmra.mrb[118].mxu1 %v16367_v17  ;;  %v7342_v25 = vpop.f32.mrb[13].mxu0  ;;  %10972 = vmatmul.mubr.f32.gmra.mrb[118].mxu0 %v16368_v28  ;;  %v16383_v50 = vld [vmem:[#allocation243_spill] sm:$0xff]  ;;  %v16385_v59 = vld [vmem:[#allocation244_spill] sm:$0xff] }
 0x394   : > { %8239 = vst.msk [vmem:[%s14527_s29 + $0x50] sm:$0xff] %vm8228_vm1, %v11177_v14  ;;  %v11180_v33 = vadd.f32 %v3750_v12, %v14515_v49  ;;  %10194 = vmatprep.mubr.f32.mxu1 %v16369_v22  ;;  %10974 = vmatprep.mubr.f32.mxu0 %v16370_v30  ;;  %v16384_v14 = vld [vmem:[#allocation248_spill] sm:$0xff]  ;;  %v16387_v30 = vld [vmem:[#allocation247_spill] sm:$0xff] }
 0x395   : > { %v11179_v20 = vadd.f32 %v11178_v7, %v10814_v6 }
 0x396   : > { %v11181_v38 = vadd.f32 %v11180_v33, %v7342_v25  ;;  %v10037_v19 = vpop.f32.mrb[14].mxu1  ;;  %v10817_v15 = vpop.f32.mrb[14].mxu0  ;;  %v16386_v33 = vld [vmem:[#allocation250_spill] sm:$0xff] }
 0x397   : > { %8242 = vst.msk [vmem:[%s14527_s29 + $0x68] sm:$0xff] %vm8228_vm1, %v11179_v20  ;;  %v11182_v45 = vadd.f32 %v10037_v19, %v14515_v49  ;;  %v3764_v23 = vpop.f32.mrb[15].mxu1  ;;  %10195 = vmatmul.mubr.f32.gmra.mrb[120].mxu1 %v16371_v61  ;;  %v7354_v1 = vpop.f32.mrb[15].mxu0  ;;  %10975 = vmatmul.mubr.f32.gmra.mrb[120].mxu0 %v16372_v2  ;;  %v16389_v19 = vld [vmem:[#allocation249_spill] sm:$0xff] }
 0x398   : > { %8241 = vst.msk [vmem:[%s14527_s29 + $0x60] sm:$0xff] %vm8228_vm1, %v11181_v38  ;;  %v11184_v10 = vadd.f32 %v3764_v23, %v14515_v49  ;;  %10197 = vmatprep.mubr.f32.mxu1 %v16373_v41  ;;  %10977 = vmatprep.mubr.f32.mxu0 %v16374_v21  ;;  %v16388_v38 = vld [vmem:[#allocation252_spill] sm:$0xff]  ;;  %v16391_v21 = vld [vmem:[#allocation251_spill] sm:$0xff] }
 0x399   : > { %v11183_v0 = vadd.f32 %v11182_v45, %v10817_v15 }
 0x39a   : > { %v11185_v3 = vadd.f32 %v11184_v10, %v7354_v1  ;;  %v10040_v53 = vpop.f32.mrb[16].mxu1  ;;  %v10820_v43 = vpop.f32.mrb[16].mxu0  ;;  %v16390_v10 = vld [vmem:[#allocation254_spill] sm:$0xff] }
 0x39b   : > { %8244 = vst.msk [vmem:[%s14527_s29 + $0x78] sm:$0xff] %vm8228_vm1, %v11183_v0  ;;  %v11186_v58 = vadd.f32 %v10040_v53, %v14515_v49  ;;  %v3778_v34 = vpop.f32.mrb[17].mxu1  ;;  %10198 = vmatmul.mubr.f32.gmra.mrb[122].mxu1 %v16375_v46  ;;  %v7366_v51 = vpop.f32.mrb[17].mxu0  ;;  %10978 = vmatmul.mubr.f32.gmra.mrb[122].mxu0 %v16376_v37  ;;  %v16393_v53 = vld [vmem:[#allocation253_spill] sm:$0xff] }
 0x39c   : > { %8243 = vst.msk [vmem:[%s14527_s29 + $0x70] sm:$0xff] %vm8228_vm1, %v11185_v3  ;;  %v11188_v13 = vadd.f32 %v3778_v34, %v14515_v49  ;;  %10200 = vmatprep.mubr.f32.mxu1 %v16377_v4  ;;  %10980 = vmatprep.mubr.f32.mxu0 %v16378_v16  ;;  %v16392_v3 = vld [vmem:[#allocation257_spill] sm:$0xff]  ;;  %v16395_v16 = vld [vmem:[#allocation255_spill] sm:$0xff] }
 0x39d   : > { %v11187_v60 = vadd.f32 %v11186_v58, %v10820_v43 }
 0x39e   : > { %v11189_v63 = vadd.f32 %v11188_v13, %v7366_v51  ;;  %v10043_v52 = vpop.f32.mrb[18].mxu1  ;;  %v10823_v8 = vpop.f32.mrb[18].mxu0  ;;  %v16394_v13 = vld [vmem:[#allocation258_spill] sm:$0xff] }
 0x39f   : > { %8246 = vst.msk [vmem:[%s14527_s29 + $0x88] sm:$0xff] %vm8228_vm1, %v11187_v60  ;;  %v11190_v24 = vadd.f32 %v10043_v52, %v14515_v49  ;;  %v3792_v39 = vpop.f32.mrb[19].mxu1  ;;  %10201 = vmatmul.mubr.f32.gmra.mrb[124].mxu1 %v16379_v40  ;;  %v7378_v42 = vpop.f32.mrb[19].mxu0  ;;  %10981 = vmatmul.mubr.f32.gmra.mrb[124].mxu0 %v16380_v54  ;;  %v16397_v52 = vld [vmem:[#allocation256_spill] sm:$0xff] }
 0x3a0   : > { %8245 = vst.msk [vmem:[%s14527_s29 + $0x80] sm:$0xff] %vm8228_vm1, %v11189_v63  ;;  %v11192_v55 = vadd.f32 %v3792_v39, %v14515_v49  ;;  %10203 = vmatprep.mubr.f32.mxu1 %v16381_v56  ;;  %10983 = vmatprep.mubr.f32.mxu0 %v16153_v62  ;;  %v16396_v63 = vld [vmem:[#allocation260_spill] sm:$0xff] }
 0x3a1   : > { %v11191_v57 = vadd.f32 %v11190_v24, %v10823_v8 }
 0x3a2   : > { %v11193_v27 = vadd.f32 %v11192_v55, %v7378_v42  ;;  %v10046_v35 = vpop.f32.mrb[20].mxu1  ;;  %v10826_v36 = vpop.f32.mrb[20].mxu0  ;;  %v16398_v55 = vld [vmem:[#allocation262_spill] sm:$0xff] }
 0x3a3   : > { %8248 = vst.msk [vmem:[%s14527_s29 + $0x98] sm:$0xff] %vm8228_vm1, %v11191_v57  ;;  %v11194_v29 = vadd.f32 %v10046_v35, %v14515_v49  ;;  %v3806_v9 = vpop.f32.mrb[21].mxu1  ;;  %10204 = vmatmul.mubr.f32.gmra.mrb[126].mxu1 %v16382_v47  ;;  %v7390_v5 = vpop.f32.mrb[21].mxu0  ;;  %10984 = vmatmul.mubr.f32.gmra.mrb[126].mxu0 %v16383_v50  ;;  %v16399_v57 = vld [vmem:[#allocation259_spill] sm:$0xff]  ;;  %v16400_v35 = vld [vmem:[#allocation265_spill] sm:$0xff] }
 0x3a4   : > { %8247 = vst.msk [vmem:[%s14527_s29 + $0x90] sm:$0xff] %vm8228_vm1, %v11193_v27  ;;  %v11196_v62 = vadd.f32 %v3806_v9, %v14515_v49  ;;  %10206 = vmatprep.mubr.f32.mxu1 %v16384_v14  ;;  %10986 = vmatprep.mubr.f32.mxu0 %v16385_v59  ;;  %v16402_v14 = vld [vmem:[#allocation267_spill] sm:$0xff] }
 0x3a5   : > { %v11195_v6 = vadd.f32 %v11194_v29, %v10826_v36  ;;  %v16401_v36 = vld [vmem:[#allocation261_spill] sm:$0xff] }
 0x3a6   : > { %v11197_v7 = vadd.f32 %v11196_v62, %v7390_v5  ;;  %v10049_v12 = vpop.f32.mrb[22].mxu1  ;;  %v10829_v17 = vpop.f32.mrb[22].mxu0 }
 0x3a7   : > { %8250 = vst.msk [vmem:[%s14527_s29 + $0xa8] sm:$0xff] %vm8228_vm1, %v11195_v6  ;;  %v11198_v25 = vadd.f32 %v10049_v12, %v14515_v49  ;;  %v3820_v28 = vpop.f32.mrb[23].mxu1  ;;  %10207 = vmatmul.mubr.f32.gmra.mrb[128].mxu1 %v16386_v33  ;;  %v7402_v22 = vpop.f32.mrb[23].mxu0  ;;  %10987 = vmatmul.mubr.f32.gmra.mrb[128].mxu0 %v16387_v30  ;;  %v16403_v6 = vld [vmem:[#allocation263_spill] sm:$0xff]  ;;  %v16404_v12 = vld [vmem:[#allocation268_spill] sm:$0xff] }
 0x3a8   : > { %8249 = vst.msk [vmem:[%s14527_s29 + $0xa0] sm:$0xff] %vm8228_vm1, %v11197_v7  ;;  %v11200_v20 = vadd.f32 %v3820_v28, %v14515_v49  ;;  %10209 = vmatprep.mubr.f32.mxu1 %v16388_v38  ;;  %10989 = vmatprep.mubr.f32.mxu0 %v16389_v19  ;;  %v16406_v38 = vld [vmem:[#allocation270_spill] sm:$0xff] }
 0x3a9   : > { %v11199_v15 = vadd.f32 %v11198_v25, %v10829_v17  ;;  %v16405_v17 = vld [vmem:[#allocation264_spill] sm:$0xff] }
 0x3aa   : > { %v11201_v45 = vadd.f32 %v11200_v20, %v7402_v22  ;;  %v10052_v23 = vpop.f32.mrb[24].mxu1  ;;  %v10832_v61 = vpop.f32.mrb[24].mxu0 }
 0x3ab   : > { %8252 = vst.msk [vmem:[%s14527_s29 + $0xb8] sm:$0xff] %vm8228_vm1, %v11199_v15  ;;  %v11202_v1 = vadd.f32 %v10052_v23, %v14515_v49  ;;  %v3834_v2 = vpop.f32.mrb[25].mxu1  ;;  %10210 = vmatmul.mubr.f32.gmra.mrb[130].mxu1 %v16390_v10  ;;  %v7414_v41 = vpop.f32.mrb[25].mxu0  ;;  %10990 = vmatmul.mubr.f32.gmra.mrb[130].mxu0 %v16391_v21  ;;  %v16407_v15 = vld [vmem:[#allocation266_spill] sm:$0xff]  ;;  %v16408_v23 = vld [vmem:[#allocation273_spill] sm:$0xff] }
 0x3ac   : > { %8251 = vst.msk [vmem:[%s14527_s29 + $0xb0] sm:$0xff] %vm8228_vm1, %v11201_v45  ;;  %v11204_v0 = vadd.f32 %v3834_v2, %v14515_v49  ;;  %10212 = vmatprep.mubr.f32.mxu1 %v16392_v3  ;;  %10992 = vmatprep.mubr.f32.mxu0 %v16393_v53  ;;  %v16410_v3 = vld [vmem:[#allocation274_spill] sm:$0xff] }
 0x3ad   : > { %v11203_v43 = vadd.f32 %v11202_v1, %v10832_v61  ;;  %v16409_v61 = vld [vmem:[#allocation269_spill] sm:$0xff] }
 0x3ae   : > { %v11205_v58 = vadd.f32 %v11204_v0, %v7414_v41  ;;  %v10055_v34 = vpop.f32.mrb[26].mxu1  ;;  %v10835_v46 = vpop.f32.mrb[26].mxu0 }
 0x3af   : > { %8254 = vst.msk [vmem:[%s14527_s29 + $0xc8] sm:$0xff] %vm8228_vm1, %v11203_v43  ;;  %v11206_v51 = vadd.f32 %v10055_v34, %v14515_v49  ;;  %v3848_v37 = vpop.f32.mrb[27].mxu1  ;;  %10213 = vmatmul.mubr.f32.gmra.mrb[132].mxu1 %v16394_v13  ;;  %v7426_v4 = vpop.f32.mrb[27].mxu0  ;;  %10993 = vmatmul.mubr.f32.gmra.mrb[132].mxu0 %v16395_v16  ;;  %v16411_v43 = vld [vmem:[#allocation271_spill] sm:$0xff] }
 0x3b0   : > { %8253 = vst.msk [vmem:[%s14527_s29 + $0xc0] sm:$0xff] %vm8228_vm1, %v11205_v58  ;;  %v11208_v60 = vadd.f32 %v3848_v37, %v14515_v49  ;;  %10215 = vmatprep.mubr.f32.mxu1 %v16396_v63  ;;  %10995 = vmatprep.mubr.f32.mxu0 %v16397_v52  ;;  %v16412_v34 = vld [vmem:[#allocation275_spill] sm:$0xff]  ;;  %v16414_v63 = vld [vmem:[#allocation278_spill] sm:$0xff] }
 0x3b1   : > { %v11207_v8 = vadd.f32 %v11206_v51, %v10835_v46  ;;  %v16413_v46 = vld [vmem:[#allocation272_spill] sm:$0xff] }
 0x3b2   : > { %v11209_v24 = vadd.f32 %v11208_v60, %v7426_v4  ;;  %v10058_v39 = vpop.f32.mrb[28].mxu1  ;;  %v10838_v40 = vpop.f32.mrb[28].mxu0 }
 0x3b3   : > { %8256 = vst.msk [vmem:[%s14527_s29 + $0xd8] sm:$0xff] %vm8228_vm1, %v11207_v8  ;;  %v11210_v42 = vadd.f32 %v10058_v39, %v14515_v49  ;;  %v3862_v54 = vpop.f32.mrb[29].mxu1  ;;  %10216 = vmatmul.mubr.f32.gmra.mrb[134].mxu1 %v16398_v55  ;;  %v7438_v56 = vpop.f32.mrb[29].mxu0  ;;  %10996 = vmatmul.mubr.f32.gmra.mrb[134].mxu0 %v16399_v57  ;;  %v16415_v8 = vld [vmem:[#allocation276_spill] sm:$0xff] }
 0x3b4   : > { %8255 = vst.msk [vmem:[%s14527_s29 + $0xd0] sm:$0xff] %vm8228_vm1, %v11209_v24  ;;  %v11212_v27 = vadd.f32 %v3862_v54, %v14515_v49  ;;  %10218 = vmatprep.mubr.f32.mxu1 %v16400_v35  ;;  %10998 = vmatprep.mubr.f32.mxu0 %v16401_v36  ;;  %v16416_v39 = vld [vmem:[#allocation280_spill] sm:$0xff]  ;;  %v16418_v35 = vld [vmem:[#allocation282_spill] sm:$0xff] }
 0x3b5   : > { %v11211_v29 = vadd.f32 %v11210_v42, %v10838_v40  ;;  %v16417_v40 = vld [vmem:[#allocation277_spill] sm:$0xff] }
 0x3b6   : > { %v11213_v9 = vadd.f32 %v11212_v27, %v7438_v56  ;;  %v10061_v47 = vpop.f32.mrb[30].mxu1  ;;  %v10841_v5 = vpop.f32.mrb[30].mxu0 }
 0x3b7   : > { %8258 = vst.msk [vmem:[%s14527_s29 + $0xe8] sm:$0xff] %vm8228_vm1, %v11211_v29  ;;  %v11214_v50 = vadd.f32 %v10061_v47, %v14515_v49  ;;  %v3876_v62 = vpop.f32.mrb[31].mxu1  ;;  %10219 = vmatmul.mubr.f32.gmra.mrb[136].mxu1 %v16402_v14  ;;  %v7450_v59 = vpop.f32.mrb[31].mxu0  ;;  %10999 = vmatmul.mubr.f32.gmra.mrb[136].mxu0 %v16403_v6  ;;  %v16419_v29 = vld [vmem:[#allocation279_spill] sm:$0xff]  ;;  %v16420_v47 = vld [vmem:[#allocation284_spill] sm:$0xff] }
 0x3b8   : > { %8257 = vst.msk [vmem:[%s14527_s29 + $0xe0] sm:$0xff] %vm8228_vm1, %v11213_v9  ;;  %v11216_v7 = vadd.f32 %v3876_v62, %v14515_v49  ;;  %10221 = vmatprep.mubr.f32.mxu1 %v16404_v12  ;;  %11001 = vmatprep.mubr.f32.mxu0 %v16405_v17  ;;  %v16422_v12 = vld [vmem:[#allocation288_spill] sm:$0xff] }
 0x3b9   : > { %v11215_v25 = vadd.f32 %v11214_v50, %v10841_v5  ;;  %v16421_v5 = vld [vmem:[#allocation281_spill] sm:$0xff] }
 0x3ba   : > { %v11217_v28 = vadd.f32 %v11216_v7, %v7450_v59  ;;  %v10064_v33 = vpop.f32.mrb[32].mxu1  ;;  %v10844_v22 = vpop.f32.mrb[32].mxu0 }
 0x3bb   : > { %8260 = vst.msk [vmem:[%s14527_s29 + $0xf8] sm:$0xff] %vm8228_vm1, %v11215_v25  ;;  %v11218_v30 = vadd.f32 %v10064_v33, %v14515_v49  ;;  %v3890_v20 = vpop.f32.mrb[33].mxu1  ;;  %10222 = vmatmul.mubr.f32.gmra.mrb[138].mxu1 %v16406_v38  ;;  %v7462_v19 = vpop.f32.mrb[33].mxu0  ;;  %11002 = vmatmul.mubr.f32.gmra.mrb[138].mxu0 %v16407_v15  ;;  %v16424_v15 = vld [vmem:[#allocation290_spill] sm:$0xff] }
 0x3bc   : > { %8259 = vst.msk [vmem:[%s14527_s29 + $0xf0] sm:$0xff] %vm8228_vm1, %v11217_v28  ;;  %v11220_v45 = vadd.f32 %v3890_v20, %v14515_v49  ;;  %10224 = vmatprep.mubr.f32.mxu1 %v16408_v23  ;;  %11004 = vmatprep.mubr.f32.mxu0 %v16409_v61  ;;  %v16423_v28 = vld [vmem:[#allocation289_spill] sm:$0xff] }
 0x3bd   : > { %v11219_v1 = vadd.f32 %v11218_v30, %v10844_v22 }
 0x3be   : > { %v11221_v2 = vadd.f32 %v11220_v45, %v7462_v19  ;;  %v10067_v10 = vpop.f32.mrb[34].mxu1  ;;  %v10847_v41 = vpop.f32.mrb[34].mxu0  ;;  %v16425_v45 = vld [vmem:[#allocation291_spill] sm:$0xff] }
 0x3bf   : > { %8262 = vst.msk [vmem:[%s14527_s29 + $0x108] sm:$0xff] %vm8228_vm1, %v11219_v1  ;;  %v11222_v21 = vadd.f32 %v10067_v10, %v14515_v49  ;;  %v3904_v0 = vpop.f32.mrb[35].mxu1  ;;  %10225 = vmatmul.mubr.f32.gmra.mrb[140].mxu1 %v16410_v3  ;;  %v7474_v53 = vpop.f32.mrb[35].mxu0  ;;  %11005 = vmatmul.mubr.f32.gmra.mrb[140].mxu0 %v16411_v43 }
 0x3c0   : > { %8261 = vst.msk [vmem:[%s14527_s29 + $0x100] sm:$0xff] %vm8228_vm1, %v11221_v2  ;;  %v11224_v58 = vadd.f32 %v3904_v0, %v14515_v49  ;;  %10227 = vmatprep.mubr.f32.mxu1 %v16412_v34  ;;  %11007 = vmatprep.mubr.f32.mxu0 %v16413_v46  ;;  %v16427_v0 = vld [vmem:[#allocation295_spill] sm:$0xff] }
 0x3c1   : > { %v11223_v51 = vadd.f32 %v11222_v21, %v10847_v41  ;;  %v16426_v21 = vld [vmem:[#allocation294_spill] sm:$0xff] }
 0x3c2   : > { %v11225_v37 = vadd.f32 %v11224_v58, %v7474_v53  ;;  %v10070_v13 = vpop.f32.mrb[36].mxu1  ;;  %v10850_v4 = vpop.f32.mrb[36].mxu0 }
 0x3c3   : > { %8264 = vst.msk [vmem:[%s14527_s29 + $0x118] sm:$0xff] %vm8228_vm1, %v11223_v51  ;;  %v11226_v16 = vadd.f32 %v10070_v13, %v14515_v49  ;;  %v3918_v60 = vpop.f32.mrb[37].mxu1  ;;  %10228 = vmatmul.mubr.f32.gmra.mrb[142].mxu1 %v16414_v63  ;;  %v7486_v52 = vpop.f32.mrb[37].mxu0  ;;  %11008 = vmatmul.mubr.f32.gmra.mrb[142].mxu0 %v16415_v8  ;;  %v16428_v51 = vld [vmem:[#allocation297_spill] sm:$0xff]  ;;  %v16430_v13 = vld [vmem:[#allocation296_spill] sm:$0xff] }
 0x3c4   : > { %8263 = vst.msk [vmem:[%s14527_s29 + $0x110] sm:$0xff] %vm8228_vm1, %v11225_v37  ;;  %v11228_v24 = vadd.f32 %v3918_v60, %v14515_v49  ;;  %10230 = vmatprep.mubr.f32.mxu1 %v16416_v39  ;;  %11010 = vmatprep.mubr.f32.mxu0 %v16417_v40  ;;  %v16429_v37 = vld [vmem:[#allocation299_spill] sm:$0xff]  ;;  %v16432_v39 = vld [vmem:[#allocation298_spill] sm:$0xff] }
 0x3c5   : > { %v11227_v42 = vadd.f32 %v11226_v16, %v10850_v4 }
 0x3c6   : > { %v11229_v54 = vadd.f32 %v11228_v24, %v7486_v52  ;;  %v10073_v55 = vpop.f32.mrb[38].mxu1  ;;  %v10853_v56 = vpop.f32.mrb[38].mxu0  ;;  %v16431_v24 = vld [vmem:[#allocation301_spill] sm:$0xff] }
 0x3c7   : > { %8266 = vst.msk [vmem:[%s14527_s29 + $0x128] sm:$0xff] %vm8228_vm1, %v11227_v42  ;;  %v11230_v57 = vadd.f32 %v10073_v55, %v14515_v49  ;;  %v3932_v27 = vpop.f32.mrb[39].mxu1  ;;  %10231 = vmatmul.mubr.f32.gmra.mrb[144].mxu1 %v16418_v35  ;;  %v7498_v36 = vpop.f32.mrb[39].mxu0  ;;  %11011 = vmatmul.mubr.f32.gmra.mrb[144].mxu0 %v16419_v29  ;;  %v16433_v42 = vld [vmem:[#allocation303_spill] sm:$0xff]  ;;  %v16435_v29 = vld [vmem:[#allocation305_spill] sm:$0xff] }
 0x3c8   : > { %8265 = vst.msk [vmem:[%s14527_s29 + $0x120] sm:$0xff] %vm8228_vm1, %v11229_v54  ;;  %v11232_v9 = vadd.f32 %v3932_v27, %v14515_v49  ;;  %10233 = vmatprep.mubr.f32.mxu1 %v16420_v47  ;;  %11013 = vmatprep.mubr.f32.mxu0 %v16421_v5  ;;  %v16434_v54 = vld [vmem:[#allocation300_spill] sm:$0xff]  ;;  %v16436_v47 = vld [vmem:[#allocation302_spill] sm:$0xff] }
 0x3c9   : > { %v11231_v50 = vadd.f32 %v11230_v57, %v10853_v56 }
 0x3ca   : > { %v11233_v62 = vadd.f32 %v11232_v9, %v7498_v36  ;;  %v10076_v14 = vpop.f32.mrb[40].mxu1  ;;  %v10856_v59 = vpop.f32.mrb[40].mxu0 }
 0x3cb   : > { %8268 = vst.msk [vmem:[%s14527_s29 + $0x138] sm:$0xff] %vm8228_vm1, %v11231_v50  ;;  %v11234_v6 = vadd.f32 %v10076_v14, %v14515_v49  ;;  %v3946_v7 = vpop.f32.mrb[41].mxu1  ;;  %10234 = vmatmul.mubr.f32.gmra.mrb[146].mxu1 %v16422_v12  ;;  %v7510_v17 = vpop.f32.mrb[41].mxu0  ;;  %11014 = vmatmul.mubr.f32.gmra.mrb[146].mxu0 %v16173_v32  ;;  %v16437_v50 = vld [vmem:[#allocation307_spill] sm:$0xff] }
 0x3cc   : > { %8267 = vst.msk [vmem:[%s14527_s29 + $0x130] sm:$0xff] %vm8228_vm1, %v11233_v62  ;;  %v11236_v25 = vadd.f32 %v3946_v7, %v14515_v49  ;;  %10236 = vmatprep.mubr.f32.mxu1 %v16423_v28  ;;  %11016 = vmatprep.mubr.f32.mxu0 %v16174_v44  ;;  %v16438_v62 = vld [vmem:[#allocation304_spill] sm:$0xff] }
 0x3cd   : > { %v11235_v33 = vadd.f32 %v11234_v6, %v10856_v59 }
 0x3ce   : > { %v11237_v22 = vadd.f32 %v11236_v25, %v7510_v17  ;;  %v10079_v30 = vpop.f32.mrb[42].mxu1  ;;  %v10859_v20 = vpop.f32.mrb[42].mxu0  ;;  %v16439_v25 = vld [vmem:[#allocation308_spill] sm:$0xff] }
 0x3cf   : > { %8270 = vst.msk [vmem:[%s14527_s29 + $0x148] sm:$0xff] %vm8228_vm1, %v11235_v33  ;;  %v11238_v38 = vadd.f32 %v10079_v30, %v14515_v49  ;;  %v3960_v19 = vpop.f32.mrb[43].mxu1  ;;  %10237 = vmatmul.mubr.f32.gmra.mrb[148].mxu1 %v16424_v15  ;;  %v7522_v32 = vpop.f32.mrb[43].mxu0  ;;  %11017 = vmatmul.mubr.f32.gmra.mrb[148].mxu0 %v16175_v26  ;;  %v16440_v33 = vld [vmem:[#allocation306_spill] sm:$0xff] }
 0x3d0   : > { %8269 = vst.msk [vmem:[%s14527_s29 + $0x140] sm:$0xff] %vm8228_vm1, %v11237_v22  ;;  %v11240_v44 = vadd.f32 %v3960_v19, %v14515_v49  ;;  %10239 = vmatprep.mubr.f32.mxu1 %v16425_v45  ;;  %11019 = vmatprep.mubr.f32.mxu0 %v16176_v48 }
 0x3d1   : > { %v11239_v23 = vadd.f32 %v11238_v38, %v10859_v20 }
 0x3d2   : > { %v11241_v61 = vadd.f32 %v11240_v44, %v7522_v32  ;;  %v10082_v1 = vpop.f32.mrb[44].mxu1  ;;  %v10862_v2 = vpop.f32.mrb[44].mxu0 }
 0x3d3   : > { %8272 = vst.msk [vmem:[%s14527_s29 + $0x158] sm:$0xff] %vm8228_vm1, %v11239_v23  ;;  %v11242_v10 = vadd.f32 %v10082_v1, %v14515_v49  ;;  %v3974_v41 = vpop.f32.mrb[45].mxu1  ;;  %10240 = vmatmul.mubr.f32.gmra.mrb[150].mxu1 %v16426_v21  ;;  %v7534_v26 = vpop.f32.mrb[45].mxu0  ;;  %11020 = vmatmul.mubr.f32.gmra.mrb[150].mxu0 %v16177_v11 }
 0x3d4   : > { %8271 = vst.msk [vmem:[%s14527_s29 + $0x150] sm:$0xff] %vm8228_vm1, %v11241_v61  ;;  %v11244_v48 = vadd.f32 %v3974_v41, %v14515_v49  ;;  %10242 = vmatprep.mubr.f32.mxu1 %v16427_v0  ;;  %11022 = vmatprep.mubr.f32.mxu0 %v16178_v18 }
 0x3d5   : > { %v11243_v3 = vadd.f32 %v11242_v10, %v10862_v2 }
 0x3d6   : > { %v11245_v53 = vadd.f32 %v11244_v48, %v7534_v26  ;;  %v10085_v43 = vpop.f32.mrb[46].mxu1  ;;  %v10865_v58 = vpop.f32.mrb[46].mxu0 }
 0x3d7   : > { %8274 = vst.msk [vmem:[%s14527_s29 + $0x168] sm:$0xff] %vm8228_vm1, %v11243_v3  ;;  %v11246_v34 = vadd.f32 %v10085_v43, %v14515_v49  ;;  %v3988_v46 = vpop.f32.mrb[47].mxu1  ;;  %10243 = vmatmul.mubr.f32.gmra.mrb[152].mxu1 %v16428_v51  ;;  %v7546_v11 = vpop.f32.mrb[47].mxu0  ;;  %11023 = vmatmul.mubr.f32.gmra.mrb[152].mxu0 %v13901_v31 }
 0x3d8   : > { %8273 = vst.msk [vmem:[%s14527_s29 + $0x160] sm:$0xff] %vm8228_vm1, %v11245_v53  ;;  %v11248_v18 = vadd.f32 %v3988_v46, %v14515_v49  ;;  %10245 = vmatprep.mubr.f32.mxu1 %v16429_v37  ;;  %11025 = vmatprep.mubr.f32.mxu0 %v16430_v13 }
 0x3d9   : > { %v11247_v4 = vadd.f32 %v11246_v34, %v10865_v58 }
 0x3da   : > { %v11249_v16 = vadd.f32 %v11248_v18, %v7546_v11  ;;  %v10088_v60 = vpop.f32.mrb[48].mxu1  ;;  %v10868_v63 = vpop.f32.mrb[48].mxu0 }
 0x3db   : > { %8276 = vst.msk [vmem:[%s14527_s29 + $0x178] sm:$0xff] %vm8228_vm1, %v11247_v4  ;;  %v11250_v52 = vadd.f32 %v10088_v60, %v14515_v49  ;;  %v4002_v8 = vpop.f32.mrb[49].mxu1  ;;  %10246 = vmatmul.mubr.f32.gmra.mrb[154].mxu1 %v16431_v24  ;;  %v7558_v31 = vpop.f32.mrb[49].mxu0  ;;  %11026 = vmatmul.mubr.f32.gmra.mrb[154].mxu0 %v16432_v39 }
 0x3dc   : > { %8275 = vst.msk [vmem:[%s14527_s29 + $0x170] sm:$0xff] %vm8228_vm1, %v11249_v16  ;;  %v11252_v40 = vadd.f32 %v4002_v8, %v14515_v49  ;;  %10248 = vmatprep.mubr.f32.mxu1 %v16433_v42  ;;  %11028 = vmatprep.mubr.f32.mxu0 %v16434_v54 }
 0x3dd   : > { %v11251_v55 = vadd.f32 %v11250_v52, %v10868_v63 }
 0x3de   : > { %v11253_v56 = vadd.f32 %v11252_v40, %v7558_v31  ;;  %v10091_v57 = vpop.f32.mrb[50].mxu1  ;;  %v10871_v27 = vpop.f32.mrb[50].mxu0 }
 0x3df   : > { %8278 = vst.msk [vmem:[%s14527_s29 + $0x188] sm:$0xff] %vm8228_vm1, %v11251_v55  ;;  %v11254_v35 = vadd.f32 %v10091_v57, %v14515_v49  ;;  %v4016_v36 = vpop.f32.mrb[51].mxu1  ;;  %10249 = vmatmul.mubr.f32.gmra.mrb[156].mxu1 %v16435_v29  ;;  %v7570_v9 = vpop.f32.mrb[51].mxu0  ;;  %11029 = vmatmul.mubr.f32.gmra.mrb[156].mxu0 %v16436_v47 }
 0x3e0   : > { %8277 = vst.msk [vmem:[%s14527_s29 + $0x180] sm:$0xff] %vm8228_vm1, %v11253_v56  ;;  %v11256_v5 = vadd.f32 %v4016_v36, %v14515_v49  ;;  %10251 = vmatprep.mubr.f32.mxu1 %v16437_v50  ;;  %11031 = vmatprep.mubr.f32.mxu0 %v16438_v62 }
 0x3e1   : > { %v11255_v14 = vadd.f32 %v11254_v35, %v10871_v27 }
 0x3e2   : > { %v11257_v59 = vadd.f32 %v11256_v5, %v7570_v9  ;;  %v10094_v6 = vpop.f32.mrb[52].mxu1  ;;  %v10874_v7 = vpop.f32.mrb[52].mxu0 }
 0x3e3   : > { %8280 = vst.msk [vmem:[%s14527_s29 + $0x198] sm:$0xff] %vm8228_vm1, %v11255_v14  ;;  %v11258_v12 = vadd.f32 %v10094_v6, %v14515_v49  ;;  %v4030_v17 = vpop.f32.mrb[53].mxu1  ;;  %10252 = vmatmul.mubr.f32.gmra.mrb[158].mxu1 %v16439_v25  ;;  %v7582_v28 = vpop.f32.mrb[53].mxu0  ;;  %11032 = vmatmul.mubr.f32.gmra.mrb[158].mxu0 %v16440_v33 }
 0x3e4   : > { %8279 = vst.msk [vmem:[%s14527_s29 + $0x190] sm:$0xff] %vm8228_vm1, %v11257_v59  ;;  %v11260_v22 = vadd.f32 %v4030_v17, %v14515_v49 }
 0x3e5   : > { %v11259_v30 = vadd.f32 %v11258_v12, %v10874_v7 }
 0x3e6   : > { %v11261_v20 = vadd.f32 %v11260_v22, %v7582_v28  ;;  %v10097_v38 = vpop.f32.mrb[54].mxu1  ;;  %v10877_v19 = vpop.f32.mrb[54].mxu0 }
 0x3e7   : > { %8282 = vst.msk [vmem:[%s14527_s29 + $0x1a8] sm:$0xff] %vm8228_vm1, %v11259_v30  ;;  %v11262_v15 = vadd.f32 %v10097_v38, %v14515_v49  ;;  %v4044_v32 = vpop.f32.mrb[55].mxu1  ;;  %v7594_v44 = vpop.f32.mrb[55].mxu0 }
 0x3e8   : > { %8281 = vst.msk [vmem:[%s14527_s29 + $0x1a0] sm:$0xff] %vm8228_vm1, %v11261_v20  ;;  %v11264_v45 = vadd.f32 %v4044_v32, %v14515_v49 }
 0x3e9   : > { %v11263_v23 = vadd.f32 %v11262_v15, %v10877_v19 }
 0x3ea   : > { %v11265_v61 = vadd.f32 %v11264_v45, %v7594_v44  ;;  %v10100_v1 = vpop.f32.mrb[56].mxu1  ;;  %v10880_v2 = vpop.f32.mrb[56].mxu0 }
 0x3eb   : > { %8284 = vst.msk [vmem:[%s14527_s29 + $0x1b8] sm:$0xff] %vm8228_vm1, %v11263_v23  ;;  %v11266_v10 = vadd.f32 %v10100_v1, %v14515_v49  ;;  %v4058_v41 = vpop.f32.mrb[57].mxu1  ;;  %v7606_v21 = vpop.f32.mrb[57].mxu0 }
 0x3ec   : > { %8283 = vst.msk [vmem:[%s14527_s29 + $0x1b0] sm:$0xff] %vm8228_vm1, %v11265_v61  ;;  %v11268_v26 = vadd.f32 %v4058_v41, %v14515_v49 }
 0x3ed   : > { %v11267_v48 = vadd.f32 %v11266_v10, %v10880_v2 }
 0x3ee   : > { %v11269_v0 = vadd.f32 %v11268_v26, %v7606_v21  ;;  %v10103_v3 = vpop.f32.mrb[58].mxu1  ;;  %v10883_v53 = vpop.f32.mrb[58].mxu0 }
 0x3ef   : > { %8286 = vst.msk [vmem:[%s14527_s29 + $0x1c8] sm:$0xff] %vm8228_vm1, %v11267_v48  ;;  %v11270_v43 = vadd.f32 %v10103_v3, %v14515_v49  ;;  %v4072_v58 = vpop.f32.mrb[59].mxu1  ;;  %v7618_v34 = vpop.f32.mrb[59].mxu0 }
 0x3f0   : > { %8285 = vst.msk [vmem:[%s14527_s29 + $0x1c0] sm:$0xff] %vm8228_vm1, %v11269_v0  ;;  %v11272_v46 = vadd.f32 %v4072_v58, %v14515_v49 }
 0x3f1   : > { %v11271_v51 = vadd.f32 %v11270_v43, %v10883_v53 }
 0x3f2   : > { %v11273_v11 = vadd.f32 %v11272_v46, %v7618_v34  ;;  %v10106_v18 = vpop.f32.mrb[60].mxu1  ;;  %v10886_v37 = vpop.f32.mrb[60].mxu0 }
 0x3f3   : > { %8288 = vst.msk [vmem:[%s14527_s29 + $0x1d8] sm:$0xff] %vm8228_vm1, %v11271_v51  ;;  %v11274_v13 = vadd.f32 %v10106_v18, %v14515_v49  ;;  %v4086_v4 = vpop.f32.mrb[61].mxu1  ;;  %v7630_v16 = vpop.f32.mrb[61].mxu0 }
 0x3f4   : > { %8287 = vst.msk [vmem:[%s14527_s29 + $0x1d0] sm:$0xff] %vm8228_vm1, %v11273_v11  ;;  %v11276_v60 = vadd.f32 %v4086_v4, %v14515_v49 }
 0x3f5   : > { %v11275_v63 = vadd.f32 %v11274_v13, %v10886_v37 }
 0x3f6   : > { %v11277_v52 = vadd.f32 %v11276_v60, %v7630_v16  ;;  %v10109_v8 = vpop.f32.mrb[62].mxu1  ;;  %v10889_v24 = vpop.f32.mrb[62].mxu0 }
 0x3f7   : > { %8290 = vst.msk [vmem:[%s14527_s29 + $0x1e8] sm:$0xff] %vm8228_vm1, %v11275_v63  ;;  %v11278_v31 = vadd.f32 %v10109_v8, %v14515_v49  ;;  %v4100_v39 = vpop.f32.mrb[63].mxu1  ;;  %v7642_v40 = vpop.f32.mrb[63].mxu0 }
 0x3f8   : > { %8289 = vst.msk [vmem:[%s14527_s29 + $0x1e0] sm:$0xff] %vm8228_vm1, %v11277_v52  ;;  %v11280_v42 = vadd.f32 %v4100_v39, %v14515_v49 }
 0x3f9   : > { %v11279_v54 = vadd.f32 %v11278_v31, %v10889_v24 }
 0x3fa   : > { %v11281_v55 = vadd.f32 %v11280_v42, %v7642_v40  ;;  %v10112_v56 = vpop.f32.mrb[64].mxu1  ;;  %v10892_v57 = vpop.f32.mrb[64].mxu0 }
 0x3fb   : > { %8292 = vst.msk [vmem:[%s14527_s29 + $0x1f8] sm:$0xff] %vm8228_vm1, %v11279_v54  ;;  %v11282_v27 = vadd.f32 %v10112_v56, %v14515_v49  ;;  %v4114_v35 = vpop.f32.mrb[65].mxu1  ;;  %v7654_v36 = vpop.f32.mrb[65].mxu0 }
 0x3fc   : > { %8291 = vst.msk [vmem:[%s14527_s29 + $0x1f0] sm:$0xff] %vm8228_vm1, %v11281_v55  ;;  %v11284_v29 = vadd.f32 %v4114_v35, %v14515_v49 }
 0x3fd   : > { %v11283_v9 = vadd.f32 %v11282_v27, %v10892_v57 }
 0x3fe   : > { %v11285_v47 = vadd.f32 %v11284_v29, %v7654_v36  ;;  %v10115_v5 = vpop.f32.mrb[66].mxu1  ;;  %v10895_v50 = vpop.f32.mrb[66].mxu0 }
 0x3ff   : > { %8294 = vst.msk [vmem:[%s14527_s29 + $0x208] sm:$0xff] %vm8228_vm1, %v11283_v9  ;;  %v11286_v62 = vadd.f32 %v10115_v5, %v14515_v49  ;;  %v4128_v14 = vpop.f32.mrb[67].mxu1  ;;  %v7666_v59 = vpop.f32.mrb[67].mxu0 }
 0x400   : > { %8293 = vst.msk [vmem:[%s14527_s29 + $0x200] sm:$0xff] %vm8228_vm1, %v11285_v47  ;;  %v11288_v6 = vadd.f32 %v4128_v14, %v14515_v49 }
 0x401   : > { %v11287_v7 = vadd.f32 %v11286_v62, %v10895_v50 }
 0x402   : > { %v11289_v12 = vadd.f32 %v11288_v6, %v7666_v59  ;;  %v10118_v17 = vpop.f32.mrb[68].mxu1  ;;  %v10898_v25 = vpop.f32.mrb[68].mxu0 }
 0x403   : > { %8296 = vst.msk [vmem:[%s14527_s29 + $0x218] sm:$0xff] %vm8228_vm1, %v11287_v7  ;;  %v11290_v28 = vadd.f32 %v10118_v17, %v14515_v49  ;;  %v4142_v33 = vpop.f32.mrb[69].mxu1  ;;  %v7678_v22 = vpop.f32.mrb[69].mxu0 }
 0x404   : > { %8295 = vst.msk [vmem:[%s14527_s29 + $0x210] sm:$0xff] %vm8228_vm1, %v11289_v12  ;;  %v11292_v30 = vadd.f32 %v4142_v33, %v14515_v49 }
 0x405   : > { %v11291_v20 = vadd.f32 %v11290_v28, %v10898_v25 }
 0x406   : > { %v11293_v38 = vadd.f32 %v11292_v30, %v7678_v22  ;;  %v10121_v19 = vpop.f32.mrb[70].mxu1  ;;  %v10901_v15 = vpop.f32.mrb[70].mxu0 }
 0x407   : > { %8298 = vst.msk [vmem:[%s14527_s29 + $0x228] sm:$0xff] %vm8228_vm1, %v11291_v20  ;;  %v11294_v32 = vadd.f32 %v10121_v19, %v14515_v49  ;;  %v4156_v44 = vpop.f32.mrb[71].mxu1  ;;  %v7690_v45 = vpop.f32.mrb[71].mxu0 }
 0x408   : > { %8297 = vst.msk [vmem:[%s14527_s29 + $0x220] sm:$0xff] %vm8228_vm1, %v11293_v38  ;;  %v11296_v23 = vadd.f32 %v4156_v44, %v14515_v49 }
 0x409   : > { %v11295_v61 = vadd.f32 %v11294_v32, %v10901_v15 }
 0x40a   : > { %v11297_v1 = vadd.f32 %v11296_v23, %v7690_v45  ;;  %v10124_v2 = vpop.f32.mrb[72].mxu1  ;;  %v10904_v10 = vpop.f32.mrb[72].mxu0 }
 0x40b   : > { %8300 = vst.msk [vmem:[%s14527_s29 + $0x238] sm:$0xff] %vm8228_vm1, %v11295_v61  ;;  %v11298_v41 = vadd.f32 %v10124_v2, %v14515_v49  ;;  %v4170_v21 = vpop.f32.mrb[73].mxu1  ;;  %v7702_v26 = vpop.f32.mrb[73].mxu0 }
 0x40c   : > { %8299 = vst.msk [vmem:[%s14527_s29 + $0x230] sm:$0xff] %vm8228_vm1, %v11297_v1  ;;  %v11300_v48 = vadd.f32 %v4170_v21, %v14515_v49 }
 0x40d   : > { %v11299_v0 = vadd.f32 %v11298_v41, %v10904_v10 }
 0x40e   : > { %v11301_v3 = vadd.f32 %v11300_v48, %v7702_v26  ;;  %v10127_v53 = vpop.f32.mrb[74].mxu1  ;;  %v10907_v43 = vpop.f32.mrb[74].mxu0 }
 0x40f   : > { %8302 = vst.msk [vmem:[%s14527_s29 + $0x248] sm:$0xff] %vm8228_vm1, %v11299_v0  ;;  %v11302_v58 = vadd.f32 %v10127_v53, %v14515_v49  ;;  %v4184_v34 = vpop.f32.mrb[75].mxu1  ;;  %v7714_v46 = vpop.f32.mrb[75].mxu0 }
 0x410   : > { %8301 = vst.msk [vmem:[%s14527_s29 + $0x240] sm:$0xff] %vm8228_vm1, %v11301_v3  ;;  %v11304_v51 = vadd.f32 %v4184_v34, %v14515_v49 }
 0x411   : > { %v11303_v11 = vadd.f32 %v11302_v58, %v10907_v43 }
 0x412   : > { %v11305_v18 = vadd.f32 %v11304_v51, %v7714_v46  ;;  %v10130_v37 = vpop.f32.mrb[76].mxu1  ;;  %v10910_v13 = vpop.f32.mrb[76].mxu0 }
 0x413   : > { %8304 = vst.msk [vmem:[%s14527_s29 + $0x258] sm:$0xff] %vm8228_vm1, %v11303_v11  ;;  %v11306_v4 = vadd.f32 %v10130_v37, %v14515_v49  ;;  %v4198_v16 = vpop.f32.mrb[77].mxu1  ;;  %v7726_v60 = vpop.f32.mrb[77].mxu0 }
 0x414   : > { %8303 = vst.msk [vmem:[%s14527_s29 + $0x250] sm:$0xff] %vm8228_vm1, %v11305_v18  ;;  %v11308_v63 = vadd.f32 %v4198_v16, %v14515_v49 }
 0x415   : > { %v11307_v52 = vadd.f32 %v11306_v4, %v10910_v13 }
 0x416   : > { %v11309_v8 = vadd.f32 %v11308_v63, %v7726_v60  ;;  %v10133_v24 = vpop.f32.mrb[78].mxu1  ;;  %v10913_v31 = vpop.f32.mrb[78].mxu0 }
 0x417   : > { %8306 = vst.msk [vmem:[%s14527_s29 + $0x268] sm:$0xff] %vm8228_vm1, %v11307_v52  ;;  %v11310_v39 = vadd.f32 %v10133_v24, %v14515_v49  ;;  %v4212_v40 = vpop.f32.mrb[79].mxu1  ;;  %v7738_v42 = vpop.f32.mrb[79].mxu0 }
 0x418   : > { %8305 = vst.msk [vmem:[%s14527_s29 + $0x260] sm:$0xff] %vm8228_vm1, %v11309_v8  ;;  %v11312_v54 = vadd.f32 %v4212_v40, %v14515_v49 }
 0x419   : > { %v11311_v55 = vadd.f32 %v11310_v39, %v10913_v31 }
 0x41a   : > { %v11313_v56 = vadd.f32 %v11312_v54, %v7738_v42  ;;  %v10136_v57 = vpop.f32.mrb[80].mxu1  ;;  %v10916_v27 = vpop.f32.mrb[80].mxu0 }
 0x41b   : > { %8308 = vst.msk [vmem:[%s14527_s29 + $0x278] sm:$0xff] %vm8228_vm1, %v11311_v55  ;;  %v11314_v35 = vadd.f32 %v10136_v57, %v14515_v49  ;;  %v4226_v36 = vpop.f32.mrb[81].mxu1  ;;  %v7750_v29 = vpop.f32.mrb[81].mxu0 }
 0x41c   : > { %8307 = vst.msk [vmem:[%s14527_s29 + $0x270] sm:$0xff] %vm8228_vm1, %v11313_v56  ;;  %v11316_v9 = vadd.f32 %v4226_v36, %v14515_v49 }
 0x41d   : > { %v11315_v47 = vadd.f32 %v11314_v35, %v10916_v27 }
 0x41e   : > { %v11317_v5 = vadd.f32 %v11316_v9, %v7750_v29  ;;  %v10139_v50 = vpop.f32.mrb[82].mxu1  ;;  %v10919_v62 = vpop.f32.mrb[82].mxu0 }
 0x41f   : > { %8310 = vst.msk [vmem:[%s14527_s29 + $0x288] sm:$0xff] %vm8228_vm1, %v11315_v47  ;;  %v11318_v14 = vadd.f32 %v10139_v50, %v14515_v49  ;;  %v4240_v59 = vpop.f32.mrb[83].mxu1  ;;  %v7762_v6 = vpop.f32.mrb[83].mxu0 }
 0x420   : > { %8309 = vst.msk [vmem:[%s14527_s29 + $0x280] sm:$0xff] %vm8228_vm1, %v11317_v5  ;;  %v11320_v7 = vadd.f32 %v4240_v59, %v14515_v49 }
 0x421   : > { %v11319_v12 = vadd.f32 %v11318_v14, %v10919_v62 }
 0x422   : > { %v11321_v17 = vadd.f32 %v11320_v7, %v7762_v6  ;;  %v10142_v25 = vpop.f32.mrb[84].mxu1  ;;  %v10922_v28 = vpop.f32.mrb[84].mxu0 }
 0x423   : > { %8312 = vst.msk [vmem:[%s14527_s29 + $0x298] sm:$0xff] %vm8228_vm1, %v11319_v12  ;;  %v11322_v33 = vadd.f32 %v10142_v25, %v14515_v49  ;;  %v4254_v22 = vpop.f32.mrb[85].mxu1  ;;  %v7774_v30 = vpop.f32.mrb[85].mxu0 }
 0x424   : > { %8311 = vst.msk [vmem:[%s14527_s29 + $0x290] sm:$0xff] %vm8228_vm1, %v11321_v17  ;;  %v11324_v20 = vadd.f32 %v4254_v22, %v14515_v49 }
 0x425   : > { %v11323_v38 = vadd.f32 %v11322_v33, %v10922_v28 }
 0x426   : > { %v11325_v19 = vadd.f32 %v11324_v20, %v7774_v30  ;;  %v10145_v15 = vpop.f32.mrb[86].mxu1  ;;  %v10925_v32 = vpop.f32.mrb[86].mxu0 }
 0x427   : > { %8314 = vst.msk [vmem:[%s14527_s29 + $0x2a8] sm:$0xff] %vm8228_vm1, %v11323_v38  ;;  %v11326_v44 = vadd.f32 %v10145_v15, %v14515_v49  ;;  %v4268_v45 = vpop.f32.mrb[87].mxu1  ;;  %v7786_v23 = vpop.f32.mrb[87].mxu0 }
 0x428   : > { %8313 = vst.msk [vmem:[%s14527_s29 + $0x2a0] sm:$0xff] %vm8228_vm1, %v11325_v19  ;;  %v11328_v61 = vadd.f32 %v4268_v45, %v14515_v49 }
 0x429   : > { %v11327_v1 = vadd.f32 %v11326_v44, %v10925_v32 }
 0x42a   : > { %v11329_v2 = vadd.f32 %v11328_v61, %v7786_v23  ;;  %v10148_v10 = vpop.f32.mrb[88].mxu1  ;;  %v10928_v41 = vpop.f32.mrb[88].mxu0 }
 0x42b   : > { %8316 = vst.msk [vmem:[%s14527_s29 + $0x2b8] sm:$0xff] %vm8228_vm1, %v11327_v1  ;;  %v11330_v21 = vadd.f32 %v10148_v10, %v14515_v49  ;;  %v4282_v26 = vpop.f32.mrb[89].mxu1  ;;  %v7798_v48 = vpop.f32.mrb[89].mxu0 }
 0x42c   : > { %8315 = vst.msk [vmem:[%s14527_s29 + $0x2b0] sm:$0xff] %vm8228_vm1, %v11329_v2  ;;  %v11332_v0 = vadd.f32 %v4282_v26, %v14515_v49 }
 0x42d   : > { %v11331_v3 = vadd.f32 %v11330_v21, %v10928_v41 }
 0x42e   : > { %v11333_v53 = vadd.f32 %v11332_v0, %v7798_v48  ;;  %v10151_v43 = vpop.f32.mrb[90].mxu1  ;;  %v10931_v58 = vpop.f32.mrb[90].mxu0 }
 0x42f   : > { %8318 = vst.msk [vmem:[%s14527_s29 + $0x2c8] sm:$0xff] %vm8228_vm1, %v11331_v3  ;;  %v11334_v34 = vadd.f32 %v10151_v43, %v14515_v49  ;;  %v4296_v46 = vpop.f32.mrb[91].mxu1  ;;  %v7810_v51 = vpop.f32.mrb[91].mxu0 }
 0x430   : > { %8317 = vst.msk [vmem:[%s14527_s29 + $0x2c0] sm:$0xff] %vm8228_vm1, %v11333_v53  ;;  %v11336_v11 = vadd.f32 %v4296_v46, %v14515_v49 }
 0x431   : > { %v11335_v18 = vadd.f32 %v11334_v34, %v10931_v58 }
 0x432   : > { %v11337_v37 = vadd.f32 %v11336_v11, %v7810_v51  ;;  %v10154_v13 = vpop.f32.mrb[92].mxu1  ;;  %v10934_v4 = vpop.f32.mrb[92].mxu0 }
 0x433   : > { %8320 = vst.msk [vmem:[%s14527_s29 + $0x2d8] sm:$0xff] %vm8228_vm1, %v11335_v18  ;;  %v11338_v16 = vadd.f32 %v10154_v13, %v14515_v49  ;;  %v4310_v60 = vpop.f32.mrb[93].mxu1  ;;  %v7822_v63 = vpop.f32.mrb[93].mxu0 }
 0x434   : > { %8319 = vst.msk [vmem:[%s14527_s29 + $0x2d0] sm:$0xff] %vm8228_vm1, %v11337_v37  ;;  %v11340_v52 = vadd.f32 %v4310_v60, %v14515_v49 }
 0x435   : > { %v11339_v8 = vadd.f32 %v11338_v16, %v10934_v4 }
 0x436   : > { %v11341_v24 = vadd.f32 %v11340_v52, %v7822_v63  ;;  %v10157_v31 = vpop.f32.mrb[94].mxu1  ;;  %v10937_v39 = vpop.f32.mrb[94].mxu0 }
 0x437   : > { %8322 = vst.msk [vmem:[%s14527_s29 + $0x2e8] sm:$0xff] %vm8228_vm1, %v11339_v8  ;;  %v11342_v40 = vadd.f32 %v10157_v31, %v14515_v49  ;;  %v4324_v42 = vpop.f32.mrb[95].mxu1  ;;  %v7834_v54 = vpop.f32.mrb[95].mxu0 }
 0x438   : > { %8321 = vst.msk [vmem:[%s14527_s29 + $0x2e0] sm:$0xff] %vm8228_vm1, %v11341_v24  ;;  %v11344_v55 = vadd.f32 %v4324_v42, %v14515_v49 }
 0x439   : > { %v11343_v56 = vadd.f32 %v11342_v40, %v10937_v39 }
 0x43a   : > { %v11345_v57 = vadd.f32 %v11344_v55, %v7834_v54  ;;  %v10160_v27 = vpop.f32.mrb[96].mxu1  ;;  %v10940_v35 = vpop.f32.mrb[96].mxu0 }
 0x43b   : > { %8324 = vst.msk [vmem:[%s14527_s29 + $0x2f8] sm:$0xff] %vm8228_vm1, %v11343_v56  ;;  %v11346_v36 = vadd.f32 %v10160_v27, %v14515_v49  ;;  %v4338_v29 = vpop.f32.mrb[97].mxu1  ;;  %v7846_v9 = vpop.f32.mrb[97].mxu0 }
 0x43c   : > { %8323 = vst.msk [vmem:[%s14527_s29 + $0x2f0] sm:$0xff] %vm8228_vm1, %v11345_v57  ;;  %v11348_v47 = vadd.f32 %v4338_v29, %v14515_v49 }
 0x43d   : > { %v11347_v5 = vadd.f32 %v11346_v36, %v10940_v35 }
 0x43e   : > { %v11349_v50 = vadd.f32 %v11348_v47, %v7846_v9  ;;  %v10163_v62 = vpop.f32.mrb[98].mxu1  ;;  %v10943_v14 = vpop.f32.mrb[98].mxu0 }
 0x43f   : > { %8326 = vst.msk [vmem:[%s14527_s29 + $0x308] sm:$0xff] %vm8228_vm1, %v11347_v5  ;;  %v11350_v59 = vadd.f32 %v10163_v62, %v14515_v49  ;;  %v4352_v6 = vpop.f32.mrb[99].mxu1  ;;  %v7858_v7 = vpop.f32.mrb[99].mxu0 }
 0x440   : > { %8325 = vst.msk [vmem:[%s14527_s29 + $0x300] sm:$0xff] %vm8228_vm1, %v11349_v50  ;;  %v11352_v12 = vadd.f32 %v4352_v6, %v14515_v49 }
 0x441   : > { %v11351_v17 = vadd.f32 %v11350_v59, %v10943_v14 }
 0x442   : > { %v11353_v25 = vadd.f32 %v11352_v12, %v7858_v7  ;;  %v10166_v28 = vpop.f32.mrb[100].mxu1  ;;  %v10946_v33 = vpop.f32.mrb[100].mxu0 }
 0x443   : > { %8328 = vst.msk [vmem:[%s14527_s29 + $0x318] sm:$0xff] %vm8228_vm1, %v11351_v17  ;;  %v11354_v22 = vadd.f32 %v10166_v28, %v14515_v49  ;;  %v4366_v30 = vpop.f32.mrb[101].mxu1  ;;  %v7870_v20 = vpop.f32.mrb[101].mxu0 }
 0x444   : > { %8327 = vst.msk [vmem:[%s14527_s29 + $0x310] sm:$0xff] %vm8228_vm1, %v11353_v25  ;;  %v11356_v38 = vadd.f32 %v4366_v30, %v14515_v49 }
 0x445   : > { %v11355_v19 = vadd.f32 %v11354_v22, %v10946_v33 }
 0x446   : > { %v11357_v15 = vadd.f32 %v11356_v38, %v7870_v20  ;;  %v10169_v32 = vpop.f32.mrb[102].mxu1  ;;  %v10949_v44 = vpop.f32.mrb[102].mxu0 }
 0x447   : > { %8330 = vst.msk [vmem:[%s14527_s29 + $0x328] sm:$0xff] %vm8228_vm1, %v11355_v19  ;;  %v11358_v45 = vadd.f32 %v10169_v32, %v14515_v49  ;;  %v4380_v23 = vpop.f32.mrb[103].mxu1  ;;  %v7882_v61 = vpop.f32.mrb[103].mxu0 }
 0x448   : > { %8329 = vst.msk [vmem:[%s14527_s29 + $0x320] sm:$0xff] %vm8228_vm1, %v11357_v15  ;;  %v11360_v1 = vadd.f32 %v4380_v23, %v14515_v49 }
 0x449   : > { %v11359_v2 = vadd.f32 %v11358_v45, %v10949_v44 }
 0x44a   : > { %v11361_v10 = vadd.f32 %v11360_v1, %v7882_v61  ;;  %v10172_v41 = vpop.f32.mrb[104].mxu1  ;;  %v10952_v21 = vpop.f32.mrb[104].mxu0 }
 0x44b   : > { %8332 = vst.msk [vmem:[%s14527_s29 + $0x338] sm:$0xff] %vm8228_vm1, %v11359_v2  ;;  %v11362_v26 = vadd.f32 %v10172_v41, %v14515_v49  ;;  %v4394_v48 = vpop.f32.mrb[105].mxu1  ;;  %v7894_v0 = vpop.f32.mrb[105].mxu0 }
 0x44c   : > { %8331 = vst.msk [vmem:[%s14527_s29 + $0x330] sm:$0xff] %vm8228_vm1, %v11361_v10  ;;  %v11364_v3 = vadd.f32 %v4394_v48, %v14515_v49 }
 0x44d   : > { %v11363_v53 = vadd.f32 %v11362_v26, %v10952_v21 }
 0x44e   : > { %v11365_v43 = vadd.f32 %v11364_v3, %v7894_v0  ;;  %v10175_v58 = vpop.f32.mrb[106].mxu1  ;;  %v10955_v34 = vpop.f32.mrb[106].mxu0 }
 0x44f   : > { %8334 = vst.msk [vmem:[%s14527_s29 + $0x348] sm:$0xff] %vm8228_vm1, %v11363_v53  ;;  %v11366_v46 = vadd.f32 %v10175_v58, %v14515_v49  ;;  %v4408_v51 = vpop.f32.mrb[107].mxu1  ;;  %v7906_v11 = vpop.f32.mrb[107].mxu0 }
 0x450   : > { %8333 = vst.msk [vmem:[%s14527_s29 + $0x340] sm:$0xff] %vm8228_vm1, %v11365_v43  ;;  %v11368_v18 = vadd.f32 %v4408_v51, %v14515_v49 }
 0x451   : > { %v11367_v37 = vadd.f32 %v11366_v46, %v10955_v34 }
 0x452   : > { %v11369_v13 = vadd.f32 %v11368_v18, %v7906_v11  ;;  %v10178_v4 = vpop.f32.mrb[108].mxu1  ;;  %v10958_v16 = vpop.f32.mrb[108].mxu0 }
 0x453   : > { %8336 = vst.msk [vmem:[%s14527_s29 + $0x358] sm:$0xff] %vm8228_vm1, %v11367_v37  ;;  %v11370_v60 = vadd.f32 %v10178_v4, %v14515_v49  ;;  %v4422_v63 = vpop.f32.mrb[109].mxu1  ;;  %v7918_v52 = vpop.f32.mrb[109].mxu0 }
 0x454   : > { %8335 = vst.msk [vmem:[%s14527_s29 + $0x350] sm:$0xff] %vm8228_vm1, %v11369_v13  ;;  %v11372_v8 = vadd.f32 %v4422_v63, %v14515_v49 }
 0x455   : > { %v11371_v24 = vadd.f32 %v11370_v60, %v10958_v16 }
 0x456   : > { %v11373_v31 = vadd.f32 %v11372_v8, %v7918_v52  ;;  %v10181_v39 = vpop.f32.mrb[110].mxu1  ;;  %v10961_v40 = vpop.f32.mrb[110].mxu0 }
 0x457   : > { %8338 = vst.msk [vmem:[%s14527_s29 + $0x368] sm:$0xff] %vm8228_vm1, %v11371_v24  ;;  %v11374_v42 = vadd.f32 %v10181_v39, %v14515_v49  ;;  %v4436_v54 = vpop.f32.mrb[111].mxu1  ;;  %v7930_v55 = vpop.f32.mrb[111].mxu0 }
 0x458   : > { %8337 = vst.msk [vmem:[%s14527_s29 + $0x360] sm:$0xff] %vm8228_vm1, %v11373_v31  ;;  %v11376_v56 = vadd.f32 %v4436_v54, %v14515_v49 }
 0x459   : > { %v11375_v57 = vadd.f32 %v11374_v42, %v10961_v40 }
 0x45a   : > { %v11377_v27 = vadd.f32 %v11376_v56, %v7930_v55  ;;  %v10184_v35 = vpop.f32.mrb[112].mxu1  ;;  %v10964_v36 = vpop.f32.mrb[112].mxu0 }
 0x45b   : > { %8340 = vst.msk [vmem:[%s14527_s29 + $0x378] sm:$0xff] %vm8228_vm1, %v11375_v57  ;;  %v11378_v29 = vadd.f32 %v10184_v35, %v14515_v49  ;;  %v4450_v9 = vpop.f32.mrb[113].mxu1  ;;  %v7942_v47 = vpop.f32.mrb[113].mxu0 }
 0x45c   : > { %8339 = vst.msk [vmem:[%s14527_s29 + $0x370] sm:$0xff] %vm8228_vm1, %v11377_v27  ;;  %v11380_v5 = vadd.f32 %v4450_v9, %v14515_v49 }
 0x45d   : > { %v11379_v50 = vadd.f32 %v11378_v29, %v10964_v36 }
 0x45e   : > { %v11381_v62 = vadd.f32 %v11380_v5, %v7942_v47  ;;  %v10187_v14 = vpop.f32.mrb[114].mxu1  ;;  %v10967_v59 = vpop.f32.mrb[114].mxu0 }
 0x45f   : > { %8342 = vst.msk [vmem:[%s14527_s29 + $0x388] sm:$0xff] %vm8228_vm1, %v11379_v50  ;;  %v11382_v6 = vadd.f32 %v10187_v14, %v14515_v49  ;;  %v4464_v7 = vpop.f32.mrb[115].mxu1  ;;  %v7954_v12 = vpop.f32.mrb[115].mxu0 }
 0x460   : > { %8341 = vst.msk [vmem:[%s14527_s29 + $0x380] sm:$0xff] %vm8228_vm1, %v11381_v62  ;;  %v11384_v17 = vadd.f32 %v4464_v7, %v14515_v49 }
 0x461   : > { %v11383_v25 = vadd.f32 %v11382_v6, %v10967_v59 }
 0x462   : > { %v11385_v28 = vadd.f32 %v11384_v17, %v7954_v12  ;;  %v10190_v33 = vpop.f32.mrb[116].mxu1  ;;  %v10970_v22 = vpop.f32.mrb[116].mxu0 }
 0x463   : > { %8344 = vst.msk [vmem:[%s14527_s29 + $0x398] sm:$0xff] %vm8228_vm1, %v11383_v25  ;;  %v11386_v30 = vadd.f32 %v10190_v33, %v14515_v49  ;;  %v4478_v20 = vpop.f32.mrb[117].mxu1  ;;  %v7966_v38 = vpop.f32.mrb[117].mxu0 }
 0x464   : > { %8343 = vst.msk [vmem:[%s14527_s29 + $0x390] sm:$0xff] %vm8228_vm1, %v11385_v28  ;;  %v11388_v19 = vadd.f32 %v4478_v20, %v14515_v49 }
 0x465   : > { %v11387_v15 = vadd.f32 %v11386_v30, %v10970_v22 }
 0x466   : > { %v11389_v32 = vadd.f32 %v11388_v19, %v7966_v38  ;;  %v10193_v44 = vpop.f32.mrb[118].mxu1  ;;  %v10973_v45 = vpop.f32.mrb[118].mxu0 }
 0x467   : > { %8346 = vst.msk [vmem:[%s14527_s29 + $0x3a8] sm:$0xff] %vm8228_vm1, %v11387_v15  ;;  %v11390_v23 = vadd.f32 %v10193_v44, %v14515_v49  ;;  %v4492_v61 = vpop.f32.mrb[119].mxu1  ;;  %v7978_v1 = vpop.f32.mrb[119].mxu0 }
 0x468   : > { %8345 = vst.msk [vmem:[%s14527_s29 + $0x3a0] sm:$0xff] %vm8228_vm1, %v11389_v32  ;;  %v11392_v2 = vadd.f32 %v4492_v61, %v14515_v49 }
 0x469   : > { %v11391_v10 = vadd.f32 %v11390_v23, %v10973_v45 }
 0x46a   : > { %v11393_v41 = vadd.f32 %v11392_v2, %v7978_v1  ;;  %v10196_v21 = vpop.f32.mrb[120].mxu1  ;;  %v10976_v26 = vpop.f32.mrb[120].mxu0 }
 0x46b   : > { %8348 = vst.msk [vmem:[%s14527_s29 + $0x3b8] sm:$0xff] %vm8228_vm1, %v11391_v10  ;;  %v11394_v48 = vadd.f32 %v10196_v21, %v14515_v49  ;;  %v4506_v0 = vpop.f32.mrb[121].mxu1  ;;  %v7990_v3 = vpop.f32.mrb[121].mxu0 }
 0x46c   : > { %8347 = vst.msk [vmem:[%s14527_s29 + $0x3b0] sm:$0xff] %vm8228_vm1, %v11393_v41  ;;  %v11396_v53 = vadd.f32 %v4506_v0, %v14515_v49 }
 0x46d   : > { %v11395_v43 = vadd.f32 %v11394_v48, %v10976_v26 }
 0x46e   : > { %v11397_v58 = vadd.f32 %v11396_v53, %v7990_v3  ;;  %v10199_v34 = vpop.f32.mrb[122].mxu1  ;;  %v10979_v46 = vpop.f32.mrb[122].mxu0 }
 0x46f   : > { %8350 = vst.msk [vmem:[%s14527_s29 + $0x3c8] sm:$0xff] %vm8228_vm1, %v11395_v43  ;;  %v11398_v51 = vadd.f32 %v10199_v34, %v14515_v49  ;;  %v4520_v11 = vpop.f32.mrb[123].mxu1  ;;  %v8002_v18 = vpop.f32.mrb[123].mxu0 }
 0x470   : > { %8349 = vst.msk [vmem:[%s14527_s29 + $0x3c0] sm:$0xff] %vm8228_vm1, %v11397_v58  ;;  %v11400_v37 = vadd.f32 %v4520_v11, %v14515_v49 }
 0x471   : > { %v11399_v13 = vadd.f32 %v11398_v51, %v10979_v46 }
 0x472   : > { %v11401_v4 = vadd.f32 %v11400_v37, %v8002_v18  ;;  %v10202_v16 = vpop.f32.mrb[124].mxu1  ;;  %v10982_v60 = vpop.f32.mrb[124].mxu0 }
 0x473   : > { %8352 = vst.msk [vmem:[%s14527_s29 + $0x3d8] sm:$0xff] %vm8228_vm1, %v11399_v13  ;;  %v11402_v63 = vadd.f32 %v10202_v16, %v14515_v49  ;;  %v4534_v52 = vpop.f32.mrb[125].mxu1  ;;  %v8014_v8 = vpop.f32.mrb[125].mxu0 }
 0x474   : > { %8351 = vst.msk [vmem:[%s14527_s29 + $0x3d0] sm:$0xff] %vm8228_vm1, %v11401_v4  ;;  %v11404_v24 = vadd.f32 %v4534_v52, %v14515_v49 }
 0x475   : > { %v11403_v31 = vadd.f32 %v11402_v63, %v10982_v60 }
 0x476   : > { %v11405_v39 = vadd.f32 %v11404_v24, %v8014_v8  ;;  %v10205_v40 = vpop.f32.mrb[126].mxu1  ;;  %v10985_v42 = vpop.f32.mrb[126].mxu0 }
 0x477   : > { %8354 = vst.msk [vmem:[%s14527_s29 + $0x3e8] sm:$0xff] %vm8228_vm1, %v11403_v31  ;;  %v11406_v54 = vadd.f32 %v10205_v40, %v14515_v49  ;;  %v4548_v55 = vpop.f32.mrb[127].mxu1  ;;  %v8026_v56 = vpop.f32.mrb[127].mxu0 }
 0x478   : > { %8353 = vst.msk [vmem:[%s14527_s29 + $0x3e0] sm:$0xff] %vm8228_vm1, %v11405_v39  ;;  %v11408_v57 = vadd.f32 %v4548_v55, %v14515_v49 }
 0x479   : > { %v11407_v27 = vadd.f32 %v11406_v54, %v10985_v42 }
 0x47a   : > { %v11409_v35 = vadd.f32 %v11408_v57, %v8026_v56  ;;  %v10208_v36 = vpop.f32.mrb[128].mxu1  ;;  %v10988_v29 = vpop.f32.mrb[128].mxu0 }
 0x47b   : > { %8356 = vst.msk [vmem:[%s14527_s29 + $0x3f8] sm:$0xff] %vm8228_vm1, %v11407_v27  ;;  %v11410_v9 = vadd.f32 %v10208_v36, %v14515_v49  ;;  %v4562_v47 = vpop.f32.mrb[129].mxu1  ;;  %v8038_v5 = vpop.f32.mrb[129].mxu0 }
 0x47c   : > { %8355 = vst.msk [vmem:[%s14527_s29 + $0x3f0] sm:$0xff] %vm8228_vm1, %v11409_v35  ;;  %v11412_v50 = vadd.f32 %v4562_v47, %v14515_v49 }
 0x47d   : > { %v11411_v62 = vadd.f32 %v11410_v9, %v10988_v29 }
 0x47e   : > { %v11413_v14 = vadd.f32 %v11412_v50, %v8038_v5  ;;  %v10211_v59 = vpop.f32.mrb[130].mxu1  ;;  %v10991_v6 = vpop.f32.mrb[130].mxu0 }
 0x47f   : > { %8358 = vst.msk [vmem:[%s14527_s29 + $0x408] sm:$0xff] %vm8228_vm1, %v11411_v62  ;;  %v11414_v7 = vadd.f32 %v10211_v59, %v14515_v49  ;;  %v4576_v12 = vpop.f32.mrb[131].mxu1  ;;  %v8050_v17 = vpop.f32.mrb[131].mxu0 }
 0x480   : > { %8357 = vst.msk [vmem:[%s14527_s29 + $0x400] sm:$0xff] %vm8228_vm1, %v11413_v14  ;;  %v11416_v25 = vadd.f32 %v4576_v12, %v14515_v49 }
 0x481   : > { %v11415_v28 = vadd.f32 %v11414_v7, %v10991_v6 }
 0x482   : > { %v11417_v33 = vadd.f32 %v11416_v25, %v8050_v17  ;;  %v10214_v22 = vpop.f32.mrb[132].mxu1  ;;  %v10994_v30 = vpop.f32.mrb[132].mxu0 }
 0x483   : > { %8360 = vst.msk [vmem:[%s14527_s29 + $0x418] sm:$0xff] %vm8228_vm1, %v11415_v28  ;;  %v11418_v20 = vadd.f32 %v10214_v22, %v14515_v49  ;;  %v4590_v38 = vpop.f32.mrb[133].mxu1  ;;  %v8062_v19 = vpop.f32.mrb[133].mxu0 }
 0x484   : > { %8359 = vst.msk [vmem:[%s14527_s29 + $0x410] sm:$0xff] %vm8228_vm1, %v11417_v33  ;;  %v11420_v15 = vadd.f32 %v4590_v38, %v14515_v49 }
 0x485   : > { %v11419_v32 = vadd.f32 %v11418_v20, %v10994_v30 }
 0x486   : > { %v11421_v44 = vadd.f32 %v11420_v15, %v8062_v19  ;;  %v10217_v45 = vpop.f32.mrb[134].mxu1  ;;  %v10997_v23 = vpop.f32.mrb[134].mxu0 }
 0x487   : > { %8362 = vst.msk [vmem:[%s14527_s29 + $0x428] sm:$0xff] %vm8228_vm1, %v11419_v32  ;;  %v11422_v61 = vadd.f32 %v10217_v45, %v14515_v49  ;;  %v4604_v1 = vpop.f32.mrb[135].mxu1  ;;  %v8074_v2 = vpop.f32.mrb[135].mxu0 }
 0x488   : > { %8361 = vst.msk [vmem:[%s14527_s29 + $0x420] sm:$0xff] %vm8228_vm1, %v11421_v44  ;;  %v11424_v10 = vadd.f32 %v4604_v1, %v14515_v49 }
 0x489   : > { %v11423_v41 = vadd.f32 %v11422_v61, %v10997_v23 }
 0x48a   : > { %v11425_v21 = vadd.f32 %v11424_v10, %v8074_v2  ;;  %v10220_v26 = vpop.f32.mrb[136].mxu1  ;;  %v11000_v48 = vpop.f32.mrb[136].mxu0 }
 0x48b   : > { %8364 = vst.msk [vmem:[%s14527_s29 + $0x438] sm:$0xff] %vm8228_vm1, %v11423_v41  ;;  %v11426_v0 = vadd.f32 %v10220_v26, %v14515_v49  ;;  %v4618_v3 = vpop.f32.mrb[137].mxu1  ;;  %v8086_v53 = vpop.f32.mrb[137].mxu0 }
 0x48c   : > { %8363 = vst.msk [vmem:[%s14527_s29 + $0x430] sm:$0xff] %vm8228_vm1, %v11425_v21  ;;  %v11428_v43 = vadd.f32 %v4618_v3, %v14515_v49 }
 0x48d   : > { %v11427_v58 = vadd.f32 %v11426_v0, %v11000_v48 }
 0x48e   : > { %v11429_v34 = vadd.f32 %v11428_v43, %v8086_v53  ;;  %v10223_v46 = vpop.f32.mrb[138].mxu1  ;;  %v11003_v51 = vpop.f32.mrb[138].mxu0 }
 0x48f   : > { %8366 = vst.msk [vmem:[%s14527_s29 + $0x448] sm:$0xff] %vm8228_vm1, %v11427_v58  ;;  %v11430_v11 = vadd.f32 %v10223_v46, %v14515_v49  ;;  %v4632_v18 = vpop.f32.mrb[139].mxu1  ;;  %v8098_v37 = vpop.f32.mrb[139].mxu0 }
 0x490   : > { %8365 = vst.msk [vmem:[%s14527_s29 + $0x440] sm:$0xff] %vm8228_vm1, %v11429_v34  ;;  %v11432_v13 = vadd.f32 %v4632_v18, %v14515_v49 }
 0x491   : > { %v11431_v4 = vadd.f32 %v11430_v11, %v11003_v51 }
 0x492   : > { %v11433_v16 = vadd.f32 %v11432_v13, %v8098_v37  ;;  %v10226_v60 = vpop.f32.mrb[140].mxu1  ;;  %v11006_v63 = vpop.f32.mrb[140].mxu0 }
 0x493   : > { %8368 = vst.msk [vmem:[%s14527_s29 + $0x458] sm:$0xff] %vm8228_vm1, %v11431_v4  ;;  %v11434_v52 = vadd.f32 %v10226_v60, %v14515_v49  ;;  %v4646_v8 = vpop.f32.mrb[141].mxu1  ;;  %v8110_v24 = vpop.f32.mrb[141].mxu0 }
 0x494   : > { %8367 = vst.msk [vmem:[%s14527_s29 + $0x450] sm:$0xff] %vm8228_vm1, %v11433_v16  ;;  %v11436_v31 = vadd.f32 %v4646_v8, %v14515_v49 }
 0x495   : > { %v11435_v39 = vadd.f32 %v11434_v52, %v11006_v63 }
 0x496   : > { %v11437_v40 = vadd.f32 %v11436_v31, %v8110_v24  ;;  %v10229_v42 = vpop.f32.mrb[142].mxu1  ;;  %v11009_v54 = vpop.f32.mrb[142].mxu0 }
 0x497   : > { %8370 = vst.msk [vmem:[%s14527_s29 + $0x468] sm:$0xff] %vm8228_vm1, %v11435_v39  ;;  %v11438_v55 = vadd.f32 %v10229_v42, %v14515_v49  ;;  %v4660_v56 = vpop.f32.mrb[143].mxu1  ;;  %v8122_v57 = vpop.f32.mrb[143].mxu0 }
 0x498   : > { %8369 = vst.msk [vmem:[%s14527_s29 + $0x460] sm:$0xff] %vm8228_vm1, %v11437_v40  ;;  %v11440_v27 = vadd.f32 %v4660_v56, %v14515_v49 }
 0x499   : > { %v11439_v35 = vadd.f32 %v11438_v55, %v11009_v54 }
 0x49a   : > { %v11441_v36 = vadd.f32 %v11440_v27, %v8122_v57  ;;  %v10232_v29 = vpop.f32.mrb[144].mxu1  ;;  %v11012_v9 = vpop.f32.mrb[144].mxu0 }
 0x49b   : > { %8372 = vst.msk [vmem:[%s14527_s29 + $0x478] sm:$0xff] %vm8228_vm1, %v11439_v35  ;;  %v11442_v47 = vadd.f32 %v10232_v29, %v14515_v49  ;;  %v4674_v5 = vpop.f32.mrb[145].mxu1  ;;  %v8134_v50 = vpop.f32.mrb[145].mxu0 }
 0x49c   : > { %8371 = vst.msk [vmem:[%s14527_s29 + $0x470] sm:$0xff] %vm8228_vm1, %v11441_v36  ;;  %v11444_v62 = vadd.f32 %v4674_v5, %v14515_v49 }
 0x49d   : > { %v11443_v14 = vadd.f32 %v11442_v47, %v11012_v9 }
 0x49e   : > { %v11445_v59 = vadd.f32 %v11444_v62, %v8134_v50  ;;  %v10235_v6 = vpop.f32.mrb[146].mxu1  ;;  %v11015_v7 = vpop.f32.mrb[146].mxu0 }
 0x49f   : > { %8374 = vst.msk [vmem:[%s14527_s29 + $0x488] sm:$0xff] %vm8228_vm1, %v11443_v14  ;;  %v11446_v12 = vadd.f32 %v10235_v6, %v14515_v49  ;;  %v4688_v17 = vpop.f32.mrb[147].mxu1  ;;  %v8146_v25 = vpop.f32.mrb[147].mxu0 }
 0x4a0   : > { %8373 = vst.msk [vmem:[%s14527_s29 + $0x480] sm:$0xff] %vm8228_vm1, %v11445_v59  ;;  %v11448_v28 = vadd.f32 %v4688_v17, %v14515_v49 }
 0x4a1   : > { %v11447_v33 = vadd.f32 %v11446_v12, %v11015_v7 }
 0x4a2   : > { %v11449_v22 = vadd.f32 %v11448_v28, %v8146_v25  ;;  %v10238_v30 = vpop.f32.mrb[148].mxu1  ;;  %v11018_v20 = vpop.f32.mrb[148].mxu0 }
 0x4a3   : > { %8376 = vst.msk [vmem:[%s14527_s29 + $0x498] sm:$0xff] %vm8228_vm1, %v11447_v33  ;;  %v11450_v38 = vadd.f32 %v10238_v30, %v14515_v49  ;;  %v4702_v19 = vpop.f32.mrb[149].mxu1  ;;  %v8158_v15 = vpop.f32.mrb[149].mxu0 }
 0x4a4   : > { %8375 = vst.msk [vmem:[%s14527_s29 + $0x490] sm:$0xff] %vm8228_vm1, %v11449_v22  ;;  %v11452_v32 = vadd.f32 %v4702_v19, %v14515_v49 }
 0x4a5   : > { %v11451_v44 = vadd.f32 %v11450_v38, %v11018_v20 }
 0x4a6   : > { %v11453_v45 = vadd.f32 %v11452_v32, %v8158_v15  ;;  %v10241_v23 = vpop.f32.mrb[150].mxu1  ;;  %v11021_v61 = vpop.f32.mrb[150].mxu0 }
 0x4a7   : > { %8378 = vst.msk [vmem:[%s14527_s29 + $0x4a8] sm:$0xff] %vm8228_vm1, %v11451_v44  ;;  %v11454_v1 = vadd.f32 %v10241_v23, %v14515_v49  ;;  %v4716_v2 = vpop.f32.mrb[151].mxu1  ;;  %v8170_v10 = vpop.f32.mrb[151].mxu0 }
 0x4a8   : > { %8377 = vst.msk [vmem:[%s14527_s29 + $0x4a0] sm:$0xff] %vm8228_vm1, %v11453_v45  ;;  %v11456_v41 = vadd.f32 %v4716_v2, %v14515_v49 }
 0x4a9   : > { %v11455_v21 = vadd.f32 %v11454_v1, %v11021_v61 }
 0x4aa   : > { %v11457_v26 = vadd.f32 %v11456_v41, %v8170_v10  ;;  %v10244_v48 = vpop.f32.mrb[152].mxu1  ;;  %v11024_v0 = vpop.f32.mrb[152].mxu0 }
 0x4ab   : > { %8380 = vst.msk [vmem:[%s14527_s29 + $0x4b8] sm:$0xff] %vm8228_vm1, %v11455_v21  ;;  %v11458_v3 = vadd.f32 %v10244_v48, %v14515_v49  ;;  %v4730_v53 = vpop.f32.mrb[153].mxu1  ;;  %v8182_v43 = vpop.f32.mrb[153].mxu0 }
 0x4ac   : > { %8379 = vst.msk [vmem:[%s14527_s29 + $0x4b0] sm:$0xff] %vm8228_vm1, %v11457_v26  ;;  %v11460_v58 = vadd.f32 %v4730_v53, %v14515_v49 }
 0x4ad   : > { %v11459_v34 = vadd.f32 %v11458_v3, %v11024_v0 }
 0x4ae   : > { %v11461_v46 = vadd.f32 %v11460_v58, %v8182_v43  ;;  %v10247_v51 = vpop.f32.mrb[154].mxu1  ;;  %v11027_v11 = vpop.f32.mrb[154].mxu0 }
 0x4af   : > { %8382 = vst.msk [vmem:[%s14527_s29 + $0x4c8] sm:$0xff] %vm8228_vm1, %v11459_v34  ;;  %v11462_v18 = vadd.f32 %v10247_v51, %v14515_v49  ;;  %v4744_v37 = vpop.f32.mrb[155].mxu1  ;;  %v8194_v13 = vpop.f32.mrb[155].mxu0 }
 0x4b0   : > { %8381 = vst.msk [vmem:[%s14527_s29 + $0x4c0] sm:$0xff] %vm8228_vm1, %v11461_v46  ;;  %v11464_v4 = vadd.f32 %v4744_v37, %v14515_v49 }
 0x4b1   : > { %v11463_v16 = vadd.f32 %v11462_v18, %v11027_v11 }
 0x4b2   : > { %v11465_v60 = vadd.f32 %v11464_v4, %v8194_v13  ;;  %v10250_v63 = vpop.f32.mrb[156].mxu1  ;;  %v11030_v52 = vpop.f32.mrb[156].mxu0 }
 0x4b3   : > { %8384 = vst.msk [vmem:[%s14527_s29 + $0x4d8] sm:$0xff] %vm8228_vm1, %v11463_v16  ;;  %v11466_v8 = vadd.f32 %v10250_v63, %v14515_v49  ;;  %v4758_v24 = vpop.f32.mrb[157].mxu1  ;;  %v8206_v31 = vpop.f32.mrb[157].mxu0 }
 0x4b4   : > { %8383 = vst.msk [vmem:[%s14527_s29 + $0x4d0] sm:$0xff] %vm8228_vm1, %v11465_v60  ;;  %v11468_v39 = vadd.f32 %v4758_v24, %v14515_v49 }
 0x4b5   : > { %v11467_v40 = vadd.f32 %v11466_v8, %v11030_v52 }
 0x4b6   : > { %v11469_v42 = vadd.f32 %v11468_v39, %v8206_v31  ;;  %v10253_v54 = vpop.f32.mrb[158].mxu1  ;;  %v11033_v55 = vpop.f32.mrb[158].mxu0 }
 0x4b7   : > { %8386 = vst.msk [vmem:[%s14527_s29 + $0x4e8] sm:$0xff] %vm8228_vm1, %v11467_v40  ;;  %v11470_v56 = vadd.f32 %v10253_v54, %v14515_v49  ;;  %v4772_v57 = vpop.f32.mrb[159].mxu1  ;;  %v8218_v27 = vpop.f32.mrb[159].mxu0 }
 0x4b8   : > { %8385 = vst.msk [vmem:[%s14527_s29 + $0x4e0] sm:$0xff] %vm8228_vm1, %v11469_v42  ;;  %v11472_v35 = vadd.f32 %v4772_v57, %v14515_v49 }
 0x4b9   : > { %v11471_v36 = vadd.f32 %v11470_v56, %v11033_v55 }
 0x4ba   : > { %v11473_v29 = vadd.f32 %v11472_v35, %v8218_v27 }
 0x4bb   : > { %8388 = vst.msk [vmem:[%s14527_s29 + $0x4f8] sm:$0xff] %vm8228_vm1, %v11471_v36 }
 0x4bc   : > { %8387 = vst.msk [vmem:[%s14527_s29 + $0x4f0] sm:$0xff] %vm8228_vm1, %v11473_v29 }
 0x4bd PF: > { %s14_s14 = sadd.s32 1, %s12134_s14  }
 0x4be   : > { %p11_p4 = scmp.ge.s32.totalorder %s14_s14, 4  }
 0x4c0   :  { %13 = sbr.rel (!%p11_p4) target bundleno = 2 (0x2), region = 62 }

</bundles_post_ra>
